<compile_context>
chip_gen: v7x
topology: tpu7x:2x2x1
jax: 0.10.0
libtpu: 0.0.40
codegen_flags: <defaults>
</compile_context>

<pallas_src>
import math

import jax
import jax.numpy as jnp
from jax.experimental import pallas as pl
from jax.experimental.pallas import tpu as pltpu

# ----- model hyper-parameters (small, T5-like) ------------------------------
D_MODEL = 32
D_KV = 8
N_HEADS = 4
D_FF = 64
N_LAYERS = 2
VOCAB = 64
NUM_BUCKETS = 32          # T5 relative_attention_num_buckets
MAX_DISTANCE = 128        # T5 relative_attention_max_distance
EPS = 1e-6                # T5LayerNorm eps
PADDING_IDX = 0
NEG_INF = -1e9            # large finite sentinel (finfo.min risks -inf / NaN)

INNER = N_HEADS * D_KV


# ============================ Pallas kernel =================================

def _decoder_stack_kernel(hid_ref, enc_ref, posb_ref, selfm_ref, crossm_ref,
                          ln_self_ref, w_qkv_ref, w_o_ref,
                          ln_cross_ref, w_cq_ref, w_ckv_ref, w_co_ref,
                          ln_ff_ref, w_wi_ref, w_wo_ref, ln_final_ref,
                          out_ref):
    """Runs the full T5 decoder stack for one block of Bb batch elements."""
    Bb, Sq, D = hid_ref.shape
    Se = enc_ref.shape[1]
    H = posb_ref.shape[0]
    dkv = D_KV
    inner = H * dkv
    f32 = jnp.float32
    bf16 = jnp.bfloat16

    def rms(x, w):
        # T5LayerNorm: no mean subtraction, no bias.
        var = jnp.mean(x * x, axis=-1, keepdims=True)
        return x * jax.lax.rsqrt(var + EPS) * w

    def mm(a, b_bf16):
        # MXU matmul: bf16 operands, f32 accumulation.
        return jnp.dot(a.astype(bf16), b_bf16, preferred_element_type=f32)

    # Flatten the batch into rows: every projection / norm runs on (Bb*Sq, D).
    hidden = hid_ref[...].astype(f32).reshape(Bb * Sq, D)
    enc = enc_ref[...].astype(f32).reshape(Bb * Se, D)

    # Per-batch additive biases, stacked along heads -> (H*Sq, Sk), built ONCE
    # before the layer loop (hoisted; JAX does not CSE broadcasts).
    posb = posb_ref[...]                                           # (H, Sq, Sq)
    self_bias = [
        (posb + selfm_ref[b][None, :, :]).reshape(H * Sq, Sq) for b in range(Bb)
    ]
    cross_bias = [
        jnp.broadcast_to(crossm_ref[b], (H * Sq, Se)) for b in range(Bb)
    ]

    def attend(q2d, k2d, v2d, bias):
        """q2d: (Sq, inner) bf16, k2d/v2d: (Sk, inner) bf16, bias: (H*Sq, Sk).

        Returns the (Sq, inner) per-row context (O projection applied later as
        one matmul over the whole flattened block)."""
        contract_last = (((1,), (1,)), ((), ()))   # q @ k^T without kh.T
        # Per-head scores stacked along sublanes -> ONE softmax over all heads.
        s = jnp.concatenate(
            [jax.lax.dot_general(q2d[:, h * dkv:(h + 1) * dkv],
                                 k2d[:, h * dkv:(h + 1) * dkv],
                                 contract_last, preferred_element_type=f32)
             for h in range(H)], axis=0)           # (H*Sq, Sk)
        # T5 attention has NO 1/sqrt(dk) scaling; bias is additive.
        s = s + bias
        s = s - jnp.max(s, axis=-1, keepdims=True)
        p = jnp.exp(s)
        p = p * pl.reciprocal(jnp.sum(p, axis=-1, keepdims=True), approx=True)
        p = p.astype(bf16)
        # Each head's P @ V goes to its lane slice of the (Sq, inner) context.
        ctx = jnp.concatenate(
            [jnp.dot(p[h * Sq:(h + 1) * Sq, :], v2d[:, h * dkv:(h + 1) * dkv],
                     preferred_element_type=f32)
             for h in range(H)], axis=1)           # (Sq, inner)
        return ctx

    for l in range(N_LAYERS):
        # --- self attention block ---
        normed = rms(hidden, ln_self_ref[l])
        qkv = mm(normed, w_qkv_ref[l])                       # (Bb*Sq, 3*inner)
        q = qkv[:, :inner].astype(bf16)
        k = qkv[:, inner:2 * inner].astype(bf16)
        v = qkv[:, 2 * inner:].astype(bf16)
        ctx = jnp.concatenate(
            [attend(q[b * Sq:(b + 1) * Sq], k[b * Sq:(b + 1) * Sq],
                    v[b * Sq:(b + 1) * Sq], self_bias[b])
             for b in range(Bb)], axis=0)                     # (Bb*Sq, inner)
        hidden = hidden + mm(ctx, w_o_ref[l])                 # single O matmul

        # --- cross attention block ---
        normed = rms(hidden, ln_cross_ref[l])
        q = mm(normed, w_cq_ref[l]).astype(bf16)              # (Bb*Sq, inner)
        kv = mm(enc, w_ckv_ref[l])                            # (Bb*Se, 2*inner)
        kc = kv[:, :inner].astype(bf16)
        vc = kv[:, inner:].astype(bf16)
        ctx = jnp.concatenate(
            [attend(q[b * Sq:(b + 1) * Sq], kc[b * Se:(b + 1) * Se],
                    vc[b * Se:(b + 1) * Se], cross_bias[b])
             for b in range(Bb)], axis=0)
        hidden = hidden + mm(ctx, w_co_ref[l])

        # --- feed-forward block (DenseReluDense; dropout = identity in eval) --
        normed = rms(hidden, ln_ff_ref[l])
        ff = jnp.maximum(mm(normed, w_wi_ref[l]), 0.0)
        hidden = hidden + mm(ff, w_wo_ref[l])

    out = rms(hidden, ln_final_ref[...])
    out_ref[...] = out.reshape(Bb, Sq, D).astype(out_ref.dtype)


# ============================ JAX glue ======================================

def _relative_position_bucket(relative_position):
    # T5 decoder: bidirectional=False
    num_buckets = NUM_BUCKETS
    relative_position = -jnp.minimum(relative_position, 0)
    max_exact = num_buckets // 2
    is_small = relative_position < max_exact
    rel_f = relative_position.astype(jnp.float32)
    # Guard log(0): the small branch is selected by `where` anyway.
    rel_if_large = max_exact + (
        jnp.log(jnp.maximum(rel_f, 1.0) / max_exact)
        / math.log(MAX_DISTANCE / max_exact)
        * (num_buckets - max_exact)
    ).astype(jnp.int32)
    rel_if_large = jnp.minimum(rel_if_large, num_buckets - 1)
    return jnp.where(is_small, relative_position, rel_if_large)


def compute_position_bias(rel_emb, q_len, k_len):
    context_position = jnp.arange(q_len)[:, None]
    memory_position = jnp.arange(k_len)[None, :]
    buckets = _relative_position_bucket(memory_position - context_position)  # (q,k)
    values = rel_emb[buckets]                                                # (q,k,H)
    return jnp.transpose(values, (2, 0, 1))                                  # (H,q,k)


def init_params(key):
    def nrm(k, shape, scale=0.05):
        return scale * jax.random.normal(k, shape, jnp.float32)

    keys = iter(jax.random.split(key, 8 + N_LAYERS * 16))
    per_layer = []
    for _ in range(N_LAYERS):
        per_layer.append(dict(
            q=nrm(next(keys), (D_MODEL, INNER)),
            k=nrm(next(keys), (D_MODEL, INNER)),
            v=nrm(next(keys), (D_MODEL, INNER)),
            o=nrm(next(keys), (INNER, D_MODEL)),
            cq=nrm(next(keys), (D_MODEL, INNER)),
            ck=nrm(next(keys), (D_MODEL, INNER)),
            cv=nrm(next(keys), (D_MODEL, INNER)),
            co=nrm(next(keys), (INNER, D_MODEL)),
            wi=nrm(next(keys), (D_MODEL, D_FF)),
            wo=nrm(next(keys), (D_FF, D_MODEL)),
        ))

    def stack(name):
        return jnp.stack([layer[name] for layer in per_layer])

    return dict(
        embed=nrm(next(keys), (VOCAB, D_MODEL), scale=1.0),
        rel_bias=nrm(next(keys), (NUM_BUCKETS, N_HEADS), scale=0.1),
        ln_final=jnp.ones((1, D_MODEL), jnp.float32),
        # distinct arrays per norm type (no aliasing if real weights are ported)
        ln_self=jnp.ones((N_LAYERS, 1, D_MODEL), jnp.float32),
        ln_cross=jnp.ones((N_LAYERS, 1, D_MODEL), jnp.float32),
        ln_ff=jnp.ones((N_LAYERS, 1, D_MODEL), jnp.float32),
        qkv=jnp.concatenate([stack("q"), stack("k"), stack("v")], axis=2),
        o=stack("o"),
        cq=stack("cq"),
        ckv=jnp.concatenate([stack("ck"), stack("cv")], axis=2),
        co=stack("co"),
        wi=stack("wi"),
        wo=stack("wo"),
    )


def parlai_t5_decoder_forward(params, input_ids, encoder_state, incr_state=None,
                              padding_idx=PADDING_IDX, num_blocks=1):
    """Mirrors ParlaiT5Decoder.forward: returns (last_hidden_state, incr_state).

    num_blocks = number of grid steps.  1 (default) is best on single-TC
    v5e/v6e; use 2 on v7x so each TensorCore gets one fat batch block.
    """
    encoder_output, encoder_mask = encoder_state
    B, Sq = input_ids.shape
    Se = encoder_output.shape[1]
    assert B % num_blocks == 0
    Bb = B // num_blocks
    bf16 = jnp.bfloat16

    # mask = input != padding_idx; mask[:, 0] = True
    mask = (input_ids != padding_idx).at[:, 0].set(True)

    # token embedding (gather is glue; T5Stack does NOT scale embeddings)
    hidden0 = params["embed"][input_ids].astype(jnp.float32)          # (B, Sq, D)

    # self-attention additive mask: causal & decoder padding  -> (B, Sq, Sq)
    causal = jnp.tril(jnp.ones((Sq, Sq), jnp.float32))
    ext = mask.astype(jnp.float32)[:, None, :] * causal[None, :, :]
    self_mask = (1.0 - ext) * NEG_INF

    # relative-position bias shared across layers -> (H, Sq, Sq)
    pos_bias = compute_position_bias(params["rel_bias"], Sq, Sq)

    # cross-attention additive mask (encoder padding only) -> (B, 1, Se)
    cross_mask = ((1.0 - encoder_mask.astype(jnp.float32)) * NEG_INF)[:, None, :]

    enc = encoder_output.astype(jnp.float32)

    full3 = lambda b: (0, 0, 0)
    batch3 = lambda b: (b, 0, 0)

    out = pl.pallas_call(
        _decoder_stack_kernel,
        out_shape=jax.ShapeDtypeStruct((B, Sq, D_MODEL), jnp.float32),
        grid=(num_blocks,),
        in_specs=[
            pl.BlockSpec((Bb, Sq, D_MODEL), batch3),                   # embedded tokens
            pl.BlockSpec((Bb, Se, D_MODEL), batch3),                   # encoder output
            pl.BlockSpec((N_HEADS, Sq, Sq), full3),                    # rel-pos bias
            pl.BlockSpec((Bb, Sq, Sq), batch3),                        # self additive mask
            pl.BlockSpec((Bb, 1, Se), batch3),                         # cross additive mask
            pl.BlockSpec((N_LAYERS, 1, D_MODEL), full3),               # ln_self
            pl.BlockSpec((N_LAYERS, D_MODEL, 3 * INNER), full3),       # fused QKV (bf16)
            pl.BlockSpec((N_LAYERS, INNER, D_MODEL), full3),           # O (bf16)
            pl.BlockSpec((N_LAYERS, 1, D_MODEL), full3),               # ln_cross
            pl.BlockSpec((N_LAYERS, D_MODEL, INNER), full3),           # cross Q (bf16)
            pl.BlockSpec((N_LAYERS, D_MODEL, 2 * INNER), full3),       # fused cross KV (bf16)
            pl.BlockSpec((N_LAYERS, INNER, D_MODEL), full3),           # cross O (bf16)
            pl.BlockSpec((N_LAYERS, 1, D_MODEL), full3),               # ln_ff
            pl.BlockSpec((N_LAYERS, D_MODEL, D_FF), full3),            # wi (bf16)
            pl.BlockSpec((N_LAYERS, D_FF, D_MODEL), full3),            # wo (bf16)
            pl.BlockSpec((1, D_MODEL), lambda b: (0, 0)),              # ln_final
        ],
        out_specs=pl.BlockSpec((Bb, Sq, D_MODEL), batch3),
        compiler_params=pltpu.CompilerParams(
            dimension_semantics=("parallel",)),
    )(hidden0, enc, pos_bias, self_mask, cross_mask,
      params["ln_self"], params["qkv"].astype(bf16), params["o"].astype(bf16),
      params["ln_cross"], params["cq"].astype(bf16), params["ckv"].astype(bf16),
      params["co"].astype(bf16),
      params["ln_ff"], params["wi"].astype(bf16), params["wo"].astype(bf16),
      params["ln_final"])

    # TODO(synk): incremental decoding state (incr_state) is passed through
    # untouched, exactly as in the reference module (it never reaches the stack).
    return out, incr_state


# ============================ main ==========================================

if __name__ == "__main__":
    key = jax.random.PRNGKey(0)
    kp, ki, ke = jax.random.split(key, 3)

    params = init_params(kp)

    B, Sq, Se = 2, 8, 8
    input_ids = jax.random.randint(ki, (B, Sq), 1, VOCAB)
    input_ids = input_ids.at[0, -2:].set(PADDING_IDX)   # some padding tokens

    encoder_output = jax.random.normal(ke, (B, Se, D_MODEL), jnp.float32)
    encoder_mask = jnp.ones((B, Se), dtype=jnp.bool_).at[1, -3:].set(False)

    out, incr = parlai_t5_decoder_forward(
        params, input_ids, (encoder_output, encoder_mask), incr_state=None
    )
    out = jax.block_until_ready(out)

    assert out.shape == (B, Sq, D_MODEL)
    assert bool(jnp.all(jnp.isfinite(out)))
    print("KERNEL_OK")
</pallas_src>

<mosaic_0001>
module attributes {stable_mosaic.version = 11 : i64} {
  func.func @_decoder_stack_kernel(%arg0: i32, %arg1: memref<2x8x32xf32, #tpu.memory_space<vmem>>, %arg2: memref<2x8x32xf32, #tpu.memory_space<vmem>>, %arg3: memref<4x8x8xf32, #tpu.memory_space<vmem>>, %arg4: memref<2x8x8xf32, #tpu.memory_space<vmem>>, %arg5: memref<2x1x8xf32, #tpu.memory_space<vmem>>, %arg6: memref<2x1x32xf32, #tpu.memory_space<vmem>>, %arg7: memref<2x32x96xbf16, #tpu.memory_space<vmem>>, %arg8: memref<2x32x32xbf16, #tpu.memory_space<vmem>>, %arg9: memref<2x1x32xf32, #tpu.memory_space<vmem>>, %arg10: memref<2x32x32xbf16, #tpu.memory_space<vmem>>, %arg11: memref<2x32x64xbf16, #tpu.memory_space<vmem>>, %arg12: memref<2x32x32xbf16, #tpu.memory_space<vmem>>, %arg13: memref<2x1x32xf32, #tpu.memory_space<vmem>>, %arg14: memref<2x32x64xbf16, #tpu.memory_space<vmem>>, %arg15: memref<2x64x32xbf16, #tpu.memory_space<vmem>>, %arg16: memref<1x32xf32, #tpu.memory_space<vmem>>, %arg17: memref<2x8x32xf32, #tpu.memory_space<vmem>>) attributes {dimension_semantics = [#tpu.dimension_semantics<parallel>], iteration_bounds = array<i64: 1>, scalar_prefetch = 0 : i64, scratch_operands = 0 : i64, tpu.core_type = #tpu.core_type<tc>, window_params = [{transform_indices = @transform_0, window_bounds = array<i64: 2, 8, 32>}, {transform_indices = @transform_1, window_bounds = array<i64: 2, 8, 32>}, {pipeline_mode = #tpu.pipeline_mode<synchronous>, transform_indices = @transform_2, window_bounds = array<i64: 4, 8, 8>}, {transform_indices = @transform_3, window_bounds = array<i64: 2, 8, 8>}, {transform_indices = @transform_4, window_bounds = array<i64: 2, 1, 8>}, {pipeline_mode = #tpu.pipeline_mode<synchronous>, transform_indices = @transform_5, window_bounds = array<i64: 2, 1, 32>}, {pipeline_mode = #tpu.pipeline_mode<synchronous>, transform_indices = @transform_6, window_bounds = array<i64: 2, 32, 96>}, {pipeline_mode = #tpu.pipeline_mode<synchronous>, transform_indices = @transform_7, window_bounds = array<i64: 2, 32, 32>}, {pipeline_mode = #tpu.pipeline_mode<synchronous>, transform_indices = @transform_8, window_bounds = array<i64: 2, 1, 32>}, {pipeline_mode = #tpu.pipeline_mode<synchronous>, transform_indices = @transform_9, window_bounds = array<i64: 2, 32, 32>}, {pipeline_mode = #tpu.pipeline_mode<synchronous>, transform_indices = @transform_10, window_bounds = array<i64: 2, 32, 64>}, {pipeline_mode = #tpu.pipeline_mode<synchronous>, transform_indices = @transform_11, window_bounds = array<i64: 2, 32, 32>}, {pipeline_mode = #tpu.pipeline_mode<synchronous>, transform_indices = @transform_12, window_bounds = array<i64: 2, 1, 32>}, {pipeline_mode = #tpu.pipeline_mode<synchronous>, transform_indices = @transform_13, window_bounds = array<i64: 2, 32, 64>}, {pipeline_mode = #tpu.pipeline_mode<synchronous>, transform_indices = @transform_14, window_bounds = array<i64: 2, 64, 32>}, {pipeline_mode = #tpu.pipeline_mode<synchronous>, transform_indices = @transform_15, window_bounds = array<i64: 1, 32>}, {transform_indices = @transform_16, window_bounds = array<i64: 2, 8, 32>}]} {
    %c0 = arith.constant 0 : index
    %c0_0 = arith.constant 0 : index
    %c0_1 = arith.constant 0 : index
    %0 = vector.load %arg1[%c0, %c0_0, %c0_1] : memref<2x8x32xf32, #tpu.memory_space<vmem>>, vector<2x8x32xf32>
    %1 = vector.shape_cast %0 : vector<2x8x32xf32> to vector<16x32xf32>
    %c0_2 = arith.constant 0 : index
    %c0_3 = arith.constant 0 : index
    %c0_4 = arith.constant 0 : index
    %2 = vector.load %arg2[%c0_2, %c0_3, %c0_4] : memref<2x8x32xf32, #tpu.memory_space<vmem>>, vector<2x8x32xf32>
    %3 = vector.shape_cast %2 : vector<2x8x32xf32> to vector<16x32xf32>
    %c0_5 = arith.constant 0 : index
    %c0_6 = arith.constant 0 : index
    %c0_7 = arith.constant 0 : index
    %4 = vector.load %arg3[%c0_5, %c0_6, %c0_7] : memref<4x8x8xf32, #tpu.memory_space<vmem>>, vector<4x8x8xf32>
    %c0_8 = arith.constant 0 : index
    %c0_9 = arith.constant 0 : index
    %c0_10 = arith.constant 0 : index
    %5 = vector.load %arg4[%c0_8, %c0_9, %c0_10] : memref<2x8x8xf32, #tpu.memory_space<vmem>>, vector<1x8x8xf32>
    %6 = vector.shape_cast %5 : vector<1x8x8xf32> to vector<8x8xf32>
    %7 = vector.shape_cast %6 : vector<8x8xf32> to vector<1x8x8xf32>
    %8 = vector.broadcast %7 : vector<1x8x8xf32> to vector<4x8x8xf32>
    %9 = arith.addf %4, %8 : vector<4x8x8xf32>
    %10 = vector.shape_cast %9 : vector<4x8x8xf32> to vector<32x8xf32>
    %c1 = arith.constant 1 : index
    %c0_11 = arith.constant 0 : index
    %c0_12 = arith.constant 0 : index
    %11 = vector.load %arg4[%c1, %c0_11, %c0_12] : memref<2x8x8xf32, #tpu.memory_space<vmem>>, vector<1x8x8xf32>
    %12 = vector.shape_cast %11 : vector<1x8x8xf32> to vector<8x8xf32>
    %13 = vector.shape_cast %12 : vector<8x8xf32> to vector<1x8x8xf32>
    %14 = vector.broadcast %13 : vector<1x8x8xf32> to vector<4x8x8xf32>
    %15 = arith.addf %4, %14 : vector<4x8x8xf32>
    %16 = vector.shape_cast %15 : vector<4x8x8xf32> to vector<32x8xf32>
    %c0_13 = arith.constant 0 : index
    %c0_14 = arith.constant 0 : index
    %c0_15 = arith.constant 0 : index
    %17 = vector.load %arg5[%c0_13, %c0_14, %c0_15] : memref<2x1x8xf32, #tpu.memory_space<vmem>>, vector<1x1x8xf32>
    %18 = vector.shape_cast %17 : vector<1x1x8xf32> to vector<1x8xf32>
    %19 = vector.shape_cast %18 : vector<1x8xf32> to vector<1x8xf32>
    %20 = vector.broadcast %19 : vector<1x8xf32> to vector<32x8xf32>
    %c1_16 = arith.constant 1 : index
    %c0_17 = arith.constant 0 : index
    %c0_18 = arith.constant 0 : index
    %21 = vector.load %arg5[%c1_16, %c0_17, %c0_18] : memref<2x1x8xf32, #tpu.memory_space<vmem>>, vector<1x1x8xf32>
    %22 = vector.shape_cast %21 : vector<1x1x8xf32> to vector<1x8xf32>
    %23 = vector.shape_cast %22 : vector<1x8xf32> to vector<1x8xf32>
    %24 = vector.broadcast %23 : vector<1x8xf32> to vector<32x8xf32>
    %c0_19 = arith.constant 0 : index
    %c0_20 = arith.constant 0 : index
    %c0_21 = arith.constant 0 : index
    %25 = vector.load %arg6[%c0_19, %c0_20, %c0_21] : memref<2x1x32xf32, #tpu.memory_space<vmem>>, vector<1x1x32xf32>
    %26 = vector.shape_cast %25 : vector<1x1x32xf32> to vector<1x32xf32>
    %27 = arith.mulf %1, %1 : vector<16x32xf32>
    %cst = arith.constant dense<0.000000e+00> : vector<16xf32>
    %28 = vector.multi_reduction <add>, %27, %cst [1] : vector<16x32xf32> to vector<16xf32>
    %29 = vector.shape_cast %28 : vector<16xf32> to vector<16x1xf32>
    %cst_22 = arith.constant 3.200000e+01 : f32
    %30 = vector.broadcast %cst_22 : f32 to vector<16x1xf32>
    %31 = arith.divf %29, %30 : vector<16x1xf32>
    %cst_23 = arith.constant 9.99999997E-7 : f32
    %32 = vector.broadcast %cst_23 : f32 to vector<16x1xf32>
    %33 = arith.addf %31, %32 : vector<16x1xf32>
    %34 = math.rsqrt %33 : vector<16x1xf32>
    %35 = vector.broadcast %34 : vector<16x1xf32> to vector<16x32xf32>
    %36 = arith.mulf %1, %35 : vector<16x32xf32>
    %37 = vector.broadcast %26 : vector<1x32xf32> to vector<16x32xf32>
    %38 = arith.mulf %36, %37 : vector<16x32xf32>
    %c0_24 = arith.constant 0 : index
    %c0_25 = arith.constant 0 : index
    %c0_26 = arith.constant 0 : index
    %39 = vector.load %arg7[%c0_24, %c0_25, %c0_26] : memref<2x32x96xbf16, #tpu.memory_space<vmem>>, vector<1x32x96xbf16>
    %40 = vector.shape_cast %39 : vector<1x32x96xbf16> to vector<32x96xbf16>
    %41 = arith.truncf %38 : vector<16x32xf32> to vector<16x32xbf16>
    %cst_27 = arith.constant dense<0.000000e+00> : vector<16x96xf32>
    %42 = tpu.matmul %41, %40, %cst_27 {dimension_numbers = #tpu.dot_dimension_numbers<[1], [0], [0], [1], [0, 0, 1, 1], [], []>} : vector<16x32xbf16>, vector<32x96xbf16>, vector<16x96xf32> -> vector<16x96xf32>
    %43 = vector.extract_strided_slice %42 {offsets = [0, 0], sizes = [16, 32], strides = [1, 1]} : vector<16x96xf32> to vector<16x32xf32>
    %44 = arith.truncf %43 : vector<16x32xf32> to vector<16x32xbf16>
    %45 = vector.extract_strided_slice %42 {offsets = [0, 32], sizes = [16, 32], strides = [1, 1]} : vector<16x96xf32> to vector<16x32xf32>
    %46 = arith.truncf %45 : vector<16x32xf32> to vector<16x32xbf16>
    %47 = vector.extract_strided_slice %42 {offsets = [0, 64], sizes = [16, 32], strides = [1, 1]} : vector<16x96xf32> to vector<16x32xf32>
    %48 = arith.truncf %47 : vector<16x32xf32> to vector<16x32xbf16>
    %49 = vector.extract_strided_slice %44 {offsets = [0, 0], sizes = [8, 32], strides = [1, 1]} : vector<16x32xbf16> to vector<8x32xbf16>
    %50 = vector.extract_strided_slice %46 {offsets = [0, 0], sizes = [8, 32], strides = [1, 1]} : vector<16x32xbf16> to vector<8x32xbf16>
    %51 = vector.extract_strided_slice %48 {offsets = [0, 0], sizes = [8, 32], strides = [1, 1]} : vector<16x32xbf16> to vector<8x32xbf16>
    %52 = vector.extract_strided_slice %49 {offsets = [0, 0], sizes = [8, 8], strides = [1, 1]} : vector<8x32xbf16> to vector<8x8xbf16>
    %53 = vector.extract_strided_slice %50 {offsets = [0, 0], sizes = [8, 8], strides = [1, 1]} : vector<8x32xbf16> to vector<8x8xbf16>
    %cst_28 = arith.constant dense<0.000000e+00> : vector<8x8xf32>
    %54 = tpu.matmul %52, %53, %cst_28 {dimension_numbers = #tpu.dot_dimension_numbers<[1], [1], [0], [0], [0, 0, 1, 0], [], []>} : vector<8x8xbf16>, vector<8x8xbf16>, vector<8x8xf32> -> vector<8x8xf32>
    %55 = vector.extract_strided_slice %49 {offsets = [0, 8], sizes = [8, 8], strides = [1, 1]} : vector<8x32xbf16> to vector<8x8xbf16>
    %56 = vector.extract_strided_slice %50 {offsets = [0, 8], sizes = [8, 8], strides = [1, 1]} : vector<8x32xbf16> to vector<8x8xbf16>
    %cst_29 = arith.constant dense<0.000000e+00> : vector<8x8xf32>
    %57 = tpu.matmul %55, %56, %cst_29 {dimension_numbers = #tpu.dot_dimension_numbers<[1], [1], [0], [0], [0, 0, 1, 0], [], []>} : vector<8x8xbf16>, vector<8x8xbf16>, vector<8x8xf32> -> vector<8x8xf32>
    %58 = vector.extract_strided_slice %49 {offsets = [0, 16], sizes = [8, 8], strides = [1, 1]} : vector<8x32xbf16> to vector<8x8xbf16>
    %59 = vector.extract_strided_slice %50 {offsets = [0, 16], sizes = [8, 8], strides = [1, 1]} : vector<8x32xbf16> to vector<8x8xbf16>
    %cst_30 = arith.constant dense<0.000000e+00> : vector<8x8xf32>
    %60 = tpu.matmul %58, %59, %cst_30 {dimension_numbers = #tpu.dot_dimension_numbers<[1], [1], [0], [0], [0, 0, 1, 0], [], []>} : vector<8x8xbf16>, vector<8x8xbf16>, vector<8x8xf32> -> vector<8x8xf32>
    %61 = vector.extract_strided_slice %49 {offsets = [0, 24], sizes = [8, 8], strides = [1, 1]} : vector<8x32xbf16> to vector<8x8xbf16>
    %62 = vector.extract_strided_slice %50 {offsets = [0, 24], sizes = [8, 8], strides = [1, 1]} : vector<8x32xbf16> to vector<8x8xbf16>
    %cst_31 = arith.constant dense<0.000000e+00> : vector<8x8xf32>
    %63 = tpu.matmul %61, %62, %cst_31 {dimension_numbers = #tpu.dot_dimension_numbers<[1], [1], [0], [0], [0, 0, 1, 0], [], []>} : vector<8x8xbf16>, vector<8x8xbf16>, vector<8x8xf32> -> vector<8x8xf32>
    %64 = tpu.concatenate %54, %57, %60, %63 in 0 : vector<8x8xf32>, vector<8x8xf32>, vector<8x8xf32>, vector<8x8xf32> -> vector<32x8xf32>
    %65 = arith.addf %64, %10 : vector<32x8xf32>
    %cst_32 = arith.constant dense<0xFF800000> : vector<32xf32>
    %66 = vector.multi_reduction <maximumf>, %65, %cst_32 [1] : vector<32x8xf32> to vector<32xf32>
    %67 = vector.shape_cast %66 : vector<32xf32> to vector<32x1xf32>
    %68 = vector.broadcast %67 : vector<32x1xf32> to vector<32x8xf32>
    %69 = arith.subf %65, %68 : vector<32x8xf32>
    %70 = math.exp %69 : vector<32x8xf32>
    %cst_33 = arith.constant dense<0.000000e+00> : vector<32xf32>
    %71 = vector.multi_reduction <add>, %70, %cst_33 [1] : vector<32x8xf32> to vector<32xf32>
    %72 = vector.shape_cast %71 : vector<32xf32> to vector<32x1xf32>
    %73 = tpu.reciprocal %72 {approx = true} : vector<32x1xf32> -> vector<32x1xf32>
    %74 = vector.broadcast %73 : vector<32x1xf32> to vector<32x8xf32>
    %75 = arith.mulf %70, %74 : vector<32x8xf32>
    %76 = arith.truncf %75 : vector<32x8xf32> to vector<32x8xbf16>
    %77 = vector.extract_strided_slice %76 {offsets = [0, 0], sizes = [8, 8], strides = [1, 1]} : vector<32x8xbf16> to vector<8x8xbf16>
    %78 = vector.extract_strided_slice %51 {offsets = [0, 0], sizes = [8, 8], strides = [1, 1]} : vector<8x32xbf16> to vector<8x8xbf16>
    %cst_34 = arith.constant dense<0.000000e+00> : vector<8x8xf32>
    %79 = tpu.matmul %77, %78, %cst_34 {dimension_numbers = #tpu.dot_dimension_numbers<[1], [0], [0], [1], [0, 0, 1, 1], [], []>} : vector<8x8xbf16>, vector<8x8xbf16>, vector<8x8xf32> -> vector<8x8xf32>
    %80 = vector.extract_strided_slice %76 {offsets = [8, 0], sizes = [8, 8], strides = [1, 1]} : vector<32x8xbf16> to vector<8x8xbf16>
    %81 = vector.extract_strided_slice %51 {offsets = [0, 8], sizes = [8, 8], strides = [1, 1]} : vector<8x32xbf16> to vector<8x8xbf16>
    %cst_35 = arith.constant dense<0.000000e+00> : vector<8x8xf32>
    %82 = tpu.matmul %80, %81, %cst_35 {dimension_numbers = #tpu.dot_dimension_numbers<[1], [0], [0], [1], [0, 0, 1, 1], [], []>} : vector<8x8xbf16>, vector<8x8xbf16>, vector<8x8xf32> -> vector<8x8xf32>
    %83 = vector.extract_strided_slice %76 {offsets = [16, 0], sizes = [8, 8], strides = [1, 1]} : vector<32x8xbf16> to vector<8x8xbf16>
    %84 = vector.extract_strided_slice %51 {offsets = [0, 16], sizes = [8, 8], strides = [1, 1]} : vector<8x32xbf16> to vector<8x8xbf16>
    %cst_36 = arith.constant dense<0.000000e+00> : vector<8x8xf32>
    %85 = tpu.matmul %83, %84, %cst_36 {dimension_numbers = #tpu.dot_dimension_numbers<[1], [0], [0], [1], [0, 0, 1, 1], [], []>} : vector<8x8xbf16>, vector<8x8xbf16>, vector<8x8xf32> -> vector<8x8xf32>
    %86 = vector.extract_strided_slice %76 {offsets = [24, 0], sizes = [8, 8], strides = [1, 1]} : vector<32x8xbf16> to vector<8x8xbf16>
    %87 = vector.extract_strided_slice %51 {offsets = [0, 24], sizes = [8, 8], strides = [1, 1]} : vector<8x32xbf16> to vector<8x8xbf16>
    %cst_37 = arith.constant dense<0.000000e+00> : vector<8x8xf32>
    %88 = tpu.matmul %86, %87, %cst_37 {dimension_numbers = #tpu.dot_dimension_numbers<[1], [0], [0], [1], [0, 0, 1, 1], [], []>} : vector<8x8xbf16>, vector<8x8xbf16>, vector<8x8xf32> -> vector<8x8xf32>
    %89 = tpu.concatenate %79, %82, %85, %88 in 1 : vector<8x8xf32>, vector<8x8xf32>, vector<8x8xf32>, vector<8x8xf32> -> vector<8x32xf32>
    %90 = vector.extract_strided_slice %44 {offsets = [8, 0], sizes = [8, 32], strides = [1, 1]} : vector<16x32xbf16> to vector<8x32xbf16>
    %91 = vector.extract_strided_slice %46 {offsets = [8, 0], sizes = [8, 32], strides = [1, 1]} : vector<16x32xbf16> to vector<8x32xbf16>
    %92 = vector.extract_strided_slice %48 {offsets = [8, 0], sizes = [8, 32], strides = [1, 1]} : vector<16x32xbf16> to vector<8x32xbf16>
    %93 = vector.extract_strided_slice %90 {offsets = [0, 0], sizes = [8, 8], strides = [1, 1]} : vector<8x32xbf16> to vector<8x8xbf16>
    %94 = vector.extract_strided_slice %91 {offsets = [0, 0], sizes = [8, 8], strides = [1, 1]} : vector<8x32xbf16> to vector<8x8xbf16>
    %cst_38 = arith.constant dense<0.000000e+00> : vector<8x8xf32>
    %95 = tpu.matmul %93, %94, %cst_38 {dimension_numbers = #tpu.dot_dimension_numbers<[1], [1], [0], [0], [0, 0, 1, 0], [], []>} : vector<8x8xbf16>, vector<8x8xbf16>, vector<8x8xf32> -> vector<8x8xf32>
    %96 = vector.extract_strided_slice %90 {offsets = [0, 8], sizes = [8, 8], strides = [1, 1]} : vector<8x32xbf16> to vector<8x8xbf16>
    %97 = vector.extract_strided_slice %91 {offsets = [0, 8], sizes = [8, 8], strides = [1, 1]} : vector<8x32xbf16> to vector<8x8xbf16>
    %cst_39 = arith.constant dense<0.000000e+00> : vector<8x8xf32>
    %98 = tpu.matmul %96, %97, %cst_39 {dimension_numbers = #tpu.dot_dimension_numbers<[1], [1], [0], [0], [0, 0, 1, 0], [], []>} : vector<8x8xbf16>, vector<8x8xbf16>, vector<8x8xf32> -> vector<8x8xf32>
    %99 = vector.extract_strided_slice %90 {offsets = [0, 16], sizes = [8, 8], strides = [1, 1]} : vector<8x32xbf16> to vector<8x8xbf16>
    %100 = vector.extract_strided_slice %91 {offsets = [0, 16], sizes = [8, 8], strides = [1, 1]} : vector<8x32xbf16> to vector<8x8xbf16>
    %cst_40 = arith.constant dense<0.000000e+00> : vector<8x8xf32>
    %101 = tpu.matmul %99, %100, %cst_40 {dimension_numbers = #tpu.dot_dimension_numbers<[1], [1], [0], [0], [0, 0, 1, 0], [], []>} : vector<8x8xbf16>, vector<8x8xbf16>, vector<8x8xf32> -> vector<8x8xf32>
    %102 = vector.extract_strided_slice %90 {offsets = [0, 24], sizes = [8, 8], strides = [1, 1]} : vector<8x32xbf16> to vector<8x8xbf16>
    %103 = vector.extract_strided_slice %91 {offsets = [0, 24], sizes = [8, 8], strides = [1, 1]} : vector<8x32xbf16> to vector<8x8xbf16>
    %cst_41 = arith.constant dense<0.000000e+00> : vector<8x8xf32>
    %104 = tpu.matmul %102, %103, %cst_41 {dimension_numbers = #tpu.dot_dimension_numbers<[1], [1], [0], [0], [0, 0, 1, 0], [], []>} : vector<8x8xbf16>, vector<8x8xbf16>, vector<8x8xf32> -> vector<8x8xf32>
    %105 = tpu.concatenate %95, %98, %101, %104 in 0 : vector<8x8xf32>, vector<8x8xf32>, vector<8x8xf32>, vector<8x8xf32> -> vector<32x8xf32>
    %106 = arith.addf %105, %16 : vector<32x8xf32>
    %cst_42 = arith.constant dense<0xFF800000> : vector<32xf32>
    %107 = vector.multi_reduction <maximumf>, %106, %cst_42 [1] : vector<32x8xf32> to vector<32xf32>
    %108 = vector.shape_cast %107 : vector<32xf32> to vector<32x1xf32>
    %109 = vector.broadcast %108 : vector<32x1xf32> to vector<32x8xf32>
    %110 = arith.subf %106, %109 : vector<32x8xf32>
    %111 = math.exp %110 : vector<32x8xf32>
    %cst_43 = arith.constant dense<0.000000e+00> : vector<32xf32>
    %112 = vector.multi_reduction <add>, %111, %cst_43 [1] : vector<32x8xf32> to vector<32xf32>
    %113 = vector.shape_cast %112 : vector<32xf32> to vector<32x1xf32>
    %114 = tpu.reciprocal %113 {approx = true} : vector<32x1xf32> -> vector<32x1xf32>
    %115 = vector.broadcast %114 : vector<32x1xf32> to vector<32x8xf32>
    %116 = arith.mulf %111, %115 : vector<32x8xf32>
    %117 = arith.truncf %116 : vector<32x8xf32> to vector<32x8xbf16>
    %118 = vector.extract_strided_slice %117 {offsets = [0, 0], sizes = [8, 8], strides = [1, 1]} : vector<32x8xbf16> to vector<8x8xbf16>
    %119 = vector.extract_strided_slice %92 {offsets = [0, 0], sizes = [8, 8], strides = [1, 1]} : vector<8x32xbf16> to vector<8x8xbf16>
    %cst_44 = arith.constant dense<0.000000e+00> : vector<8x8xf32>
    %120 = tpu.matmul %118, %119, %cst_44 {dimension_numbers = #tpu.dot_dimension_numbers<[1], [0], [0], [1], [0, 0, 1, 1], [], []>} : vector<8x8xbf16>, vector<8x8xbf16>, vector<8x8xf32> -> vector<8x8xf32>
    %121 = vector.extract_strided_slice %117 {offsets = [8, 0], sizes = [8, 8], strides = [1, 1]} : vector<32x8xbf16> to vector<8x8xbf16>
    %122 = vector.extract_strided_slice %92 {offsets = [0, 8], sizes = [8, 8], strides = [1, 1]} : vector<8x32xbf16> to vector<8x8xbf16>
    %cst_45 = arith.constant dense<0.000000e+00> : vector<8x8xf32>
    %123 = tpu.matmul %121, %122, %cst_45 {dimension_numbers = #tpu.dot_dimension_numbers<[1], [0], [0], [1], [0, 0, 1, 1], [], []>} : vector<8x8xbf16>, vector<8x8xbf16>, vector<8x8xf32> -> vector<8x8xf32>
    %124 = vector.extract_strided_slice %117 {offsets = [16, 0], sizes = [8, 8], strides = [1, 1]} : vector<32x8xbf16> to vector<8x8xbf16>
    %125 = vector.extract_strided_slice %92 {offsets = [0, 16], sizes = [8, 8], strides = [1, 1]} : vector<8x32xbf16> to vector<8x8xbf16>
    %cst_46 = arith.constant dense<0.000000e+00> : vector<8x8xf32>
    %126 = tpu.matmul %124, %125, %cst_46 {dimension_numbers = #tpu.dot_dimension_numbers<[1], [0], [0], [1], [0, 0, 1, 1], [], []>} : vector<8x8xbf16>, vector<8x8xbf16>, vector<8x8xf32> -> vector<8x8xf32>
    %127 = vector.extract_strided_slice %117 {offsets = [24, 0], sizes = [8, 8], strides = [1, 1]} : vector<32x8xbf16> to vector<8x8xbf16>
    %128 = vector.extract_strided_slice %92 {offsets = [0, 24], sizes = [8, 8], strides = [1, 1]} : vector<8x32xbf16> to vector<8x8xbf16>
    %cst_47 = arith.constant dense<0.000000e+00> : vector<8x8xf32>
    %129 = tpu.matmul %127, %128, %cst_47 {dimension_numbers = #tpu.dot_dimension_numbers<[1], [0], [0], [1], [0, 0, 1, 1], [], []>} : vector<8x8xbf16>, vector<8x8xbf16>, vector<8x8xf32> -> vector<8x8xf32>
    %130 = tpu.concatenate %120, %123, %126, %129 in 1 : vector<8x8xf32>, vector<8x8xf32>, vector<8x8xf32>, vector<8x8xf32> -> vector<8x32xf32>
    %131 = tpu.concatenate %89, %130 in 0 : vector<8x32xf32>, vector<8x32xf32> -> vector<16x32xf32>
    %c0_48 = arith.constant 0 : index
    %c0_49 = arith.constant 0 : index
    %c0_50 = arith.constant 0 : index
    %132 = vector.load %arg8[%c0_48, %c0_49, %c0_50] : memref<2x32x32xbf16, #tpu.memory_space<vmem>>, vector<1x32x32xbf16>
    %133 = vector.shape_cast %132 : vector<1x32x32xbf16> to vector<32x32xbf16>
    %134 = arith.truncf %131 : vector<16x32xf32> to vector<16x32xbf16>
    %cst_51 = arith.constant dense<0.000000e+00> : vector<16x32xf32>
    %135 = tpu.matmul %134, %133, %cst_51 {dimension_numbers = #tpu.dot_dimension_numbers<[1], [0], [0], [1], [0, 0, 1, 1], [], []>} : vector<16x32xbf16>, vector<32x32xbf16>, vector<16x32xf32> -> vector<16x32xf32>
    %136 = arith.addf %1, %135 : vector<16x32xf32>
    %c0_52 = arith.constant 0 : index
    %c0_53 = arith.constant 0 : index
    %c0_54 = arith.constant 0 : index
    %137 = vector.load %arg9[%c0_52, %c0_53, %c0_54] : memref<2x1x32xf32, #tpu.memory_space<vmem>>, vector<1x1x32xf32>
    %138 = vector.shape_cast %137 : vector<1x1x32xf32> to vector<1x32xf32>
    %139 = arith.mulf %136, %136 : vector<16x32xf32>
    %cst_55 = arith.constant dense<0.000000e+00> : vector<16xf32>
    %140 = vector.multi_reduction <add>, %139, %cst_55 [1] : vector<16x32xf32> to vector<16xf32>
    %141 = vector.shape_cast %140 : vector<16xf32> to vector<16x1xf32>
    %cst_56 = arith.constant 3.200000e+01 : f32
    %142 = vector.broadcast %cst_56 : f32 to vector<16x1xf32>
    %143 = arith.divf %141, %142 : vector<16x1xf32>
    %cst_57 = arith.constant 9.99999997E-7 : f32
    %144 = vector.broadcast %cst_57 : f32 to vector<16x1xf32>
    %145 = arith.addf %143, %144 : vector<16x1xf32>
    %146 = math.rsqrt %145 : vector<16x1xf32>
    %147 = vector.broadcast %146 : vector<16x1xf32> to vector<16x32xf32>
    %148 = arith.mulf %136, %147 : vector<16x32xf32>
    %149 = vector.broadcast %138 : vector<1x32xf32> to vector<16x32xf32>
    %150 = arith.mulf %148, %149 : vector<16x32xf32>
    %c0_58 = arith.constant 0 : index
    %c0_59 = arith.constant 0 : index
    %c0_60 = arith.constant 0 : index
    %151 = vector.load %arg10[%c0_58, %c0_59, %c0_60] : memref<2x32x32xbf16, #tpu.memory_space<vmem>>, vector<1x32x32xbf16>
    %152 = vector.shape_cast %151 : vector<1x32x32xbf16> to vector<32x32xbf16>
    %153 = arith.truncf %150 : vector<16x32xf32> to vector<16x32xbf16>
    %cst_61 = arith.constant dense<0.000000e+00> : vector<16x32xf32>
    %154 = tpu.matmul %153, %152, %cst_61 {dimension_numbers = #tpu.dot_dimension_numbers<[1], [0], [0], [1], [0, 0, 1, 1], [], []>} : vector<16x32xbf16>, vector<32x32xbf16>, vector<16x32xf32> -> vector<16x32xf32>
    %155 = arith.truncf %154 : vector<16x32xf32> to vector<16x32xbf16>
    %c0_62 = arith.constant 0 : index
    %c0_63 = arith.constant 0 : index
    %c0_64 = arith.constant 0 : index
    %156 = vector.load %arg11[%c0_62, %c0_63, %c0_64] : memref<2x32x64xbf16, #tpu.memory_space<vmem>>, vector<1x32x64xbf16>
    %157 = vector.shape_cast %156 : vector<1x32x64xbf16> to vector<32x64xbf16>
    %158 = arith.truncf %3 : vector<16x32xf32> to vector<16x32xbf16>
    %cst_65 = arith.constant dense<0.000000e+00> : vector<16x64xf32>
    %159 = tpu.matmul %158, %157, %cst_65 {dimension_numbers = #tpu.dot_dimension_numbers<[1], [0], [0], [1], [0, 0, 1, 1], [], []>} : vector<16x32xbf16>, vector<32x64xbf16>, vector<16x64xf32> -> vector<16x64xf32>
    %160 = vector.extract_strided_slice %159 {offsets = [0, 0], sizes = [16, 32], strides = [1, 1]} : vector<16x64xf32> to vector<16x32xf32>
    %161 = arith.truncf %160 : vector<16x32xf32> to vector<16x32xbf16>
    %162 = vector.extract_strided_slice %159 {offsets = [0, 32], sizes = [16, 32], strides = [1, 1]} : vector<16x64xf32> to vector<16x32xf32>
    %163 = arith.truncf %162 : vector<16x32xf32> to vector<16x32xbf16>
    %164 = vector.extract_strided_slice %155 {offsets = [0, 0], sizes = [8, 32], strides = [1, 1]} : vector<16x32xbf16> to vector<8x32xbf16>
    %165 = vector.extract_strided_slice %161 {offsets = [0, 0], sizes = [8, 32], strides = [1, 1]} : vector<16x32xbf16> to vector<8x32xbf16>
    %166 = vector.extract_strided_slice %163 {offsets = [0, 0], sizes = [8, 32], strides = [1, 1]} : vector<16x32xbf16> to vector<8x32xbf16>
    %167 = vector.extract_strided_slice %164 {offsets = [0, 0], sizes = [8, 8], strides = [1, 1]} : vector<8x32xbf16> to vector<8x8xbf16>
    %168 = vector.extract_strided_slice %165 {offsets = [0, 0], sizes = [8, 8], strides = [1, 1]} : vector<8x32xbf16> to vector<8x8xbf16>
    %cst_66 = arith.constant dense<0.000000e+00> : vector<8x8xf32>
    %169 = tpu.matmul %167, %168, %cst_66 {dimension_numbers = #tpu.dot_dimension_numbers<[1], [1], [0], [0], [0, 0, 1, 0], [], []>} : vector<8x8xbf16>, vector<8x8xbf16>, vector<8x8xf32> -> vector<8x8xf32>
    %170 = vector.extract_strided_slice %164 {offsets = [0, 8], sizes = [8, 8], strides = [1, 1]} : vector<8x32xbf16> to vector<8x8xbf16>
    %171 = vector.extract_strided_slice %165 {offsets = [0, 8], sizes = [8, 8], strides = [1, 1]} : vector<8x32xbf16> to vector<8x8xbf16>
    %cst_67 = arith.constant dense<0.000000e+00> : vector<8x8xf32>
    %172 = tpu.matmul %170, %171, %cst_67 {dimension_numbers = #tpu.dot_dimension_numbers<[1], [1], [0], [0], [0, 0, 1, 0], [], []>} : vector<8x8xbf16>, vector<8x8xbf16>, vector<8x8xf32> -> vector<8x8xf32>
    %173 = vector.extract_strided_slice %164 {offsets = [0, 16], sizes = [8, 8], strides = [1, 1]} : vector<8x32xbf16> to vector<8x8xbf16>
    %174 = vector.extract_strided_slice %165 {offsets = [0, 16], sizes = [8, 8], strides = [1, 1]} : vector<8x32xbf16> to vector<8x8xbf16>
    %cst_68 = arith.constant dense<0.000000e+00> : vector<8x8xf32>
    %175 = tpu.matmul %173, %174, %cst_68 {dimension_numbers = #tpu.dot_dimension_numbers<[1], [1], [0], [0], [0, 0, 1, 0], [], []>} : vector<8x8xbf16>, vector<8x8xbf16>, vector<8x8xf32> -> vector<8x8xf32>
    %176 = vector.extract_strided_slice %164 {offsets = [0, 24], sizes = [8, 8], strides = [1, 1]} : vector<8x32xbf16> to vector<8x8xbf16>
    %177 = vector.extract_strided_slice %165 {offsets = [0, 24], sizes = [8, 8], strides = [1, 1]} : vector<8x32xbf16> to vector<8x8xbf16>
    %cst_69 = arith.constant dense<0.000000e+00> : vector<8x8xf32>
    %178 = tpu.matmul %176, %177, %cst_69 {dimension_numbers = #tpu.dot_dimension_numbers<[1], [1], [0], [0], [0, 0, 1, 0], [], []>} : vector<8x8xbf16>, vector<8x8xbf16>, vector<8x8xf32> -> vector<8x8xf32>
    %179 = tpu.concatenate %169, %172, %175, %178 in 0 : vector<8x8xf32>, vector<8x8xf32>, vector<8x8xf32>, vector<8x8xf32> -> vector<32x8xf32>
    %180 = arith.addf %179, %20 : vector<32x8xf32>
    %cst_70 = arith.constant dense<0xFF800000> : vector<32xf32>
    %181 = vector.multi_reduction <maximumf>, %180, %cst_70 [1] : vector<32x8xf32> to vector<32xf32>
    %182 = vector.shape_cast %181 : vector<32xf32> to vector<32x1xf32>
    %183 = vector.broadcast %182 : vector<32x1xf32> to vector<32x8xf32>
    %184 = arith.subf %180, %183 : vector<32x8xf32>
    %185 = math.exp %184 : vector<32x8xf32>
    %cst_71 = arith.constant dense<0.000000e+00> : vector<32xf32>
    %186 = vector.multi_reduction <add>, %185, %cst_71 [1] : vector<32x8xf32> to vector<32xf32>
    %187 = vector.shape_cast %186 : vector<32xf32> to vector<32x1xf32>
    %188 = tpu.reciprocal %187 {approx = true} : vector<32x1xf32> -> vector<32x1xf32>
    %189 = vector.broadcast %188 : vector<32x1xf32> to vector<32x8xf32>
    %190 = arith.mulf %185, %189 : vector<32x8xf32>
    %191 = arith.truncf %190 : vector<32x8xf32> to vector<32x8xbf16>
    %192 = vector.extract_strided_slice %191 {offsets = [0, 0], sizes = [8, 8], strides = [1, 1]} : vector<32x8xbf16> to vector<8x8xbf16>
    %193 = vector.extract_strided_slice %166 {offsets = [0, 0], sizes = [8, 8], strides = [1, 1]} : vector<8x32xbf16> to vector<8x8xbf16>
    %cst_72 = arith.constant dense<0.000000e+00> : vector<8x8xf32>
    %194 = tpu.matmul %192, %193, %cst_72 {dimension_numbers = #tpu.dot_dimension_numbers<[1], [0], [0], [1], [0, 0, 1, 1], [], []>} : vector<8x8xbf16>, vector<8x8xbf16>, vector<8x8xf32> -> vector<8x8xf32>
    %195 = vector.extract_strided_slice %191 {offsets = [8, 0], sizes = [8, 8], strides = [1, 1]} : vector<32x8xbf16> to vector<8x8xbf16>
    %196 = vector.extract_strided_slice %166 {offsets = [0, 8], sizes = [8, 8], strides = [1, 1]} : vector<8x32xbf16> to vector<8x8xbf16>
    %cst_73 = arith.constant dense<0.000000e+00> : vector<8x8xf32>
    %197 = tpu.matmul %195, %196, %cst_73 {dimension_numbers = #tpu.dot_dimension_numbers<[1], [0], [0], [1], [0, 0, 1, 1], [], []>} : vector<8x8xbf16>, vector<8x8xbf16>, vector<8x8xf32> -> vector<8x8xf32>
    %198 = vector.extract_strided_slice %191 {offsets = [16, 0], sizes = [8, 8], strides = [1, 1]} : vector<32x8xbf16> to vector<8x8xbf16>
    %199 = vector.extract_strided_slice %166 {offsets = [0, 16], sizes = [8, 8], strides = [1, 1]} : vector<8x32xbf16> to vector<8x8xbf16>
    %cst_74 = arith.constant dense<0.000000e+00> : vector<8x8xf32>
    %200 = tpu.matmul %198, %199, %cst_74 {dimension_numbers = #tpu.dot_dimension_numbers<[1], [0], [0], [1], [0, 0, 1, 1], [], []>} : vector<8x8xbf16>, vector<8x8xbf16>, vector<8x8xf32> -> vector<8x8xf32>
    %201 = vector.extract_strided_slice %191 {offsets = [24, 0], sizes = [8, 8], strides = [1, 1]} : vector<32x8xbf16> to vector<8x8xbf16>
    %202 = vector.extract_strided_slice %166 {offsets = [0, 24], sizes = [8, 8], strides = [1, 1]} : vector<8x32xbf16> to vector<8x8xbf16>
    %cst_75 = arith.constant dense<0.000000e+00> : vector<8x8xf32>
    %203 = tpu.matmul %201, %202, %cst_75 {dimension_numbers = #tpu.dot_dimension_numbers<[1], [0], [0], [1], [0, 0, 1, 1], [], []>} : vector<8x8xbf16>, vector<8x8xbf16>, vector<8x8xf32> -> vector<8x8xf32>
    %204 = tpu.concatenate %194, %197, %200, %203 in 1 : vector<8x8xf32>, vector<8x8xf32>, vector<8x8xf32>, vector<8x8xf32> -> vector<8x32xf32>
    %205 = vector.extract_strided_slice %155 {offsets = [8, 0], sizes = [8, 32], strides = [1, 1]} : vector<16x32xbf16> to vector<8x32xbf16>
    %206 = vector.extract_strided_slice %161 {offsets = [8, 0], sizes = [8, 32], strides = [1, 1]} : vector<16x32xbf16> to vector<8x32xbf16>
    %207 = vector.extract_strided_slice %163 {offsets = [8, 0], sizes = [8, 32], strides = [1, 1]} : vector<16x32xbf16> to vector<8x32xbf16>
    %208 = vector.extract_strided_slice %205 {offsets = [0, 0], sizes = [8, 8], strides = [1, 1]} : vector<8x32xbf16> to vector<8x8xbf16>
    %209 = vector.extract_strided_slice %206 {offsets = [0, 0], sizes = [8, 8], strides = [1, 1]} : vector<8x32xbf16> to vector<8x8xbf16>
    %cst_76 = arith.constant dense<0.000000e+00> : vector<8x8xf32>
    %210 = tpu.matmul %208, %209, %cst_76 {dimension_numbers = #tpu.dot_dimension_numbers<[1], [1], [0], [0], [0, 0, 1, 0], [], []>} : vector<8x8xbf16>, vector<8x8xbf16>, vector<8x8xf32> -> vector<8x8xf32>
    %211 = vector.extract_strided_slice %205 {offsets = [0, 8], sizes = [8, 8], strides = [1, 1]} : vector<8x32xbf16> to vector<8x8xbf16>
    %212 = vector.extract_strided_slice %206 {offsets = [0, 8], sizes = [8, 8], strides = [1, 1]} : vector<8x32xbf16> to vector<8x8xbf16>
    %cst_77 = arith.constant dense<0.000000e+00> : vector<8x8xf32>
    %213 = tpu.matmul %211, %212, %cst_77 {dimension_numbers = #tpu.dot_dimension_numbers<[1], [1], [0], [0], [0, 0, 1, 0], [], []>} : vector<8x8xbf16>, vector<8x8xbf16>, vector<8x8xf32> -> vector<8x8xf32>
    %214 = vector.extract_strided_slice %205 {offsets = [0, 16], sizes = [8, 8], strides = [1, 1]} : vector<8x32xbf16> to vector<8x8xbf16>
    %215 = vector.extract_strided_slice %206 {offsets = [0, 16], sizes = [8, 8], strides = [1, 1]} : vector<8x32xbf16> to vector<8x8xbf16>
    %cst_78 = arith.constant dense<0.000000e+00> : vector<8x8xf32>
    %216 = tpu.matmul %214, %215, %cst_78 {dimension_numbers = #tpu.dot_dimension_numbers<[1], [1], [0], [0], [0, 0, 1, 0], [], []>} : vector<8x8xbf16>, vector<8x8xbf16>, vector<8x8xf32> -> vector<8x8xf32>
    %217 = vector.extract_strided_slice %205 {offsets = [0, 24], sizes = [8, 8], strides = [1, 1]} : vector<8x32xbf16> to vector<8x8xbf16>
    %218 = vector.extract_strided_slice %206 {offsets = [0, 24], sizes = [8, 8], strides = [1, 1]} : vector<8x32xbf16> to vector<8x8xbf16>
    %cst_79 = arith.constant dense<0.000000e+00> : vector<8x8xf32>
    %219 = tpu.matmul %217, %218, %cst_79 {dimension_numbers = #tpu.dot_dimension_numbers<[1], [1], [0], [0], [0, 0, 1, 0], [], []>} : vector<8x8xbf16>, vector<8x8xbf16>, vector<8x8xf32> -> vector<8x8xf32>
    %220 = tpu.concatenate %210, %213, %216, %219 in 0 : vector<8x8xf32>, vector<8x8xf32>, vector<8x8xf32>, vector<8x8xf32> -> vector<32x8xf32>
    %221 = arith.addf %220, %24 : vector<32x8xf32>
    %cst_80 = arith.constant dense<0xFF800000> : vector<32xf32>
    %222 = vector.multi_reduction <maximumf>, %221, %cst_80 [1] : vector<32x8xf32> to vector<32xf32>
    %223 = vector.shape_cast %222 : vector<32xf32> to vector<32x1xf32>
    %224 = vector.broadcast %223 : vector<32x1xf32> to vector<32x8xf32>
    %225 = arith.subf %221, %224 : vector<32x8xf32>
    %226 = math.exp %225 : vector<32x8xf32>
    %cst_81 = arith.constant dense<0.000000e+00> : vector<32xf32>
    %227 = vector.multi_reduction <add>, %226, %cst_81 [1] : vector<32x8xf32> to vector<32xf32>
    %228 = vector.shape_cast %227 : vector<32xf32> to vector<32x1xf32>
    %229 = tpu.reciprocal %228 {approx = true} : vector<32x1xf32> -> vector<32x1xf32>
    %230 = vector.broadcast %229 : vector<32x1xf32> to vector<32x8xf32>
    %231 = arith.mulf %226, %230 : vector<32x8xf32>
    %232 = arith.truncf %231 : vector<32x8xf32> to vector<32x8xbf16>
    %233 = vector.extract_strided_slice %232 {offsets = [0, 0], sizes = [8, 8], strides = [1, 1]} : vector<32x8xbf16> to vector<8x8xbf16>
    %234 = vector.extract_strided_slice %207 {offsets = [0, 0], sizes = [8, 8], strides = [1, 1]} : vector<8x32xbf16> to vector<8x8xbf16>
    %cst_82 = arith.constant dense<0.000000e+00> : vector<8x8xf32>
    %235 = tpu.matmul %233, %234, %cst_82 {dimension_numbers = #tpu.dot_dimension_numbers<[1], [0], [0], [1], [0, 0, 1, 1], [], []>} : vector<8x8xbf16>, vector<8x8xbf16>, vector<8x8xf32> -> vector<8x8xf32>
    %236 = vector.extract_strided_slice %232 {offsets = [8, 0], sizes = [8, 8], strides = [1, 1]} : vector<32x8xbf16> to vector<8x8xbf16>
    %237 = vector.extract_strided_slice %207 {offsets = [0, 8], sizes = [8, 8], strides = [1, 1]} : vector<8x32xbf16> to vector<8x8xbf16>
    %cst_83 = arith.constant dense<0.000000e+00> : vector<8x8xf32>
    %238 = tpu.matmul %236, %237, %cst_83 {dimension_numbers = #tpu.dot_dimension_numbers<[1], [0], [0], [1], [0, 0, 1, 1], [], []>} : vector<8x8xbf16>, vector<8x8xbf16>, vector<8x8xf32> -> vector<8x8xf32>
    %239 = vector.extract_strided_slice %232 {offsets = [16, 0], sizes = [8, 8], strides = [1, 1]} : vector<32x8xbf16> to vector<8x8xbf16>
    %240 = vector.extract_strided_slice %207 {offsets = [0, 16], sizes = [8, 8], strides = [1, 1]} : vector<8x32xbf16> to vector<8x8xbf16>
    %cst_84 = arith.constant dense<0.000000e+00> : vector<8x8xf32>
    %241 = tpu.matmul %239, %240, %cst_84 {dimension_numbers = #tpu.dot_dimension_numbers<[1], [0], [0], [1], [0, 0, 1, 1], [], []>} : vector<8x8xbf16>, vector<8x8xbf16>, vector<8x8xf32> -> vector<8x8xf32>
    %242 = vector.extract_strided_slice %232 {offsets = [24, 0], sizes = [8, 8], strides = [1, 1]} : vector<32x8xbf16> to vector<8x8xbf16>
    %243 = vector.extract_strided_slice %207 {offsets = [0, 24], sizes = [8, 8], strides = [1, 1]} : vector<8x32xbf16> to vector<8x8xbf16>
    %cst_85 = arith.constant dense<0.000000e+00> : vector<8x8xf32>
    %244 = tpu.matmul %242, %243, %cst_85 {dimension_numbers = #tpu.dot_dimension_numbers<[1], [0], [0], [1], [0, 0, 1, 1], [], []>} : vector<8x8xbf16>, vector<8x8xbf16>, vector<8x8xf32> -> vector<8x8xf32>
    %245 = tpu.concatenate %235, %238, %241, %244 in 1 : vector<8x8xf32>, vector<8x8xf32>, vector<8x8xf32>, vector<8x8xf32> -> vector<8x32xf32>
    %246 = tpu.concatenate %204, %245 in 0 : vector<8x32xf32>, vector<8x32xf32> -> vector<16x32xf32>
    %c0_86 = arith.constant 0 : index
    %c0_87 = arith.constant 0 : index
    %c0_88 = arith.constant 0 : index
    %247 = vector.load %arg12[%c0_86, %c0_87, %c0_88] : memref<2x32x32xbf16, #tpu.memory_space<vmem>>, vector<1x32x32xbf16>
    %248 = vector.shape_cast %247 : vector<1x32x32xbf16> to vector<32x32xbf16>
    %249 = arith.truncf %246 : vector<16x32xf32> to vector<16x32xbf16>
    %cst_89 = arith.constant dense<0.000000e+00> : vector<16x32xf32>
    %250 = tpu.matmul %249, %248, %cst_89 {dimension_numbers = #tpu.dot_dimension_numbers<[1], [0], [0], [1], [0, 0, 1, 1], [], []>} : vector<16x32xbf16>, vector<32x32xbf16>, vector<16x32xf32> -> vector<16x32xf32>
    %251 = arith.addf %136, %250 : vector<16x32xf32>
    %c0_90 = arith.constant 0 : index
    %c0_91 = arith.constant 0 : index
    %c0_92 = arith.constant 0 : index
    %252 = vector.load %arg13[%c0_90, %c0_91, %c0_92] : memref<2x1x32xf32, #tpu.memory_space<vmem>>, vector<1x1x32xf32>
    %253 = vector.shape_cast %252 : vector<1x1x32xf32> to vector<1x32xf32>
    %254 = arith.mulf %251, %251 : vector<16x32xf32>
    %cst_93 = arith.constant dense<0.000000e+00> : vector<16xf32>
    %255 = vector.multi_reduction <add>, %254, %cst_93 [1] : vector<16x32xf32> to vector<16xf32>
    %256 = vector.shape_cast %255 : vector<16xf32> to vector<16x1xf32>
    %cst_94 = arith.constant 3.200000e+01 : f32
    %257 = vector.broadcast %cst_94 : f32 to vector<16x1xf32>
    %258 = arith.divf %256, %257 : vector<16x1xf32>
    %cst_95 = arith.constant 9.99999997E-7 : f32
    %259 = vector.broadcast %cst_95 : f32 to vector<16x1xf32>
    %260 = arith.addf %258, %259 : vector<16x1xf32>
    %261 = math.rsqrt %260 : vector<16x1xf32>
    %262 = vector.broadcast %261 : vector<16x1xf32> to vector<16x32xf32>
    %263 = arith.mulf %251, %262 : vector<16x32xf32>
    %264 = vector.broadcast %253 : vector<1x32xf32> to vector<16x32xf32>
    %265 = arith.mulf %263, %264 : vector<16x32xf32>
    %c0_96 = arith.constant 0 : index
    %c0_97 = arith.constant 0 : index
    %c0_98 = arith.constant 0 : index
    %266 = vector.load %arg14[%c0_96, %c0_97, %c0_98] : memref<2x32x64xbf16, #tpu.memory_space<vmem>>, vector<1x32x64xbf16>
    %267 = vector.shape_cast %266 : vector<1x32x64xbf16> to vector<32x64xbf16>
    %268 = arith.truncf %265 : vector<16x32xf32> to vector<16x32xbf16>
    %cst_99 = arith.constant dense<0.000000e+00> : vector<16x64xf32>
    %269 = tpu.matmul %268, %267, %cst_99 {dimension_numbers = #tpu.dot_dimension_numbers<[1], [0], [0], [1], [0, 0, 1, 1], [], []>} : vector<16x32xbf16>, vector<32x64xbf16>, vector<16x64xf32> -> vector<16x64xf32>
    %cst_100 = arith.constant 0.000000e+00 : f32
    %270 = vector.broadcast %cst_100 : f32 to vector<16x64xf32>
    %271 = arith.maximumf %269, %270 : vector<16x64xf32>
    %c0_101 = arith.constant 0 : index
    %c0_102 = arith.constant 0 : index
    %c0_103 = arith.constant 0 : index
    %272 = vector.load %arg15[%c0_101, %c0_102, %c0_103] : memref<2x64x32xbf16, #tpu.memory_space<vmem>>, vector<1x64x32xbf16>
    %273 = vector.shape_cast %272 : vector<1x64x32xbf16> to vector<64x32xbf16>
    %274 = arith.truncf %271 : vector<16x64xf32> to vector<16x64xbf16>
    %cst_104 = arith.constant dense<0.000000e+00> : vector<16x32xf32>
    %275 = tpu.matmul %274, %273, %cst_104 {dimension_numbers = #tpu.dot_dimension_numbers<[1], [0], [0], [1], [0, 0, 1, 1], [], []>} : vector<16x64xbf16>, vector<64x32xbf16>, vector<16x32xf32> -> vector<16x32xf32>
    %276 = arith.addf %251, %275 : vector<16x32xf32>
    %c1_105 = arith.constant 1 : index
    %c0_106 = arith.constant 0 : index
    %c0_107 = arith.constant 0 : index
    %277 = vector.load %arg6[%c1_105, %c0_106, %c0_107] : memref<2x1x32xf32, #tpu.memory_space<vmem>>, vector<1x1x32xf32>
    %278 = vector.shape_cast %277 : vector<1x1x32xf32> to vector<1x32xf32>
    %279 = arith.mulf %276, %276 : vector<16x32xf32>
    %cst_108 = arith.constant dense<0.000000e+00> : vector<16xf32>
    %280 = vector.multi_reduction <add>, %279, %cst_108 [1] : vector<16x32xf32> to vector<16xf32>
    %281 = vector.shape_cast %280 : vector<16xf32> to vector<16x1xf32>
    %cst_109 = arith.constant 3.200000e+01 : f32
    %282 = vector.broadcast %cst_109 : f32 to vector<16x1xf32>
    %283 = arith.divf %281, %282 : vector<16x1xf32>
    %cst_110 = arith.constant 9.99999997E-7 : f32
    %284 = vector.broadcast %cst_110 : f32 to vector<16x1xf32>
    %285 = arith.addf %283, %284 : vector<16x1xf32>
    %286 = math.rsqrt %285 : vector<16x1xf32>
    %287 = vector.broadcast %286 : vector<16x1xf32> to vector<16x32xf32>
    %288 = arith.mulf %276, %287 : vector<16x32xf32>
    %289 = vector.broadcast %278 : vector<1x32xf32> to vector<16x32xf32>
    %290 = arith.mulf %288, %289 : vector<16x32xf32>
    %c1_111 = arith.constant 1 : index
    %c0_112 = arith.constant 0 : index
    %c0_113 = arith.constant 0 : index
    %291 = vector.load %arg7[%c1_111, %c0_112, %c0_113] : memref<2x32x96xbf16, #tpu.memory_space<vmem>>, vector<1x32x96xbf16>
    %292 = vector.shape_cast %291 : vector<1x32x96xbf16> to vector<32x96xbf16>
    %293 = arith.truncf %290 : vector<16x32xf32> to vector<16x32xbf16>
    %cst_114 = arith.constant dense<0.000000e+00> : vector<16x96xf32>
    %294 = tpu.matmul %293, %292, %cst_114 {dimension_numbers = #tpu.dot_dimension_numbers<[1], [0], [0], [1], [0, 0, 1, 1], [], []>} : vector<16x32xbf16>, vector<32x96xbf16>, vector<16x96xf32> -> vector<16x96xf32>
    %295 = vector.extract_strided_slice %294 {offsets = [0, 0], sizes = [16, 32], strides = [1, 1]} : vector<16x96xf32> to vector<16x32xf32>
    %296 = arith.truncf %295 : vector<16x32xf32> to vector<16x32xbf16>
    %297 = vector.extract_strided_slice %294 {offsets = [0, 32], sizes = [16, 32], strides = [1, 1]} : vector<16x96xf32> to vector<16x32xf32>
    %298 = arith.truncf %297 : vector<16x32xf32> to vector<16x32xbf16>
    %299 = vector.extract_strided_slice %294 {offsets = [0, 64], sizes = [16, 32], strides = [1, 1]} : vector<16x96xf32> to vector<16x32xf32>
    %300 = arith.truncf %299 : vector<16x32xf32> to vector<16x32xbf16>
    %301 = vector.extract_strided_slice %296 {offsets = [0, 0], sizes = [8, 32], strides = [1, 1]} : vector<16x32xbf16> to vector<8x32xbf16>
    %302 = vector.extract_strided_slice %298 {offsets = [0, 0], sizes = [8, 32], strides = [1, 1]} : vector<16x32xbf16> to vector<8x32xbf16>
    %303 = vector.extract_strided_slice %300 {offsets = [0, 0], sizes = [8, 32], strides = [1, 1]} : vector<16x32xbf16> to vector<8x32xbf16>
    %304 = vector.extract_strided_slice %301 {offsets = [0, 0], sizes = [8, 8], strides = [1, 1]} : vector<8x32xbf16> to vector<8x8xbf16>
    %305 = vector.extract_strided_slice %302 {offsets = [0, 0], sizes = [8, 8], strides = [1, 1]} : vector<8x32xbf16> to vector<8x8xbf16>
    %cst_115 = arith.constant dense<0.000000e+00> : vector<8x8xf32>
    %306 = tpu.matmul %304, %305, %cst_115 {dimension_numbers = #tpu.dot_dimension_numbers<[1], [1], [0], [0], [0, 0, 1, 0], [], []>} : vector<8x8xbf16>, vector<8x8xbf16>, vector<8x8xf32> -> vector<8x8xf32>
    %307 = vector.extract_strided_slice %301 {offsets = [0, 8], sizes = [8, 8], strides = [1, 1]} : vector<8x32xbf16> to vector<8x8xbf16>
    %308 = vector.extract_strided_slice %302 {offsets = [0, 8], sizes = [8, 8], strides = [1, 1]} : vector<8x32xbf16> to vector<8x8xbf16>
    %cst_116 = arith.constant dense<0.000000e+00> : vector<8x8xf32>
    %309 = tpu.matmul %307, %308, %cst_116 {dimension_numbers = #tpu.dot_dimension_numbers<[1], [1], [0], [0], [0, 0, 1, 0], [], []>} : vector<8x8xbf16>, vector<8x8xbf16>, vector<8x8xf32> -> vector<8x8xf32>
    %310 = vector.extract_strided_slice %301 {offsets = [0, 16], sizes = [8, 8], strides = [1, 1]} : vector<8x32xbf16> to vector<8x8xbf16>
    %311 = vector.extract_strided_slice %302 {offsets = [0, 16], sizes = [8, 8], strides = [1, 1]} : vector<8x32xbf16> to vector<8x8xbf16>
    %cst_117 = arith.constant dense<0.000000e+00> : vector<8x8xf32>
    %312 = tpu.matmul %310, %311, %cst_117 {dimension_numbers = #tpu.dot_dimension_numbers<[1], [1], [0], [0], [0, 0, 1, 0], [], []>} : vector<8x8xbf16>, vector<8x8xbf16>, vector<8x8xf32> -> vector<8x8xf32>
    %313 = vector.extract_strided_slice %301 {offsets = [0, 24], sizes = [8, 8], strides = [1, 1]} : vector<8x32xbf16> to vector<8x8xbf16>
    %314 = vector.extract_strided_slice %302 {offsets = [0, 24], sizes = [8, 8], strides = [1, 1]} : vector<8x32xbf16> to vector<8x8xbf16>
    %cst_118 = arith.constant dense<0.000000e+00> : vector<8x8xf32>
    %315 = tpu.matmul %313, %314, %cst_118 {dimension_numbers = #tpu.dot_dimension_numbers<[1], [1], [0], [0], [0, 0, 1, 0], [], []>} : vector<8x8xbf16>, vector<8x8xbf16>, vector<8x8xf32> -> vector<8x8xf32>
    %316 = tpu.concatenate %306, %309, %312, %315 in 0 : vector<8x8xf32>, vector<8x8xf32>, vector<8x8xf32>, vector<8x8xf32> -> vector<32x8xf32>
    %317 = arith.addf %316, %10 : vector<32x8xf32>
    %cst_119 = arith.constant dense<0xFF800000> : vector<32xf32>
    %318 = vector.multi_reduction <maximumf>, %317, %cst_119 [1] : vector<32x8xf32> to vector<32xf32>
    %319 = vector.shape_cast %318 : vector<32xf32> to vector<32x1xf32>
    %320 = vector.broadcast %319 : vector<32x1xf32> to vector<32x8xf32>
    %321 = arith.subf %317, %320 : vector<32x8xf32>
    %322 = math.exp %321 : vector<32x8xf32>
    %cst_120 = arith.constant dense<0.000000e+00> : vector<32xf32>
    %323 = vector.multi_reduction <add>, %322, %cst_120 [1] : vector<32x8xf32> to vector<32xf32>
    %324 = vector.shape_cast %323 : vector<32xf32> to vector<32x1xf32>
    %325 = tpu.reciprocal %324 {approx = true} : vector<32x1xf32> -> vector<32x1xf32>
    %326 = vector.broadcast %325 : vector<32x1xf32> to vector<32x8xf32>
    %327 = arith.mulf %322, %326 : vector<32x8xf32>
    %328 = arith.truncf %327 : vector<32x8xf32> to vector<32x8xbf16>
    %329 = vector.extract_strided_slice %328 {offsets = [0, 0], sizes = [8, 8], strides = [1, 1]} : vector<32x8xbf16> to vector<8x8xbf16>
    %330 = vector.extract_strided_slice %303 {offsets = [0, 0], sizes = [8, 8], strides = [1, 1]} : vector<8x32xbf16> to vector<8x8xbf16>
    %cst_121 = arith.constant dense<0.000000e+00> : vector<8x8xf32>
    %331 = tpu.matmul %329, %330, %cst_121 {dimension_numbers = #tpu.dot_dimension_numbers<[1], [0], [0], [1], [0, 0, 1, 1], [], []>} : vector<8x8xbf16>, vector<8x8xbf16>, vector<8x8xf32> -> vector<8x8xf32>
    %332 = vector.extract_strided_slice %328 {offsets = [8, 0], sizes = [8, 8], strides = [1, 1]} : vector<32x8xbf16> to vector<8x8xbf16>
    %333 = vector.extract_strided_slice %303 {offsets = [0, 8], sizes = [8, 8], strides = [1, 1]} : vector<8x32xbf16> to vector<8x8xbf16>
    %cst_122 = arith.constant dense<0.000000e+00> : vector<8x8xf32>
    %334 = tpu.matmul %332, %333, %cst_122 {dimension_numbers = #tpu.dot_dimension_numbers<[1], [0], [0], [1], [0, 0, 1, 1], [], []>} : vector<8x8xbf16>, vector<8x8xbf16>, vector<8x8xf32> -> vector<8x8xf32>
    %335 = vector.extract_strided_slice %328 {offsets = [16, 0], sizes = [8, 8], strides = [1, 1]} : vector<32x8xbf16> to vector<8x8xbf16>
    %336 = vector.extract_strided_slice %303 {offsets = [0, 16], sizes = [8, 8], strides = [1, 1]} : vector<8x32xbf16> to vector<8x8xbf16>
    %cst_123 = arith.constant dense<0.000000e+00> : vector<8x8xf32>
    %337 = tpu.matmul %335, %336, %cst_123 {dimension_numbers = #tpu.dot_dimension_numbers<[1], [0], [0], [1], [0, 0, 1, 1], [], []>} : vector<8x8xbf16>, vector<8x8xbf16>, vector<8x8xf32> -> vector<8x8xf32>
    %338 = vector.extract_strided_slice %328 {offsets = [24, 0], sizes = [8, 8], strides = [1, 1]} : vector<32x8xbf16> to vector<8x8xbf16>
    %339 = vector.extract_strided_slice %303 {offsets = [0, 24], sizes = [8, 8], strides = [1, 1]} : vector<8x32xbf16> to vector<8x8xbf16>
    %cst_124 = arith.constant dense<0.000000e+00> : vector<8x8xf32>
    %340 = tpu.matmul %338, %339, %cst_124 {dimension_numbers = #tpu.dot_dimension_numbers<[1], [0], [0], [1], [0, 0, 1, 1], [], []>} : vector<8x8xbf16>, vector<8x8xbf16>, vector<8x8xf32> -> vector<8x8xf32>
    %341 = tpu.concatenate %331, %334, %337, %340 in 1 : vector<8x8xf32>, vector<8x8xf32>, vector<8x8xf32>, vector<8x8xf32> -> vector<8x32xf32>
    %342 = vector.extract_strided_slice %296 {offsets = [8, 0], sizes = [8, 32], strides = [1, 1]} : vector<16x32xbf16> to vector<8x32xbf16>
    %343 = vector.extract_strided_slice %298 {offsets = [8, 0], sizes = [8, 32], strides = [1, 1]} : vector<16x32xbf16> to vector<8x32xbf16>
    %344 = vector.extract_strided_slice %300 {offsets = [8, 0], sizes = [8, 32], strides = [1, 1]} : vector<16x32xbf16> to vector<8x32xbf16>
    %345 = vector.extract_strided_slice %342 {offsets = [0, 0], sizes = [8, 8], strides = [1, 1]} : vector<8x32xbf16> to vector<8x8xbf16>
    %346 = vector.extract_strided_slice %343 {offsets = [0, 0], sizes = [8, 8], strides = [1, 1]} : vector<8x32xbf16> to vector<8x8xbf16>
    %cst_125 = arith.constant dense<0.000000e+00> : vector<8x8xf32>
    %347 = tpu.matmul %345, %346, %cst_125 {dimension_numbers = #tpu.dot_dimension_numbers<[1], [1], [0], [0], [0, 0, 1, 0], [], []>} : vector<8x8xbf16>, vector<8x8xbf16>, vector<8x8xf32> -> vector<8x8xf32>
    %348 = vector.extract_strided_slice %342 {offsets = [0, 8], sizes = [8, 8], strides = [1, 1]} : vector<8x32xbf16> to vector<8x8xbf16>
    %349 = vector.extract_strided_slice %343 {offsets = [0, 8], sizes = [8, 8], strides = [1, 1]} : vector<8x32xbf16> to vector<8x8xbf16>
    %cst_126 = arith.constant dense<0.000000e+00> : vector<8x8xf32>
    %350 = tpu.matmul %348, %349, %cst_126 {dimension_numbers = #tpu.dot_dimension_numbers<[1], [1], [0], [0], [0, 0, 1, 0], [], []>} : vector<8x8xbf16>, vector<8x8xbf16>, vector<8x8xf32> -> vector<8x8xf32>
    %351 = vector.extract_strided_slice %342 {offsets = [0, 16], sizes = [8, 8], strides = [1, 1]} : vector<8x32xbf16> to vector<8x8xbf16>
    %352 = vector.extract_strided_slice %343 {offsets = [0, 16], sizes = [8, 8], strides = [1, 1]} : vector<8x32xbf16> to vector<8x8xbf16>
    %cst_127 = arith.constant dense<0.000000e+00> : vector<8x8xf32>
    %353 = tpu.matmul %351, %352, %cst_127 {dimension_numbers = #tpu.dot_dimension_numbers<[1], [1], [0], [0], [0, 0, 1, 0], [], []>} : vector<8x8xbf16>, vector<8x8xbf16>, vector<8x8xf32> -> vector<8x8xf32>
    %354 = vector.extract_strided_slice %342 {offsets = [0, 24], sizes = [8, 8], strides = [1, 1]} : vector<8x32xbf16> to vector<8x8xbf16>
    %355 = vector.extract_strided_slice %343 {offsets = [0, 24], sizes = [8, 8], strides = [1, 1]} : vector<8x32xbf16> to vector<8x8xbf16>
    %cst_128 = arith.constant dense<0.000000e+00> : vector<8x8xf32>
    %356 = tpu.matmul %354, %355, %cst_128 {dimension_numbers = #tpu.dot_dimension_numbers<[1], [1], [0], [0], [0, 0, 1, 0], [], []>} : vector<8x8xbf16>, vector<8x8xbf16>, vector<8x8xf32> -> vector<8x8xf32>
    %357 = tpu.concatenate %347, %350, %353, %356 in 0 : vector<8x8xf32>, vector<8x8xf32>, vector<8x8xf32>, vector<8x8xf32> -> vector<32x8xf32>
    %358 = arith.addf %357, %16 : vector<32x8xf32>
    %cst_129 = arith.constant dense<0xFF800000> : vector<32xf32>
    %359 = vector.multi_reduction <maximumf>, %358, %cst_129 [1] : vector<32x8xf32> to vector<32xf32>
    %360 = vector.shape_cast %359 : vector<32xf32> to vector<32x1xf32>
    %361 = vector.broadcast %360 : vector<32x1xf32> to vector<32x8xf32>
    %362 = arith.subf %358, %361 : vector<32x8xf32>
    %363 = math.exp %362 : vector<32x8xf32>
    %cst_130 = arith.constant dense<0.000000e+00> : vector<32xf32>
    %364 = vector.multi_reduction <add>, %363, %cst_130 [1] : vector<32x8xf32> to vector<32xf32>
    %365 = vector.shape_cast %364 : vector<32xf32> to vector<32x1xf32>
    %366 = tpu.reciprocal %365 {approx = true} : vector<32x1xf32> -> vector<32x1xf32>
    %367 = vector.broadcast %366 : vector<32x1xf32> to vector<32x8xf32>
    %368 = arith.mulf %363, %367 : vector<32x8xf32>
    %369 = arith.truncf %368 : vector<32x8xf32> to vector<32x8xbf16>
    %370 = vector.extract_strided_slice %369 {offsets = [0, 0], sizes = [8, 8], strides = [1, 1]} : vector<32x8xbf16> to vector<8x8xbf16>
    %371 = vector.extract_strided_slice %344 {offsets = [0, 0], sizes = [8, 8], strides = [1, 1]} : vector<8x32xbf16> to vector<8x8xbf16>
    %cst_131 = arith.constant dense<0.000000e+00> : vector<8x8xf32>
    %372 = tpu.matmul %370, %371, %cst_131 {dimension_numbers = #tpu.dot_dimension_numbers<[1], [0], [0], [1], [0, 0, 1, 1], [], []>} : vector<8x8xbf16>, vector<8x8xbf16>, vector<8x8xf32> -> vector<8x8xf32>
    %373 = vector.extract_strided_slice %369 {offsets = [8, 0], sizes = [8, 8], strides = [1, 1]} : vector<32x8xbf16> to vector<8x8xbf16>
    %374 = vector.extract_strided_slice %344 {offsets = [0, 8], sizes = [8, 8], strides = [1, 1]} : vector<8x32xbf16> to vector<8x8xbf16>
    %cst_132 = arith.constant dense<0.000000e+00> : vector<8x8xf32>
    %375 = tpu.matmul %373, %374, %cst_132 {dimension_numbers = #tpu.dot_dimension_numbers<[1], [0], [0], [1], [0, 0, 1, 1], [], []>} : vector<8x8xbf16>, vector<8x8xbf16>, vector<8x8xf32> -> vector<8x8xf32>
    %376 = vector.extract_strided_slice %369 {offsets = [16, 0], sizes = [8, 8], strides = [1, 1]} : vector<32x8xbf16> to vector<8x8xbf16>
    %377 = vector.extract_strided_slice %344 {offsets = [0, 16], sizes = [8, 8], strides = [1, 1]} : vector<8x32xbf16> to vector<8x8xbf16>
    %cst_133 = arith.constant dense<0.000000e+00> : vector<8x8xf32>
    %378 = tpu.matmul %376, %377, %cst_133 {dimension_numbers = #tpu.dot_dimension_numbers<[1], [0], [0], [1], [0, 0, 1, 1], [], []>} : vector<8x8xbf16>, vector<8x8xbf16>, vector<8x8xf32> -> vector<8x8xf32>
    %379 = vector.extract_strided_slice %369 {offsets = [24, 0], sizes = [8, 8], strides = [1, 1]} : vector<32x8xbf16> to vector<8x8xbf16>
    %380 = vector.extract_strided_slice %344 {offsets = [0, 24], sizes = [8, 8], strides = [1, 1]} : vector<8x32xbf16> to vector<8x8xbf16>
    %cst_134 = arith.constant dense<0.000000e+00> : vector<8x8xf32>
    %381 = tpu.matmul %379, %380, %cst_134 {dimension_numbers = #tpu.dot_dimension_numbers<[1], [0], [0], [1], [0, 0, 1, 1], [], []>} : vector<8x8xbf16>, vector<8x8xbf16>, vector<8x8xf32> -> vector<8x8xf32>
    %382 = tpu.concatenate %372, %375, %378, %381 in 1 : vector<8x8xf32>, vector<8x8xf32>, vector<8x8xf32>, vector<8x8xf32> -> vector<8x32xf32>
    %383 = tpu.concatenate %341, %382 in 0 : vector<8x32xf32>, vector<8x32xf32> -> vector<16x32xf32>
    %c1_135 = arith.constant 1 : index
    %c0_136 = arith.constant 0 : index
    %c0_137 = arith.constant 0 : index
    %384 = vector.load %arg8[%c1_135, %c0_136, %c0_137] : memref<2x32x32xbf16, #tpu.memory_space<vmem>>, vector<1x32x32xbf16>
    %385 = vector.shape_cast %384 : vector<1x32x32xbf16> to vector<32x32xbf16>
    %386 = arith.truncf %383 : vector<16x32xf32> to vector<16x32xbf16>
    %cst_138 = arith.constant dense<0.000000e+00> : vector<16x32xf32>
    %387 = tpu.matmul %386, %385, %cst_138 {dimension_numbers = #tpu.dot_dimension_numbers<[1], [0], [0], [1], [0, 0, 1, 1], [], []>} : vector<16x32xbf16>, vector<32x32xbf16>, vector<16x32xf32> -> vector<16x32xf32>
    %388 = arith.addf %276, %387 : vector<16x32xf32>
    %c1_139 = arith.constant 1 : index
    %c0_140 = arith.constant 0 : index
    %c0_141 = arith.constant 0 : index
    %389 = vector.load %arg9[%c1_139, %c0_140, %c0_141] : memref<2x1x32xf32, #tpu.memory_space<vmem>>, vector<1x1x32xf32>
    %390 = vector.shape_cast %389 : vector<1x1x32xf32> to vector<1x32xf32>
    %391 = arith.mulf %388, %388 : vector<16x32xf32>
    %cst_142 = arith.constant dense<0.000000e+00> : vector<16xf32>
    %392 = vector.multi_reduction <add>, %391, %cst_142 [1] : vector<16x32xf32> to vector<16xf32>
    %393 = vector.shape_cast %392 : vector<16xf32> to vector<16x1xf32>
    %cst_143 = arith.constant 3.200000e+01 : f32
    %394 = vector.broadcast %cst_143 : f32 to vector<16x1xf32>
    %395 = arith.divf %393, %394 : vector<16x1xf32>
    %cst_144 = arith.constant 9.99999997E-7 : f32
    %396 = vector.broadcast %cst_144 : f32 to vector<16x1xf32>
    %397 = arith.addf %395, %396 : vector<16x1xf32>
    %398 = math.rsqrt %397 : vector<16x1xf32>
    %399 = vector.broadcast %398 : vector<16x1xf32> to vector<16x32xf32>
    %400 = arith.mulf %388, %399 : vector<16x32xf32>
    %401 = vector.broadcast %390 : vector<1x32xf32> to vector<16x32xf32>
    %402 = arith.mulf %400, %401 : vector<16x32xf32>
    %c1_145 = arith.constant 1 : index
    %c0_146 = arith.constant 0 : index
    %c0_147 = arith.constant 0 : index
    %403 = vector.load %arg10[%c1_145, %c0_146, %c0_147] : memref<2x32x32xbf16, #tpu.memory_space<vmem>>, vector<1x32x32xbf16>
    %404 = vector.shape_cast %403 : vector<1x32x32xbf16> to vector<32x32xbf16>
    %405 = arith.truncf %402 : vector<16x32xf32> to vector<16x32xbf16>
    %cst_148 = arith.constant dense<0.000000e+00> : vector<16x32xf32>
    %406 = tpu.matmul %405, %404, %cst_148 {dimension_numbers = #tpu.dot_dimension_numbers<[1], [0], [0], [1], [0, 0, 1, 1], [], []>} : vector<16x32xbf16>, vector<32x32xbf16>, vector<16x32xf32> -> vector<16x32xf32>
    %407 = arith.truncf %406 : vector<16x32xf32> to vector<16x32xbf16>
    %c1_149 = arith.constant 1 : index
    %c0_150 = arith.constant 0 : index
    %c0_151 = arith.constant 0 : index
    %408 = vector.load %arg11[%c1_149, %c0_150, %c0_151] : memref<2x32x64xbf16, #tpu.memory_space<vmem>>, vector<1x32x64xbf16>
    %409 = vector.shape_cast %408 : vector<1x32x64xbf16> to vector<32x64xbf16>
    %410 = arith.truncf %3 : vector<16x32xf32> to vector<16x32xbf16>
    %cst_152 = arith.constant dense<0.000000e+00> : vector<16x64xf32>
    %411 = tpu.matmul %410, %409, %cst_152 {dimension_numbers = #tpu.dot_dimension_numbers<[1], [0], [0], [1], [0, 0, 1, 1], [], []>} : vector<16x32xbf16>, vector<32x64xbf16>, vector<16x64xf32> -> vector<16x64xf32>
    %412 = vector.extract_strided_slice %411 {offsets = [0, 0], sizes = [16, 32], strides = [1, 1]} : vector<16x64xf32> to vector<16x32xf32>
    %413 = arith.truncf %412 : vector<16x32xf32> to vector<16x32xbf16>
    %414 = vector.extract_strided_slice %411 {offsets = [0, 32], sizes = [16, 32], strides = [1, 1]} : vector<16x64xf32> to vector<16x32xf32>
    %415 = arith.truncf %414 : vector<16x32xf32> to vector<16x32xbf16>
    %416 = vector.extract_strided_slice %407 {offsets = [0, 0], sizes = [8, 32], strides = [1, 1]} : vector<16x32xbf16> to vector<8x32xbf16>
    %417 = vector.extract_strided_slice %413 {offsets = [0, 0], sizes = [8, 32], strides = [1, 1]} : vector<16x32xbf16> to vector<8x32xbf16>
    %418 = vector.extract_strided_slice %415 {offsets = [0, 0], sizes = [8, 32], strides = [1, 1]} : vector<16x32xbf16> to vector<8x32xbf16>
    %419 = vector.extract_strided_slice %416 {offsets = [0, 0], sizes = [8, 8], strides = [1, 1]} : vector<8x32xbf16> to vector<8x8xbf16>
    %420 = vector.extract_strided_slice %417 {offsets = [0, 0], sizes = [8, 8], strides = [1, 1]} : vector<8x32xbf16> to vector<8x8xbf16>
    %cst_153 = arith.constant dense<0.000000e+00> : vector<8x8xf32>
    %421 = tpu.matmul %419, %420, %cst_153 {dimension_numbers = #tpu.dot_dimension_numbers<[1], [1], [0], [0], [0, 0, 1, 0], [], []>} : vector<8x8xbf16>, vector<8x8xbf16>, vector<8x8xf32> -> vector<8x8xf32>
    %422 = vector.extract_strided_slice %416 {offsets = [0, 8], sizes = [8, 8], strides = [1, 1]} : vector<8x32xbf16> to vector<8x8xbf16>
    %423 = vector.extract_strided_slice %417 {offsets = [0, 8], sizes = [8, 8], strides = [1, 1]} : vector<8x32xbf16> to vector<8x8xbf16>
    %cst_154 = arith.constant dense<0.000000e+00> : vector<8x8xf32>
    %424 = tpu.matmul %422, %423, %cst_154 {dimension_numbers = #tpu.dot_dimension_numbers<[1], [1], [0], [0], [0, 0, 1, 0], [], []>} : vector<8x8xbf16>, vector<8x8xbf16>, vector<8x8xf32> -> vector<8x8xf32>
    %425 = vector.extract_strided_slice %416 {offsets = [0, 16], sizes = [8, 8], strides = [1, 1]} : vector<8x32xbf16> to vector<8x8xbf16>
    %426 = vector.extract_strided_slice %417 {offsets = [0, 16], sizes = [8, 8], strides = [1, 1]} : vector<8x32xbf16> to vector<8x8xbf16>
    %cst_155 = arith.constant dense<0.000000e+00> : vector<8x8xf32>
    %427 = tpu.matmul %425, %426, %cst_155 {dimension_numbers = #tpu.dot_dimension_numbers<[1], [1], [0], [0], [0, 0, 1, 0], [], []>} : vector<8x8xbf16>, vector<8x8xbf16>, vector<8x8xf32> -> vector<8x8xf32>
    %428 = vector.extract_strided_slice %416 {offsets = [0, 24], sizes = [8, 8], strides = [1, 1]} : vector<8x32xbf16> to vector<8x8xbf16>
    %429 = vector.extract_strided_slice %417 {offsets = [0, 24], sizes = [8, 8], strides = [1, 1]} : vector<8x32xbf16> to vector<8x8xbf16>
    %cst_156 = arith.constant dense<0.000000e+00> : vector<8x8xf32>
    %430 = tpu.matmul %428, %429, %cst_156 {dimension_numbers = #tpu.dot_dimension_numbers<[1], [1], [0], [0], [0, 0, 1, 0], [], []>} : vector<8x8xbf16>, vector<8x8xbf16>, vector<8x8xf32> -> vector<8x8xf32>
    %431 = tpu.concatenate %421, %424, %427, %430 in 0 : vector<8x8xf32>, vector<8x8xf32>, vector<8x8xf32>, vector<8x8xf32> -> vector<32x8xf32>
    %432 = arith.addf %431, %20 : vector<32x8xf32>
    %cst_157 = arith.constant dense<0xFF800000> : vector<32xf32>
    %433 = vector.multi_reduction <maximumf>, %432, %cst_157 [1] : vector<32x8xf32> to vector<32xf32>
    %434 = vector.shape_cast %433 : vector<32xf32> to vector<32x1xf32>
    %435 = vector.broadcast %434 : vector<32x1xf32> to vector<32x8xf32>
    %436 = arith.subf %432, %435 : vector<32x8xf32>
    %437 = math.exp %436 : vector<32x8xf32>
    %cst_158 = arith.constant dense<0.000000e+00> : vector<32xf32>
    %438 = vector.multi_reduction <add>, %437, %cst_158 [1] : vector<32x8xf32> to vector<32xf32>
    %439 = vector.shape_cast %438 : vector<32xf32> to vector<32x1xf32>
    %440 = tpu.reciprocal %439 {approx = true} : vector<32x1xf32> -> vector<32x1xf32>
    %441 = vector.broadcast %440 : vector<32x1xf32> to vector<32x8xf32>
    %442 = arith.mulf %437, %441 : vector<32x8xf32>
    %443 = arith.truncf %442 : vector<32x8xf32> to vector<32x8xbf16>
    %444 = vector.extract_strided_slice %443 {offsets = [0, 0], sizes = [8, 8], strides = [1, 1]} : vector<32x8xbf16> to vector<8x8xbf16>
    %445 = vector.extract_strided_slice %418 {offsets = [0, 0], sizes = [8, 8], strides = [1, 1]} : vector<8x32xbf16> to vector<8x8xbf16>
    %cst_159 = arith.constant dense<0.000000e+00> : vector<8x8xf32>
    %446 = tpu.matmul %444, %445, %cst_159 {dimension_numbers = #tpu.dot_dimension_numbers<[1], [0], [0], [1], [0, 0, 1, 1], [], []>} : vector<8x8xbf16>, vector<8x8xbf16>, vector<8x8xf32> -> vector<8x8xf32>
    %447 = vector.extract_strided_slice %443 {offsets = [8, 0], sizes = [8, 8], strides = [1, 1]} : vector<32x8xbf16> to vector<8x8xbf16>
    %448 = vector.extract_strided_slice %418 {offsets = [0, 8], sizes = [8, 8], strides = [1, 1]} : vector<8x32xbf16> to vector<8x8xbf16>
    %cst_160 = arith.constant dense<0.000000e+00> : vector<8x8xf32>
    %449 = tpu.matmul %447, %448, %cst_160 {dimension_numbers = #tpu.dot_dimension_numbers<[1], [0], [0], [1], [0, 0, 1, 1], [], []>} : vector<8x8xbf16>, vector<8x8xbf16>, vector<8x8xf32> -> vector<8x8xf32>
    %450 = vector.extract_strided_slice %443 {offsets = [16, 0], sizes = [8, 8], strides = [1, 1]} : vector<32x8xbf16> to vector<8x8xbf16>
    %451 = vector.extract_strided_slice %418 {offsets = [0, 16], sizes = [8, 8], strides = [1, 1]} : vector<8x32xbf16> to vector<8x8xbf16>
    %cst_161 = arith.constant dense<0.000000e+00> : vector<8x8xf32>
    %452 = tpu.matmul %450, %451, %cst_161 {dimension_numbers = #tpu.dot_dimension_numbers<[1], [0], [0], [1], [0, 0, 1, 1], [], []>} : vector<8x8xbf16>, vector<8x8xbf16>, vector<8x8xf32> -> vector<8x8xf32>
    %453 = vector.extract_strided_slice %443 {offsets = [24, 0], sizes = [8, 8], strides = [1, 1]} : vector<32x8xbf16> to vector<8x8xbf16>
    %454 = vector.extract_strided_slice %418 {offsets = [0, 24], sizes = [8, 8], strides = [1, 1]} : vector<8x32xbf16> to vector<8x8xbf16>
    %cst_162 = arith.constant dense<0.000000e+00> : vector<8x8xf32>
    %455 = tpu.matmul %453, %454, %cst_162 {dimension_numbers = #tpu.dot_dimension_numbers<[1], [0], [0], [1], [0, 0, 1, 1], [], []>} : vector<8x8xbf16>, vector<8x8xbf16>, vector<8x8xf32> -> vector<8x8xf32>
    %456 = tpu.concatenate %446, %449, %452, %455 in 1 : vector<8x8xf32>, vector<8x8xf32>, vector<8x8xf32>, vector<8x8xf32> -> vector<8x32xf32>
    %457 = vector.extract_strided_slice %407 {offsets = [8, 0], sizes = [8, 32], strides = [1, 1]} : vector<16x32xbf16> to vector<8x32xbf16>
    %458 = vector.extract_strided_slice %413 {offsets = [8, 0], sizes = [8, 32], strides = [1, 1]} : vector<16x32xbf16> to vector<8x32xbf16>
    %459 = vector.extract_strided_slice %415 {offsets = [8, 0], sizes = [8, 32], strides = [1, 1]} : vector<16x32xbf16> to vector<8x32xbf16>
    %460 = vector.extract_strided_slice %457 {offsets = [0, 0], sizes = [8, 8], strides = [1, 1]} : vector<8x32xbf16> to vector<8x8xbf16>
    %461 = vector.extract_strided_slice %458 {offsets = [0, 0], sizes = [8, 8], strides = [1, 1]} : vector<8x32xbf16> to vector<8x8xbf16>
    %cst_163 = arith.constant dense<0.000000e+00> : vector<8x8xf32>
    %462 = tpu.matmul %460, %461, %cst_163 {dimension_numbers = #tpu.dot_dimension_numbers<[1], [1], [0], [0], [0, 0, 1, 0], [], []>} : vector<8x8xbf16>, vector<8x8xbf16>, vector<8x8xf32> -> vector<8x8xf32>
    %463 = vector.extract_strided_slice %457 {offsets = [0, 8], sizes = [8, 8], strides = [1, 1]} : vector<8x32xbf16> to vector<8x8xbf16>
    %464 = vector.extract_strided_slice %458 {offsets = [0, 8], sizes = [8, 8], strides = [1, 1]} : vector<8x32xbf16> to vector<8x8xbf16>
    %cst_164 = arith.constant dense<0.000000e+00> : vector<8x8xf32>
    %465 = tpu.matmul %463, %464, %cst_164 {dimension_numbers = #tpu.dot_dimension_numbers<[1], [1], [0], [0], [0, 0, 1, 0], [], []>} : vector<8x8xbf16>, vector<8x8xbf16>, vector<8x8xf32> -> vector<8x8xf32>
    %466 = vector.extract_strided_slice %457 {offsets = [0, 16], sizes = [8, 8], strides = [1, 1]} : vector<8x32xbf16> to vector<8x8xbf16>
    %467 = vector.extract_strided_slice %458 {offsets = [0, 16], sizes = [8, 8], strides = [1, 1]} : vector<8x32xbf16> to vector<8x8xbf16>
    %cst_165 = arith.constant dense<0.000000e+00> : vector<8x8xf32>
    %468 = tpu.matmul %466, %467, %cst_165 {dimension_numbers = #tpu.dot_dimension_numbers<[1], [1], [0], [0], [0, 0, 1, 0], [], []>} : vector<8x8xbf16>, vector<8x8xbf16>, vector<8x8xf32> -> vector<8x8xf32>
    %469 = vector.extract_strided_slice %457 {offsets = [0, 24], sizes = [8, 8], strides = [1, 1]} : vector<8x32xbf16> to vector<8x8xbf16>
    %470 = vector.extract_strided_slice %458 {offsets = [0, 24], sizes = [8, 8], strides = [1, 1]} : vector<8x32xbf16> to vector<8x8xbf16>
    %cst_166 = arith.constant dense<0.000000e+00> : vector<8x8xf32>
    %471 = tpu.matmul %469, %470, %cst_166 {dimension_numbers = #tpu.dot_dimension_numbers<[1], [1], [0], [0], [0, 0, 1, 0], [], []>} : vector<8x8xbf16>, vector<8x8xbf16>, vector<8x8xf32> -> vector<8x8xf32>
    %472 = tpu.concatenate %462, %465, %468, %471 in 0 : vector<8x8xf32>, vector<8x8xf32>, vector<8x8xf32>, vector<8x8xf32> -> vector<32x8xf32>
    %473 = arith.addf %472, %24 : vector<32x8xf32>
    %cst_167 = arith.constant dense<0xFF800000> : vector<32xf32>
    %474 = vector.multi_reduction <maximumf>, %473, %cst_167 [1] : vector<32x8xf32> to vector<32xf32>
    %475 = vector.shape_cast %474 : vector<32xf32> to vector<32x1xf32>
    %476 = vector.broadcast %475 : vector<32x1xf32> to vector<32x8xf32>
    %477 = arith.subf %473, %476 : vector<32x8xf32>
    %478 = math.exp %477 : vector<32x8xf32>
    %cst_168 = arith.constant dense<0.000000e+00> : vector<32xf32>
    %479 = vector.multi_reduction <add>, %478, %cst_168 [1] : vector<32x8xf32> to vector<32xf32>
    %480 = vector.shape_cast %479 : vector<32xf32> to vector<32x1xf32>
    %481 = tpu.reciprocal %480 {approx = true} : vector<32x1xf32> -> vector<32x1xf32>
    %482 = vector.broadcast %481 : vector<32x1xf32> to vector<32x8xf32>
    %483 = arith.mulf %478, %482 : vector<32x8xf32>
    %484 = arith.truncf %483 : vector<32x8xf32> to vector<32x8xbf16>
    %485 = vector.extract_strided_slice %484 {offsets = [0, 0], sizes = [8, 8], strides = [1, 1]} : vector<32x8xbf16> to vector<8x8xbf16>
    %486 = vector.extract_strided_slice %459 {offsets = [0, 0], sizes = [8, 8], strides = [1, 1]} : vector<8x32xbf16> to vector<8x8xbf16>
    %cst_169 = arith.constant dense<0.000000e+00> : vector<8x8xf32>
    %487 = tpu.matmul %485, %486, %cst_169 {dimension_numbers = #tpu.dot_dimension_numbers<[1], [0], [0], [1], [0, 0, 1, 1], [], []>} : vector<8x8xbf16>, vector<8x8xbf16>, vector<8x8xf32> -> vector<8x8xf32>
    %488 = vector.extract_strided_slice %484 {offsets = [8, 0], sizes = [8, 8], strides = [1, 1]} : vector<32x8xbf16> to vector<8x8xbf16>
    %489 = vector.extract_strided_slice %459 {offsets = [0, 8], sizes = [8, 8], strides = [1, 1]} : vector<8x32xbf16> to vector<8x8xbf16>
    %cst_170 = arith.constant dense<0.000000e+00> : vector<8x8xf32>
    %490 = tpu.matmul %488, %489, %cst_170 {dimension_numbers = #tpu.dot_dimension_numbers<[1], [0], [0], [1], [0, 0, 1, 1], [], []>} : vector<8x8xbf16>, vector<8x8xbf16>, vector<8x8xf32> -> vector<8x8xf32>
    %491 = vector.extract_strided_slice %484 {offsets = [16, 0], sizes = [8, 8], strides = [1, 1]} : vector<32x8xbf16> to vector<8x8xbf16>
    %492 = vector.extract_strided_slice %459 {offsets = [0, 16], sizes = [8, 8], strides = [1, 1]} : vector<8x32xbf16> to vector<8x8xbf16>
    %cst_171 = arith.constant dense<0.000000e+00> : vector<8x8xf32>
    %493 = tpu.matmul %491, %492, %cst_171 {dimension_numbers = #tpu.dot_dimension_numbers<[1], [0], [0], [1], [0, 0, 1, 1], [], []>} : vector<8x8xbf16>, vector<8x8xbf16>, vector<8x8xf32> -> vector<8x8xf32>
    %494 = vector.extract_strided_slice %484 {offsets = [24, 0], sizes = [8, 8], strides = [1, 1]} : vector<32x8xbf16> to vector<8x8xbf16>
    %495 = vector.extract_strided_slice %459 {offsets = [0, 24], sizes = [8, 8], strides = [1, 1]} : vector<8x32xbf16> to vector<8x8xbf16>
    %cst_172 = arith.constant dense<0.000000e+00> : vector<8x8xf32>
    %496 = tpu.matmul %494, %495, %cst_172 {dimension_numbers = #tpu.dot_dimension_numbers<[1], [0], [0], [1], [0, 0, 1, 1], [], []>} : vector<8x8xbf16>, vector<8x8xbf16>, vector<8x8xf32> -> vector<8x8xf32>
    %497 = tpu.concatenate %487, %490, %493, %496 in 1 : vector<8x8xf32>, vector<8x8xf32>, vector<8x8xf32>, vector<8x8xf32> -> vector<8x32xf32>
    %498 = tpu.concatenate %456, %497 in 0 : vector<8x32xf32>, vector<8x32xf32> -> vector<16x32xf32>
    %c1_173 = arith.constant 1 : index
    %c0_174 = arith.constant 0 : index
    %c0_175 = arith.constant 0 : index
    %499 = vector.load %arg12[%c1_173, %c0_174, %c0_175] : memref<2x32x32xbf16, #tpu.memory_space<vmem>>, vector<1x32x32xbf16>
    %500 = vector.shape_cast %499 : vector<1x32x32xbf16> to vector<32x32xbf16>
    %501 = arith.truncf %498 : vector<16x32xf32> to vector<16x32xbf16>
    %cst_176 = arith.constant dense<0.000000e+00> : vector<16x32xf32>
    %502 = tpu.matmul %501, %500, %cst_176 {dimension_numbers = #tpu.dot_dimension_numbers<[1], [0], [0], [1], [0, 0, 1, 1], [], []>} : vector<16x32xbf16>, vector<32x32xbf16>, vector<16x32xf32> -> vector<16x32xf32>
    %503 = arith.addf %388, %502 : vector<16x32xf32>
    %c1_177 = arith.constant 1 : index
    %c0_178 = arith.constant 0 : index
    %c0_179 = arith.constant 0 : index
    %504 = vector.load %arg13[%c1_177, %c0_178, %c0_179] : memref<2x1x32xf32, #tpu.memory_space<vmem>>, vector<1x1x32xf32>
    %505 = vector.shape_cast %504 : vector<1x1x32xf32> to vector<1x32xf32>
    %506 = arith.mulf %503, %503 : vector<16x32xf32>
    %cst_180 = arith.constant dense<0.000000e+00> : vector<16xf32>
    %507 = vector.multi_reduction <add>, %506, %cst_180 [1] : vector<16x32xf32> to vector<16xf32>
    %508 = vector.shape_cast %507 : vector<16xf32> to vector<16x1xf32>
    %cst_181 = arith.constant 3.200000e+01 : f32
    %509 = vector.broadcast %cst_181 : f32 to vector<16x1xf32>
    %510 = arith.divf %508, %509 : vector<16x1xf32>
    %cst_182 = arith.constant 9.99999997E-7 : f32
    %511 = vector.broadcast %cst_182 : f32 to vector<16x1xf32>
    %512 = arith.addf %510, %511 : vector<16x1xf32>
    %513 = math.rsqrt %512 : vector<16x1xf32>
    %514 = vector.broadcast %513 : vector<16x1xf32> to vector<16x32xf32>
    %515 = arith.mulf %503, %514 : vector<16x32xf32>
    %516 = vector.broadcast %505 : vector<1x32xf32> to vector<16x32xf32>
    %517 = arith.mulf %515, %516 : vector<16x32xf32>
    %c1_183 = arith.constant 1 : index
    %c0_184 = arith.constant 0 : index
    %c0_185 = arith.constant 0 : index
    %518 = vector.load %arg14[%c1_183, %c0_184, %c0_185] : memref<2x32x64xbf16, #tpu.memory_space<vmem>>, vector<1x32x64xbf16>
    %519 = vector.shape_cast %518 : vector<1x32x64xbf16> to vector<32x64xbf16>
    %520 = arith.truncf %517 : vector<16x32xf32> to vector<16x32xbf16>
    %cst_186 = arith.constant dense<0.000000e+00> : vector<16x64xf32>
    %521 = tpu.matmul %520, %519, %cst_186 {dimension_numbers = #tpu.dot_dimension_numbers<[1], [0], [0], [1], [0, 0, 1, 1], [], []>} : vector<16x32xbf16>, vector<32x64xbf16>, vector<16x64xf32> -> vector<16x64xf32>
    %cst_187 = arith.constant 0.000000e+00 : f32
    %522 = vector.broadcast %cst_187 : f32 to vector<16x64xf32>
    %523 = arith.maximumf %521, %522 : vector<16x64xf32>
    %c1_188 = arith.constant 1 : index
    %c0_189 = arith.constant 0 : index
    %c0_190 = arith.constant 0 : index
    %524 = vector.load %arg15[%c1_188, %c0_189, %c0_190] : memref<2x64x32xbf16, #tpu.memory_space<vmem>>, vector<1x64x32xbf16>
    %525 = vector.shape_cast %524 : vector<1x64x32xbf16> to vector<64x32xbf16>
    %526 = arith.truncf %523 : vector<16x64xf32> to vector<16x64xbf16>
    %cst_191 = arith.constant dense<0.000000e+00> : vector<16x32xf32>
    %527 = tpu.matmul %526, %525, %cst_191 {dimension_numbers = #tpu.dot_dimension_numbers<[1], [0], [0], [1], [0, 0, 1, 1], [], []>} : vector<16x64xbf16>, vector<64x32xbf16>, vector<16x32xf32> -> vector<16x32xf32>
    %528 = arith.addf %503, %527 : vector<16x32xf32>
    %c0_192 = arith.constant 0 : index
    %c0_193 = arith.constant 0 : index
    %529 = vector.load %arg16[%c0_192, %c0_193] : memref<1x32xf32, #tpu.memory_space<vmem>>, vector<1x32xf32>
    %530 = arith.mulf %528, %528 : vector<16x32xf32>
    %cst_194 = arith.constant dense<0.000000e+00> : vector<16xf32>
    %531 = vector.multi_reduction <add>, %530, %cst_194 [1] : vector<16x32xf32> to vector<16xf32>
    %532 = vector.shape_cast %531 : vector<16xf32> to vector<16x1xf32>
    %cst_195 = arith.constant 3.200000e+01 : f32
    %533 = vector.broadcast %cst_195 : f32 to vector<16x1xf32>
    %534 = arith.divf %532, %533 : vector<16x1xf32>
    %cst_196 = arith.constant 9.99999997E-7 : f32
    %535 = vector.broadcast %cst_196 : f32 to vector<16x1xf32>
    %536 = arith.addf %534, %535 : vector<16x1xf32>
    %537 = math.rsqrt %536 : vector<16x1xf32>
    %538 = vector.broadcast %537 : vector<16x1xf32> to vector<16x32xf32>
    %539 = arith.mulf %528, %538 : vector<16x32xf32>
    %540 = vector.broadcast %529 : vector<1x32xf32> to vector<16x32xf32>
    %541 = arith.mulf %539, %540 : vector<16x32xf32>
    %542 = vector.shape_cast %541 : vector<16x32xf32> to vector<2x8x32xf32>
    %c0_197 = arith.constant 0 : index
    %c0_198 = arith.constant 0 : index
    %c0_199 = arith.constant 0 : index
    %543 = vector.load %arg17[%c0_197, %c0_198, %c0_199] : memref<2x8x32xf32, #tpu.memory_space<vmem>>, vector<2x8x32xf32>
    tpu.vector_store %arg17[%c0_197, %c0_198, %c0_199], %542 {strides = array<i32>} : memref<2x8x32xf32, #tpu.memory_space<vmem>>, vector<2x8x32xf32>,
    return
  }
  func.func @transform_0(%arg0: i32) -> (i32, i32, i32) {
    %c0_i32 = arith.constant 0 : i32
    %c0_i32_0 = arith.constant 0 : i32
    %c0_i32_1 = arith.constant 0 : i32
    return %arg0, %c0_i32, %c0_i32_0 : i32, i32, i32
  }
  func.func @transform_1(%arg0: i32) -> (i32, i32, i32) {
    %c0_i32 = arith.constant 0 : i32
    %c0_i32_0 = arith.constant 0 : i32
    %c0_i32_1 = arith.constant 0 : i32
    return %arg0, %c0_i32, %c0_i32_0 : i32, i32, i32
  }
  func.func @transform_2(%arg0: i32) -> (i32, i32, i32) {
    %c0_i32 = arith.constant 0 : i32
    %c0_i32_0 = arith.constant 0 : i32
    %c0_i32_1 = arith.constant 0 : i32
    %c0_i32_2 = arith.constant 0 : i32
    return %c0_i32, %c0_i32_0, %c0_i32_1 : i32, i32, i32
  }
  func.func @transform_3(%arg0: i32) -> (i32, i32, i32) {
    %c0_i32 = arith.constant 0 : i32
    %c0_i32_0 = arith.constant 0 : i32
    %c0_i32_1 = arith.constant 0 : i32
    return %arg0, %c0_i32, %c0_i32_0 : i32, i32, i32
  }
  func.func @transform_4(%arg0: i32) -> (i32, i32, i32) {
    %c0_i32 = arith.constant 0 : i32
    %c0_i32_0 = arith.constant 0 : i32
    %c0_i32_1 = arith.constant 0 : i32
    return %arg0, %c0_i32, %c0_i32_0 : i32, i32, i32
  }
  func.func @transform_5(%arg0: i32) -> (i32, i32, i32) {
    %c0_i32 = arith.constant 0 : i32
    %c0_i32_0 = arith.constant 0 : i32
    %c0_i32_1 = arith.constant 0 : i32
    %c0_i32_2 = arith.constant 0 : i32
    return %c0_i32, %c0_i32_0, %c0_i32_1 : i32, i32, i32
  }
  func.func @transform_6(%arg0: i32) -> (i32, i32, i32) {
    %c0_i32 = arith.constant 0 : i32
    %c0_i32_0 = arith.constant 0 : i32
    %c0_i32_1 = arith.constant 0 : i32
    %c0_i32_2 = arith.constant 0 : i32
    return %c0_i32, %c0_i32_0, %c0_i32_1 : i32, i32, i32
  }
  func.func @transform_7(%arg0: i32) -> (i32, i32, i32) {
    %c0_i32 = arith.constant 0 : i32
    %c0_i32_0 = arith.constant 0 : i32
    %c0_i32_1 = arith.constant 0 : i32
    %c0_i32_2 = arith.constant 0 : i32
    return %c0_i32, %c0_i32_0, %c0_i32_1 : i32, i32, i32
  }
  func.func @transform_8(%arg0: i32) -> (i32, i32, i32) {
    %c0_i32 = arith.constant 0 : i32
    %c0_i32_0 = arith.constant 0 : i32
    %c0_i32_1 = arith.constant 0 : i32
    %c0_i32_2 = arith.constant 0 : i32
    return %c0_i32, %c0_i32_0, %c0_i32_1 : i32, i32, i32
  }
  func.func @transform_9(%arg0: i32) -> (i32, i32, i32) {
    %c0_i32 = arith.constant 0 : i32
    %c0_i32_0 = arith.constant 0 : i32
    %c0_i32_1 = arith.constant 0 : i32
    %c0_i32_2 = arith.constant 0 : i32
    return %c0_i32, %c0_i32_0, %c0_i32_1 : i32, i32, i32
  }
  func.func @transform_10(%arg0: i32) -> (i32, i32, i32) {
    %c0_i32 = arith.constant 0 : i32
    %c0_i32_0 = arith.constant 0 : i32
    %c0_i32_1 = arith.constant 0 : i32
    %c0_i32_2 = arith.constant 0 : i32
    return %c0_i32, %c0_i32_0, %c0_i32_1 : i32, i32, i32
  }
  func.func @transform_11(%arg0: i32) -> (i32, i32, i32) {
    %c0_i32 = arith.constant 0 : i32
    %c0_i32_0 = arith.constant 0 : i32
    %c0_i32_1 = arith.constant 0 : i32
    %c0_i32_2 = arith.constant 0 : i32
    return %c0_i32, %c0_i32_0, %c0_i32_1 : i32, i32, i32
  }
  func.func @transform_12(%arg0: i32) -> (i32, i32, i32) {
    %c0_i32 = arith.constant 0 : i32
    %c0_i32_0 = arith.constant 0 : i32
    %c0_i32_1 = arith.constant 0 : i32
    %c0_i32_2 = arith.constant 0 : i32
    return %c0_i32, %c0_i32_0, %c0_i32_1 : i32, i32, i32
  }
  func.func @transform_13(%arg0: i32) -> (i32, i32, i32) {
    %c0_i32 = arith.constant 0 : i32
    %c0_i32_0 = arith.constant 0 : i32
    %c0_i32_1 = arith.constant 0 : i32
    %c0_i32_2 = arith.constant 0 : i32
    return %c0_i32, %c0_i32_0, %c0_i32_1 : i32, i32, i32
  }
  func.func @transform_14(%arg0: i32) -> (i32, i32, i32) {
    %c0_i32 = arith.constant 0 : i32
    %c0_i32_0 = arith.constant 0 : i32
    %c0_i32_1 = arith.constant 0 : i32
    %c0_i32_2 = arith.constant 0 : i32
    return %c0_i32, %c0_i32_0, %c0_i32_1 : i32, i32, i32
  }
  func.func @transform_15(%arg0: i32) -> (i32, i32) {
    %c0_i32 = arith.constant 0 : i32
    %c0_i32_0 = arith.constant 0 : i32
    %c0_i32_1 = arith.constant 0 : i32
    return %c0_i32, %c0_i32_0 : i32, i32
  }
  func.func @transform_16(%arg0: i32) -> (i32, i32, i32) {
    %c0_i32 = arith.constant 0 : i32
    %c0_i32_0 = arith.constant 0 : i32
    %c0_i32_1 = arith.constant 0 : i32
    return %arg0, %c0_i32, %c0_i32_0 : i32, i32, i32
  }
}

</mosaic_0001>

<bundles_post_ra>
// kernel: tpu_custom_call.1
= control target key start
LH: loop header
LB: loop body
LE: loop exit
PB: predicated region body
PF: predicated region fallthrough
CT: control target
= control target key end

     0   :  { %s7470_s0 = inlined_call_operand.hbm [shape: f32[2,8,32], index: 0, kind: input, shape index: {}]   ;;  %s7471_s1 = inlined_call_operand.hbm [shape: f32[2,8,32], index: 1, kind: input, shape index: {}]   ;;  %s7472_s2 = inlined_call_operand.vmem [shape: f32[4,8,8], index: 2, kind: input, shape index: {}]   ;;  %s7473_s3 = inlined_call_operand.hbm [shape: f32[2,8,8], index: 3, kind: input, shape index: {}]   ;;  %s7474_s4 = inlined_call_operand.vmem [shape: f32[2,1,8], index: 4, kind: input, shape index: {}]   ;;  %s7475_s5 = inlined_call_operand.vmem [shape: f32[2,1,32], index: 5, kind: input, shape index: {}]   ;;  %s7476_s6 = inlined_call_operand.vmem [shape: bf16[2,32,96], index: 6, kind: input, shape index: {}]   ;;  %s7477_s7 = inlined_call_operand.vmem [shape: bf16[2,32,32], index: 7, kind: input, shape index: {}]   ;;  %s7478_s8 = inlined_call_operand.vmem [shape: f32[2,1,32], index: 8, kind: input, shape index: {}]   ;;  %s7479_s9 = inlined_call_operand.hbm [shape: bf16[2,32,32], index: 9, kind: input, shape index: {}]   ;;  %s7480_s10 = inlined_call_operand.hbm [shape: bf16[2,32,64], index: 10, kind: input, shape index: {}]   ;;  %s7481_s11 = inlined_call_operand.hbm [shape: bf16[2,32,32], index: 11, kind: input, shape index: {}]   ;;  %s7482_s12 = inlined_call_operand.vmem [shape: f32[2,1,32], index: 12, kind: input, shape index: {}]   ;;  %s7483_s13 = inlined_call_operand.hbm [shape: bf16[2,32,64], index: 13, kind: input, shape index: {}]   ;;  %s7484_s14 = inlined_call_operand.vmem [shape: bf16[2,64,32], index: 14, kind: input, shape index: {}]   ;;  %s7485_s15 = inlined_call_operand.vmem [shape: f32[1,32], index: 15, kind: input, shape index: {}]   ;;  %s7486_s16 = inlined_call_operand.hbm [shape: f32[2,8,32], index: 16, kind: output, shape index: {}]  }
   0x1   :  { %7494 = sst [smem:[#allocation20_spill]] %s7470_s0 }
   0x2   :  { %21 = vsyncpa [#allocation3], 0 }
   0x3   :  { %22 = vsyncpa [#allocation6], 0 }
   0x4   :  { %23 = vsyncpa [#allocation9], 0 }
   0x5   :  { %24 = vsyncpa [#allocation12], 0 }
   0x6   :  { %25 = vsyncpa [#allocation4], 0  ;;  %s6257_s21 = smov [#allocation5]   ;;  %s6258_s23 = smov [#allocation8]  }
   0x7   :  { %s43_s22 = sshll.u32 %s6257_s21, 4  ;;  %s79_s24 = sshll.u32 %s6258_s23, 4  ;;  %s44_s22 = int_to_ptr.vmem [resolvable:$true] %s43_s22  ;;  %s6368_s24 = int_to_ptr.vmem [resolvable:$true] %s79_s24 }
   0x8   :  { %s6071_s27 = scalar_lea.hbm %s7471_s1, 256 }
   0x9   :  { %p6072_p0 = scmp.ne.s32.totalorder %s7471_s1, %s6071_s27  ;;  %p6075_p1 = scmp.lt.u32.totalorder %s6071_s27, %s7471_s1 }
   0xb   :  { %p6077_p2 = pnand %p6075_p1, %p6072_p0 }
   0xd   :  { %6080 = shalt.err (!%p6077_p2)
}
   0xe   :  { %s6081_s17 = scalar_lea.vmem %s44_s22, 256  ;;  %p6086_p4 = scmp.lt.s32.totalorder %s44_s22, %s44_s22 }
   0xf   :  { %p6082_p3 = scmp.ne.s32.totalorder %s44_s22, %s6081_s17  ;;  %p6087_p5 = scmp.lt.s32.totalorder %s6081_s17, %s6081_s17 }
  0x11   :  { %p6088_p6 = por %p6087_p5, %p6086_p4 }
  0x13   :  { %p6089_p7 = pnand %p6088_p6, %p6082_p3 }
  0x15   :  { %6092 = shalt.err (!%p6089_p7)
}
  0x16   :  { %s7488_s18 = smov 128   ;;  %s7490_s19 = smov 8  }
  0x17   :  { %49 = dma.hbm_to_vmem [thread:$0]  %s7471_s1, 256, %s44_s22, [#allocation6], %s7488_s18, %s7488_s18, %s7490_s19  }
  0x18   :  { %s6093_s26 = scalar_lea.hbm %s7479_s9, 512 }
  0x19   :  { %p6094_p8 = scmp.ne.s32.totalorder %s7479_s9, %s6093_s26  ;;  %p6097_p9 = scmp.lt.u32.totalorder %s6093_s26, %s7479_s9 }
  0x1b   :  { %p6099_p10 = pnand %p6097_p9, %p6094_p8 }
  0x1d   :  { %6102 = shalt.err (!%p6099_p10)
}
  0x1e   :  { %s6103_s0 = scalar_lea.vmem %s6368_s24, 512  ;;  %p6108_p12 = scmp.lt.s32.totalorder %s6368_s24, %s6368_s24 }
  0x1f   :  { %p6104_p11 = scmp.ne.s32.totalorder %s6368_s24, %s6103_s0  ;;  %p6109_p13 = scmp.lt.s32.totalorder %s6103_s0, %s6103_s0 }
  0x21   :  { %p6110_p0 = por %p6109_p13, %p6108_p12 }
  0x23   :  { %p6111_p1 = pnand %p6110_p0, %p6104_p11 }
  0x25   :  { %6114 = shalt.err (!%p6111_p1)
}
  0x26   :  { %s7492_s1 = smov 64   ;;  %s6262_s22 = smov 4  }
  0x27   :  { %85 = dma.hbm_to_vmem [thread:$0]  %s7479_s9, 512, %s6368_s24, [#allocation9], %s7492_s1, %s7492_s1, %s6262_s22  }
  0x28   :  { %s6263_s21 = smov [#allocation11]   ;;  %s6264_s25 = smov [#allocation2]  }
  0x29   :  { %s103_s23 = sshll.u32 %s6263_s21, 4  ;;  %s31_s26 = sshll.u32 %s6264_s25, 4  ;;  %s104_s23 = int_to_ptr.vmem [resolvable:$true] %s103_s23  ;;  %s6405_s26 = int_to_ptr.vmem [resolvable:$true] %s31_s26 }
  0x2a   :  { %s6115_s29 = scalar_lea.hbm %s7481_s11, 512 }
  0x2b   :  { %p6116_p2 = scmp.ne.s32.totalorder %s7481_s11, %s6115_s29  ;;  %p6119_p3 = scmp.lt.u32.totalorder %s6115_s29, %s7481_s11 }
  0x2d   :  { %p6121_p4 = pnand %p6119_p3, %p6116_p2 }
  0x2f   :  { %6124 = shalt.err (!%p6121_p4)
}
  0x30   :  { %s6125_s9 = scalar_lea.vmem %s104_s23, 512  ;;  %p6130_p6 = scmp.lt.s32.totalorder %s104_s23, %s104_s23 }
  0x31   :  { %p6126_p5 = scmp.ne.s32.totalorder %s104_s23, %s6125_s9  ;;  %p6131_p7 = scmp.lt.s32.totalorder %s6125_s9, %s6125_s9 }
  0x33   :  { %p6132_p8 = por %p6131_p7, %p6130_p6 }
  0x35   :  { %p6133_p9 = pnand %p6132_p8, %p6126_p5 }
  0x37   :  { %6136 = shalt.err (!%p6133_p9)
}
  0x38   :  { %109 = dma.hbm_to_vmem [thread:$0]  %s7481_s11, 512, %s104_s23, [#allocation12], %s7492_s1, %s7492_s1, %s6262_s22  }
  0x39   :  { %s7495_s18 = sld [smem:[#allocation20_spill]] }
  0x3f   :  { %s6137_s19 = scalar_lea.hbm %s7495_s18, 256 }
  0x40   :  { %p6138_p10 = scmp.ne.s32.totalorder %s7495_s18, %s6137_s19  ;;  %p6141_p11 = scmp.lt.u32.totalorder %s6137_s19, %s7495_s18 }
  0x42   :  { %p6143_p12 = pnand %p6141_p11, %p6138_p10 }
  0x44   :  { %6146 = shalt.err (!%p6143_p12)
}
  0x45   :  { %s6147_s30 = scalar_lea.vmem %s6405_s26, 256  ;;  %p6152_p0 = scmp.lt.s32.totalorder %s6405_s26, %s6405_s26 }
  0x46   :  { %p6148_p13 = scmp.ne.s32.totalorder %s6405_s26, %s6147_s30  ;;  %p6153_p1 = scmp.lt.s32.totalorder %s6147_s30, %s6147_s30 }
  0x48   :  { %p6154_p2 = por %p6153_p1, %p6152_p0 }
  0x4a   :  { %p6155_p3 = pnand %p6154_p2, %p6148_p13 }
  0x4c   :  { %6158 = shalt.err (!%p6155_p3)
}
  0x4d   :  { %s7496_s11 = smov 8   ;;  %s7497_s23 = smov 128  }
  0x4e   :  { %37 = dma.hbm_to_vmem [thread:$0]  %s7495_s18, 256, %s6405_s26, [#allocation3], %s7497_s23, %s7497_s23, %s7496_s11  }
  0x4f   :  { %s6265_s24 = smov [#allocation7]   ;;  %s6266_s20 = smov [#allocation10]  }
  0x50   :  { %s57_s17 = sshll.u32 %s6265_s24, 4  ;;  %s91_s21 = sshll.u32 %s6266_s20, 4  ;;  %s58_s17 = int_to_ptr.vmem [resolvable:$true] %s57_s17  ;;  %s6442_s21 = int_to_ptr.vmem [resolvable:$true] %s91_s21 }
  0x51   :  { %s6159_s27 = scalar_lea.hbm %s7473_s3, 256 }
  0x52   :  { %p6160_p4 = scmp.ne.s32.totalorder %s7473_s3, %s6159_s27  ;;  %p6163_p5 = scmp.lt.u32.totalorder %s6159_s27, %s7473_s3 }
  0x54   :  { %p6165_p6 = pnand %p6163_p5, %p6160_p4 }
  0x56   :  { %6168 = shalt.err (!%p6165_p6)
}
  0x57   :  { %s6169_s26 = scalar_lea.vmem %s58_s17, 256  ;;  %p6174_p8 = scmp.lt.s32.totalorder %s58_s17, %s58_s17 }
  0x58   :  { %p6170_p7 = scmp.ne.s32.totalorder %s58_s17, %s6169_s26  ;;  %p6175_p9 = scmp.lt.s32.totalorder %s6169_s26, %s6169_s26 }
  0x5a   :  { %p6176_p10 = por %p6175_p9, %p6174_p8 }
  0x5c   :  { %p6177_p11 = pnand %p6176_p10, %p6170_p7 }
  0x5e   :  { %6180 = shalt.err (!%p6177_p11)
}
  0x5f   :  { %63 = dma.hbm_to_vmem [thread:$0]  %s7473_s3, 256, %s58_s17, [#allocation6], %s7497_s23, %s7497_s23, %s7496_s11  }
  0x60   :  { %s6181_s1 = scalar_lea.hbm %s7480_s10, 512 }
  0x61   :  { %p6182_p12 = scmp.ne.s32.totalorder %s7480_s10, %s6181_s1  ;;  %p6185_p13 = scmp.lt.u32.totalorder %s6181_s1, %s7480_s10 }
  0x63   :  { %p6187_p0 = pnand %p6185_p13, %p6182_p12 }
  0x65   :  { %6190 = shalt.err (!%p6187_p0)
}
  0x66   :  { %s6191_s28 = scalar_lea.vmem %s6442_s21, 512  ;;  %p6196_p2 = scmp.lt.s32.totalorder %s6442_s21, %s6442_s21 }
  0x67   :  { %p6192_p1 = scmp.ne.s32.totalorder %s6442_s21, %s6191_s28  ;;  %p6197_p3 = scmp.lt.s32.totalorder %s6191_s28, %s6191_s28 }
  0x69   :  { %p6198_p4 = por %p6197_p3, %p6196_p2 }
  0x6b   :  { %p6199_p5 = pnand %p6198_p4, %p6192_p1 }
  0x6d   :  { %6202 = shalt.err (!%p6199_p5)
}
  0x6e   :  { %s7498_s3 = smov 64   ;;  %s6267_s30 = smov [#allocation13]  }
  0x6f   :  { %97 = dma.hbm_to_vmem [thread:$0]  %s7480_s10, 512, %s6442_s21, [#allocation9], %s7498_s3, %s7498_s3, %s6262_s22  }
  0x70   :  { %s117_s26 = sshll.u32 %s6267_s30, 4  ;;  %s6203_s9 = scalar_lea.hbm %s7483_s13, 512  ;;  %s118_s26 = int_to_ptr.vmem [resolvable:$true] %s117_s26 }
  0x71   :  { %p6204_p6 = scmp.ne.s32.totalorder %s7483_s13, %s6203_s9  ;;  %p6207_p7 = scmp.lt.u32.totalorder %s6203_s9, %s7483_s13 }
  0x73   :  { %p6209_p8 = pnand %p6207_p7, %p6204_p6 }
  0x75   :  { %6212 = shalt.err (!%p6209_p8)
}
  0x76   :  { %s6213_s25 = scalar_lea.vmem %s118_s26, 512  ;;  %p6218_p10 = scmp.lt.s32.totalorder %s118_s26, %s118_s26 }
  0x77   :  { %p6214_p9 = scmp.ne.s32.totalorder %s118_s26, %s6213_s25  ;;  %p6219_p11 = scmp.lt.s32.totalorder %s6213_s25, %s6213_s25 }
  0x79   :  { %p6220_p12 = por %p6219_p11, %p6218_p10 }
  0x7b   :  { %p6221_p13 = pnand %p6220_p12, %p6214_p9 }
  0x7d   :  { %6224 = shalt.err (!%p6221_p13)
}
  0x7e   :  { %123 = dma.hbm_to_vmem [thread:$0]  %s7483_s13, 512, %s118_s26, [#allocation12], %s7498_s3, %s7498_s3, %s6262_s22  }
  0x7f   :  { %6247 = dma.done.wait [#allocation3], 256  }
  0x80   :  { %6248 = vsyncadd [#allocation3], 4294967040 }
  0x81   :  { %6249 = dma.done.wait [#allocation6], 512  }
  0x82   :  { %6250 = vsyncadd [#allocation6], 4294966784 }
  0x83   :  { %6251 = dma.done.wait [#allocation9], 1024  }
  0x84   :  { %6252 = vsyncadd [#allocation9], 4294966272 }
  0x85   :  { %6253 = dma.done.wait [#allocation12], 1024  }
  0x86   :  { %6254 = vsyncadd [#allocation12], 4294966272  ;;  %v6494_v0 = vld [vmem:[#allocation2] sm:$0xff]  ;;  %vm187_vm0 = vcmask 261120   ;;  %v6496_v1 = vld [vmem:[#allocation2 + $0x8] sm:$0xff]  ;;  %v6268_v7 = vmov 0.0  }
  0x87   :  { %v185_v2 = vmul.f32 %v6494_v0, %v6494_v0  ;;  %v186_v3 = vmul.f32 %v6496_v1, %v6496_v1  ;;  %v5881_v6 = vld [vmem:[%s7476_s6] sm:$0xff]   ;;  %5291 = vmatprep.subr.bf16.mxu1 %v6268_v7  ;;  %vm6269_vm1 = vmmov 0   ;;  %v5882_v8 = vld [vmem:[%s7476_s6 + $0x8] sm:$0xff]   ;;  %5305 = vmatprep.subr.bf16.mxu0 %v6268_v7  ;;  %s6270_s30 = smov 120   ;;  %s6271_s26 = smov 96   ;;  %vm276_vm2 = vcmask 64512  }
  0x88   :  { %5295 = vmatprep.mubr.msk.bf16.mxu1 %vm6269_vm1, %v6268_v7  ;;  %5292 = vmatpush3.bf16.msra.mxu1 %v5881_v6  ;;  %v4981_v18 = vld [vmem:[%s7475_s5] ss:$0 sm:$0xff]  ;;  %s6272_s18 = smov 88   ;;  %s6273_s0 = smov 80   ;;  %v6574_v42 = vld [vmem:[%s7472_s2 + $0x8] sm:$0xff]  ;;  %v6583_v48 = vld [vmem:[%s7472_s2 + $0x10] sm:$0xff] }
  0x89   :  { %v188_v4 = vsel %vm187_vm0, %v185_v2, 0.0  ;;  %v191_v5 = vsel %vm187_vm0, %v186_v3, 0.0  ;;  %5293 = vmatprep.subr.bf16.mxu1 %v6268_v7  ;;  %5307 = vmatprep.mubr.msk.bf16.mxu0 %vm6269_vm1, %v6268_v7  ;;  %s6274_s9 = smov 72   ;;  %s6275_s24 = smov 112   ;;  %v6566_v39 = vld [vmem:[%s7472_s2] sm:$0xff]  ;;  %v6593_v56 = vld [vmem:[%s7472_s2 + $0x18] sm:$0xff] }
  0x8a   :  { %189 = vadd.xlane.f32.xlu0 %v188_v4  ;;  %s6276_s1 = smov 104   ;;  %v158_v40 = vld [vmem:[#allocation7] sm:$0xff]  ;;  %vm528_vm3 = vcmask 1043456   ;;  %s6277_s2 = smov 48   ;;  %vm733_vm4 = vcmask 130048   ;;  %vm735_vm5 = vcmask 195584  }
  0x8b   :  { %v6569_v41 = vadd.f32 %v158_v40, %v6566_v39  ;;  %v6578_v46 = vadd.f32 %v158_v40, %v6574_v42  ;;  %v6588_v54 = vadd.f32 %v158_v40, %v6583_v48  ;;  %v6598_v62 = vadd.f32 %v158_v40, %v6593_v56  ;;  %s6278_s28 = smov 40   ;;  %s6279_s17 = smov 56  }
  0x8c   :  { %5294 = vmatpush3.bf16.msra.mxu1 %v5882_v8  ;;  %s6280_s10 = smov 16   ;;  %s6281_s21 = smov 24   ;;  %vm2511_vm6 = vcmask 523264  }
  0x8d   :  { %5299 = vmatprep.subr.bf16.mxu1 %v6268_v7  ;;  %s6282_s29 = smov [#allocation14]  }
  0x8e   :  { %192 = vadd.xlane.f32.xlu0 %v191_v5  ;;  %s4963_s20 = sshll.u32 %s6282_s29, 4  ;;  %s4964_s20 = int_to_ptr.vmem [resolvable:$true] %s4963_s20 }
  0x8f   :  { %s6225_s19 = scalar_lea.vmem %s4964_s20, 256  ;;  %p6230_p1 = scmp.lt.s32.totalorder %s4964_s20, %s4964_s20 }
  0x90   :  { %p6226_p0 = scmp.ne.s32.totalorder %s4964_s20, %s6225_s19  ;;  %p6231_p2 = scmp.lt.s32.totalorder %s6225_s19, %s6225_s19 }
  0x92   :  { %p6232_p3 = por %p6231_p2, %p6230_p1 }
  0x94   :  { %p6233_p4 = pnand %p6232_p3, %p6226_p0 }
 0x117   :  { %v190_v9 = vpop.xlane.xlu0 %189 }
 0x118   :  { %v195_v10 = vmul.f32 0.03125, %v190_v9 }
 0x11a   :  { %v197_v11 = vadd.f32 1e-06, %v195_v10 }
 0x11b   :  { %v193_v12 = vpop.xlane.xlu0 %192 }
 0x11c   :  { %5913 = vrsqrt.f32 %v197_v11  ;;  %v196_v13 = vmul.f32 0.03125, %v193_v12 }
 0x11e   :  { %v198_v14 = vadd.f32 1e-06, %v196_v13 }
 0x120   :  { %5915 = vrsqrt.f32 %v198_v14 }
 0x126   :  { %v5914_v15 = vpop.eup %5913 }
 0x127   :  { %v201_v16 = vmul.f32 %v5914_v15, %v6494_v0 }
 0x129   :  { %v209_v20 = vmul.f32 %v4981_v18, %v201_v16 }
 0x12a   :  { %v5916_v17 = vpop.eup %5915 }
 0x12b   :  { %v202_v19 = vmul.f32 %v5916_v17, %v6496_v1 }
 0x12d   :  { %v210_v21 = vmul.f32 %v4981_v18, %v202_v19 }
 0x12f   :  { %v215_v22 = vpack.c.bf16 %v210_v21, %v209_v20 }
 0x131   :  { %5296 = vmatmul.mubr.msk.bf16.vlgmr.msra.gmra.mrb[0].mxu1 %vm187_vm0, %v215_v22 }
 0x132   :  { %5301 = vmatprep.mubr.msk.bf16.mxu1 %vm6269_vm1, %v6268_v7 }
 0x204   :  { %v265_v23 = vpop.f32.mrb[0].mxu1 }
 0x205   :  { %v5297_v24 = vpop.f32.mrb[1].mxu1 }
 0x206   :  { %v268_v25 = vpop.f32.mrb[2].mxu1 }
 0x207   :  { %v6526_v26 = vpack.c.bf16 %v268_v25, %v265_v23  ;;  %v5298_v27 = vpop.f32.mrb[3].mxu1 }
 0x209   :  { %323 = vrot.lane.b32.xlu0 %v6526_v26, %s6270_s30  ;;  %274 = vrot.lane.b32.xlu1 %v6526_v26, %s6271_s26 }
 0x20d   :  { %325 = vrot.lane.b32.xlu1 %v6526_v26, %s6272_s18 }
 0x211   :  { %375 = vrot.lane.b32.xlu1 %v6526_v26, %s6273_s0 }
 0x215   :  { %425 = vrot.lane.b32.xlu1 %v6526_v26, %s6274_s9 }
 0x219   :  { %373 = vrot.lane.b32.xlu1 %v6526_v26, %s6275_s24 }
 0x21d   :  { %423 = vrot.lane.b32.xlu1 %v6526_v26, %s6276_s1 }
 0x27b   :  { %v275_v28 = vpop.permute.xlu1 %274  ;;  %v324_v34 = vpop.permute.xlu0 %323 }
 0x27c   :  { %v281_v29 = vsel %vm276_vm2, %v275_v28, 0 }
 0x27d   :  { %5300 = vmatpush3.bf16.xpose.msra.mxu1 %v281_v29 }
 0x27e   :  { %5311 = vmatprep.subr.bf16.mxu1 %v6268_v7 }
 0x27f   :  { %v326_v30 = vpop.permute.xlu1 %325 }
 0x280   :  { %v331_v31 = vsel %vm276_vm2, %v326_v30, 0 }
 0x281   :  { %5306 = vmatpush3.bf16.xpose.msra.mxu0 %v331_v31 }
 0x282   :  { %5317 = vmatprep.subr.bf16.mxu0 %v6268_v7 }
 0x283   :  { %v376_v32 = vpop.permute.xlu1 %375 }
 0x284   :  { %v381_v33 = vsel %vm276_vm2, %v376_v32, 0  ;;  %5302 = vmatmul.mubr.msk.bf16.vlgmr.msra.gmra.mrb[4].mxu1 %vm276_vm2, %v6526_v26 }
 0x285   :  { %5312 = vmatpush3.bf16.xpose.msra.mxu1 %v381_v33  ;;  %5313 = vmatprep.mubr.msk.bf16.mxu1 %vm6269_vm1, %v6268_v7 }
 0x286   :  { %5323 = vmatprep.subr.bf16.mxu1 %v6268_v7 }
 0x287   :  { %v426_v35 = vpop.permute.xlu1 %425 }
 0x288   :  { %v431_v36 = vsel %vm276_vm2, %v426_v35, 0  ;;  %5308 = vmatmul.mubr.msk.bf16.vlgmr.msra.gmra.mrb[0].mxu0 %vm276_vm2, %v324_v34  ;;  %v6618_v34 = vrot.slane %v6526_v26, 4 }
 0x289   :  { %5318 = vmatpush3.bf16.xpose.msra.mxu0 %v431_v36  ;;  %5319 = vmatprep.mubr.msk.bf16.mxu0 %vm6269_vm1, %v6268_v7 }
 0x28a   :  { %5329 = vmatprep.subr.bf16.mxu0 %v6268_v7 }
 0x28b   :  { %v374_v37 = vpop.permute.xlu1 %373 }
 0x28c   :  { %5314 = vmatmul.mubr.msk.bf16.vlgmr.msra.gmra.mrb[8].mxu1 %vm276_vm2, %v374_v37 }
 0x28d   :  { %5325 = vmatprep.mubr.msk.bf16.mxu1 %vm6269_vm1, %v6268_v7 }
 0x28f   :  { %v424_v38 = vpop.permute.xlu1 %423 }
 0x290   :  { %5320 = vmatmul.mubr.msk.bf16.vlgmr.msra.gmra.mrb[4].mxu0 %vm276_vm2, %v424_v38 }
 0x291   :  { %5331 = vmatprep.mubr.msk.bf16.mxu0 %vm6269_vm1, %v6268_v7 }
 0x357   :  { %v317_v43 = vpop.f32.mrb[4].mxu1 }
 0x358   :  { %v473_v44 = vadd.f32 %v317_v43, %v6569_v41  ;;  %v5303_v45 = vpop.f32.mrb[5].mxu1 }
 0x359   :  { %v320_v47 = vpop.f32.mrb[6].mxu1 }
 0x35a   :  { %v5304_v49 = vpop.f32.mrb[7].mxu1  ;;  %v477_v50 = vsel %vm276_vm2, %v473_v44, -inf }
 0x35b   :  { %v367_v51 = vpop.f32.mrb[0].mxu0  ;;  %478 = vmax.xlane.f32.xlu1 %v477_v50 }
 0x35c   :  { %v474_v52 = vadd.f32 %v367_v51, %v6578_v46  ;;  %v5309_v53 = vpop.f32.mrb[1].mxu0 }
 0x35d   :  { %v370_v55 = vpop.f32.mrb[2].mxu0 }
 0x35e   :  { %v5310_v57 = vpop.f32.mrb[3].mxu0  ;;  %v480_v58 = vsel %vm276_vm2, %v474_v52, -inf }
 0x35f   :  { %481 = vmax.xlane.f32.xlu0 %v480_v58  ;;  %v417_v59 = vpop.f32.mrb[8].mxu1 }
 0x360   :  { %v475_v60 = vadd.f32 %v417_v59, %v6588_v54  ;;  %v5315_v61 = vpop.f32.mrb[9].mxu1 }
 0x361   :  { %v420_v63 = vpop.f32.mrb[10].mxu1 }
 0x362   :  { %v5316_v2 = vpop.f32.mrb[11].mxu1  ;;  %v483_v3 = vsel %vm276_vm2, %v475_v60, -inf }
 0x363   :  { %v467_v4 = vpop.f32.mrb[4].mxu0  ;;  %484 = vmax.xlane.f32.xlu1 %v483_v3 }
 0x364   :  { %v476_v5 = vadd.f32 %v467_v4, %v6598_v62  ;;  %v5321_v6 = vpop.f32.mrb[5].mxu0 }
 0x365   :  { %v470_v8 = vpop.f32.mrb[6].mxu0 }
 0x366   :  { %v5322_v9 = vpop.f32.mrb[7].mxu0  ;;  %v486_v10 = vsel %vm276_vm2, %v476_v5, -inf }
 0x367   :  { %487 = vmax.xlane.f32.xlu0 %v486_v10 }
 0x374   :  { %523 = vrot.lane.b32.xlu1 %v6526_v26, %s7498_s3 }
 0x3e8   :  { %v479_v11 = vpop.xlane.xlu1 %478 }
 0x3e9   :  { %v489_v12 = vsub.f32 %v473_v44, %v479_v11 }
 0x3eb   :  { %v493_v13 = vmul.f32 1.442695, %v489_v12 }
 0x3ec   :  { %v482_v14 = vpop.xlane.xlu0 %481 }
 0x3ed   :  { %5917 = vpow2.f32 %v493_v13  ;;  %v490_v15 = vsub.f32 %v474_v52, %v482_v14 }
 0x3ef   :  { %v495_v16 = vmul.f32 1.442695, %v490_v15 }
 0x3f0   :  { %v485_v17 = vpop.xlane.xlu1 %484 }
 0x3f1   :  { %5919 = vpow2.f32 %v495_v16  ;;  %v491_v25 = vsub.f32 %v475_v60, %v485_v17 }
 0x3f3   :  { %v497_v28 = vmul.f32 1.442695, %v491_v25 }
 0x3f4   :  { %v524_v18 = vpop.permute.xlu1 %523  ;;  %v488_v24 = vpop.xlane.xlu0 %487 }
 0x3f5   :  { %v530_v19 = vsel %vm528_vm3, %v524_v18, 0  ;;  %v492_v27 = vsub.f32 %v476_v5, %v488_v24  ;;  %5921 = vpow2.f32 %v497_v28 }
 0x3f6   :  { %5324 = vmatpush3.bf16.msra.mxu1 %v530_v19 }
 0x3f7   :  { %v5918_v20 = vpop.eup %5917  ;;  %5335 = vmatprep.subr.bf16.mxu1 %v6268_v7  ;;  %v499_v29 = vmul.f32 1.442695, %v492_v27  ;;  %v164_v27 = vld [vmem:[#allocation7 + $0x8] sm:$0xff] }
 0x3f8   :  { %v501_v21 = vsel %vm276_vm2, %v5918_v20, 0.0 }
 0x3f9   :  { %502 = vadd.xlane.f32.xlu1 %v501_v21  ;;  %5923 = vpow2.f32 %v499_v29 }
 0x3fb   :  { %v5920_v22 = vpop.eup %5919 }
 0x3fc   :  { %v504_v23 = vsel %vm276_vm2, %v5920_v22, 0.0 }
 0x3fd   :  { %505 = vadd.xlane.f32.xlu0 %v504_v23 }
 0x3ff   :  { %v5922_v30 = vpop.eup %5921 }
 0x400   :  { %v507_v33 = vsel %vm276_vm2, %v5922_v30, 0.0 }
 0x403   :  { %v5924_v31 = vpop.eup %5923 }
 0x404   :  { %v510_v32 = vsel %vm276_vm2, %v5924_v31, 0.0 }
 0x40a   :  { %622 = vrot.lane.b32.xlu1 %v6526_v26, %s6277_s2 }
 0x40e   :  { %672 = vrot.lane.b32.xlu1 %v6526_v26, %s6278_s28 }
 0x413   :  { %574 = vrot.lane.b32.xlu0 %v6526_v26, %s6279_s17 }
 0x432   :  { %511 = vadd.xlane.f32.xlu0 %v510_v32  ;;  %508 = vadd.xlane.f32.xlu1 %v507_v33  ;;  %v6682_v32 = vadd.f32 %v164_v27, %v6566_v39  ;;  %v6685_v33 = vadd.f32 %v164_v27, %v6574_v42  ;;  %v6692_v42 = vadd.f32 %v164_v27, %v6583_v48 }
 0x443   :  { %788 = vrot.lane.b32.xlu1 %v6618_v34, %s6272_s18 }
 0x447   :  { %838 = vrot.lane.b32.xlu1 %v6618_v34, %s6273_s0 }
 0x448   :  { %738 = vrot.lane.b32.xlu0 %v6618_v34, %s6271_s26 }
 0x44b   :  { %836 = vrot.lane.b32.xlu1 %v6618_v34, %s6275_s24 }
 0x44c   :  { %786 = vrot.lane.b32.xlu0 %v6618_v34, %s6270_s30 }
 0x450   :  { %888 = vrot.lane.b32.xlu0 %v6618_v34, %s6274_s9 }
 0x454   :  { %886 = vrot.lane.b32.xlu0 %v6618_v34, %s6276_s1 }
 0x486   :  { %v503_v26 = vpop.xlane.xlu1 %502 }
 0x487   :  { %5925 = vrcp.f32 %v503_v26 }
 0x48a   :  { %v506_v35 = vpop.xlane.xlu0 %505  ;;  %v623_v40 = vpop.permute.xlu1 %622 }
 0x48b   :  { %5927 = vrcp.f32 %v506_v35  ;;  %v628_v50 = vsel %vm528_vm3, %v623_v40, 0 }
 0x48e   :  { %v575_v36 = vpop.permute.xlu0 %574  ;;  %v673_v49 = vpop.permute.xlu1 %672 }
 0x48f   :  { %v580_v37 = vsel %vm528_vm3, %v575_v36, 0  ;;  %v678_v52 = vsel %vm528_vm3, %v673_v49, 0 }
 0x490   :  { %5330 = vmatpush3.bf16.msra.mxu0 %v580_v37 }
 0x491   :  { %5341 = vmatprep.subr.bf16.mxu0 %v6268_v7  ;;  %v5926_v38 = vpop.eup %5925 }
 0x492   :  { %v517_v44 = vmul.f32 %v5926_v38, %v5918_v20 }
 0x495   :  { %v5928_v43 = vpop.eup %5927 }
 0x496   :  { %v518_v45 = vmul.f32 %v5928_v43, %v5920_v22 }
 0x498   :  { %v521_v47 = vpack.c.bf16 %v518_v45, %v517_v44 }
 0x49a   :  { %5326 = vmatmul.mubr.msk.bf16.vlgmr.msra.gmra.mrb[12].mxu1 %vm276_vm2, %v521_v47  ;;  %v573_v51 = vrot.slane %v521_v47, 4 }
 0x49b   :  { %5336 = vmatpush3.bf16.msra.mxu1 %v628_v50  ;;  %5337 = vmatprep.mubr.msk.bf16.mxu1 %vm6269_vm1, %v6268_v7  ;;  %v6695_v50 = vadd.f32 %v164_v27, %v6593_v56 }
 0x49c   :  { %5332 = vmatmul.mubr.msk.bf16.vlgmr.msra.gmra.mrb[8].mxu0 %vm276_vm2, %v573_v51  ;;  %5347 = vmatprep.subr.bf16.mxu1 %v6268_v7 }
 0x49d   :  { %5342 = vmatpush3.bf16.msra.mxu0 %v678_v52  ;;  %5343 = vmatprep.mubr.msk.bf16.mxu0 %vm6269_vm1, %v6268_v7 }
 0x49e   :  { %5353 = vmatprep.subr.bf16.mxu0 %v6268_v7 }
 0x4bf   :  { %v512_v53 = vpop.xlane.xlu0 %511  ;;  %v509_v55 = vpop.xlane.xlu1 %508 }
 0x4c0   :  { %5929 = vrcp.f32 %v512_v53 }
 0x4c1   :  { %5931 = vrcp.f32 %v509_v55 }
 0x4c3   :  { %v739_v60 = vpop.permute.xlu0 %738  ;;  %v789_v2 = vpop.permute.xlu1 %788 }
 0x4c4   :  { %v744_v3 = vsel %vm276_vm2, %v739_v60, 0  ;;  %v794_v6 = vsel %vm276_vm2, %v789_v2, 0 }
 0x4c7   :  { %v787_v5 = vpop.permute.xlu0 %786  ;;  %v839_v8 = vpop.permute.xlu1 %838 }
 0x4c8   :  { %v844_v10 = vsel %vm276_vm2, %v839_v8, 0 }
 0x4ca   :  { %v5930_v57 = vpop.eup %5929 }
 0x4cb   :  { %v5932_v58 = vpop.eup %5931  ;;  %v520_v59 = vmul.f32 %v5930_v57, %v5924_v31  ;;  %v889_v9 = vpop.permute.xlu0 %888 }
 0x4cc   :  { %v519_v61 = vmul.f32 %v5932_v58, %v5922_v30  ;;  %v894_v11 = vsel %vm276_vm2, %v889_v9, 0  ;;  %v837_v12 = vpop.permute.xlu1 %836 }
 0x4ce   :  { %v522_v63 = vpack.c.bf16 %v520_v59, %v519_v61 }
 0x4cf   :  { %v887_v13 = vpop.permute.xlu0 %886 }
 0x4d0   :  { %5338 = vmatmul.mubr.msk.bf16.vlgmr.msra.gmra.mrb[16].mxu1 %vm276_vm2, %v522_v63  ;;  %v671_v4 = vrot.slane %v522_v63, 4 }
 0x4d1   :  { %5348 = vmatpush3.bf16.xpose.msra.mxu1 %v744_v3  ;;  %5349 = vmatprep.mubr.msk.bf16.mxu1 %vm6269_vm1, %v6268_v7 }
 0x4d2   :  { %5344 = vmatmul.mubr.msk.bf16.vlgmr.msra.gmra.mrb[12].mxu0 %vm276_vm2, %v671_v4  ;;  %5359 = vmatprep.subr.bf16.mxu1 %v6268_v7 }
 0x4d3   :  { %5354 = vmatpush3.bf16.xpose.msra.mxu0 %v794_v6  ;;  %5355 = vmatprep.mubr.msk.bf16.mxu0 %vm6269_vm1, %v6268_v7 }
 0x4d4   :  { %5365 = vmatprep.subr.bf16.mxu0 %v6268_v7 }
 0x4d8   :  { %5350 = vmatmul.mubr.msk.bf16.vlgmr.msra.gmra.mrb[20].mxu1 %vm276_vm2, %v6618_v34 }
 0x4d9   :  { %5360 = vmatpush3.bf16.xpose.msra.mxu1 %v844_v10  ;;  %5361 = vmatprep.mubr.msk.bf16.mxu1 %vm6269_vm1, %v6268_v7 }
 0x4da   :  { %5356 = vmatmul.mubr.msk.bf16.vlgmr.msra.gmra.mrb[16].mxu0 %vm276_vm2, %v787_v5  ;;  %5371 = vmatprep.subr.bf16.mxu1 %v6268_v7 }
 0x4db   :  { %5366 = vmatpush3.bf16.xpose.msra.mxu0 %v894_v11  ;;  %5367 = vmatprep.mubr.msk.bf16.mxu0 %vm6269_vm1, %v6268_v7 }
 0x4dc   :  { %5377 = vmatprep.subr.bf16.mxu0 %v6268_v7 }
 0x4e0   :  { %5362 = vmatmul.mubr.msk.bf16.vlgmr.msra.gmra.mrb[24].mxu1 %vm276_vm2, %v837_v12 }
 0x4e1   :  { %5373 = vmatprep.mubr.msk.bf16.mxu1 %vm6269_vm1, %v6268_v7 }
 0x4e2   :  { %5368 = vmatmul.mubr.msk.bf16.vlgmr.msra.gmra.mrb[20].mxu0 %vm276_vm2, %v887_v13 }
 0x4e3   :  { %5379 = vmatprep.mubr.msk.bf16.mxu0 %vm6269_vm1, %v6268_v7 }
 0x56d   :  { %v6673_v14 = vpop.f32.mrb[12].mxu1 }
 0x56e   :  { %v5327_v15 = vpop.f32.mrb[13].mxu1 }
 0x56f   :  { %v569_v16 = vpop.f32.mrb[14].mxu1  ;;  %v6675_v17 = vpop.f32.mrb[8].mxu0 }
 0x570   :  { %v5328_v18 = vpop.f32.mrb[15].mxu1  ;;  %v5333_v19 = vpop.f32.mrb[9].mxu0 }
 0x571   :  { %v619_v20 = vpop.f32.mrb[10].mxu0 }
 0x572   :  { %v5334_v21 = vpop.f32.mrb[11].mxu0 }
 0x5a3   :  { %v6677_v22 = vpop.f32.mrb[16].mxu1 }
 0x5a4   :  { %v5339_v23 = vpop.f32.mrb[17].mxu1 }
 0x5a5   :  { %v667_v24 = vpop.f32.mrb[18].mxu1  ;;  %v6679_v25 = vpop.f32.mrb[12].mxu0 }
 0x5a6   :  { %v5340_v28 = vpop.f32.mrb[19].mxu1  ;;  %v5345_v29 = vpop.f32.mrb[13].mxu0 }
 0x5a7   :  { %v717_v30 = vpop.f32.mrb[14].mxu0 }
 0x5a8   :  { %v5346_v31 = vpop.f32.mrb[15].mxu0 }
 0x5ab   :  { %v780_v26 = vpop.f32.mrb[20].mxu1 }
 0x5ac   :  { %v936_v35 = vadd.f32 %v780_v26, %v6682_v32  ;;  %v5351_v36 = vpop.f32.mrb[21].mxu1 }
 0x5ad   :  { %v783_v37 = vpop.f32.mrb[22].mxu1  ;;  %v830_v38 = vpop.f32.mrb[16].mxu0 }
 0x5ae   :  { %v937_v40 = vadd.f32 %v830_v38, %v6685_v33  ;;  %v5352_v43 = vpop.f32.mrb[23].mxu1  ;;  %v5357_v44 = vpop.f32.mrb[17].mxu0  ;;  %v940_v45 = vsel %vm276_vm2, %v936_v35, -inf }
 0x5af   :  { %v833_v47 = vpop.f32.mrb[18].mxu0  ;;  %941 = vmax.xlane.f32.xlu1 %v940_v45 }
 0x5b0   :  { %v5358_v49 = vpop.f32.mrb[19].mxu0  ;;  %v943_v39 = vsel %vm276_vm2, %v937_v40, -inf }
 0x5b1   :  { %944 = vmax.xlane.f32.xlu0 %v943_v39 }
 0x5b3   :  { %v880_v51 = vpop.f32.mrb[24].mxu1 }
 0x5b4   :  { %v938_v52 = vadd.f32 %v880_v51, %v6692_v42  ;;  %v5363_v53 = vpop.f32.mrb[25].mxu1 }
 0x5b5   :  { %v883_v55 = vpop.f32.mrb[26].mxu1  ;;  %v930_v57 = vpop.f32.mrb[20].mxu0 }
 0x5b6   :  { %v939_v58 = vadd.f32 %v930_v57, %v6695_v50  ;;  %v5364_v59 = vpop.f32.mrb[27].mxu1  ;;  %v5369_v60 = vpop.f32.mrb[21].mxu0  ;;  %v946_v61 = vsel %vm276_vm2, %v938_v52, -inf }
 0x5b7   :  { %v933_v63 = vpop.f32.mrb[22].mxu0  ;;  %947 = vmax.xlane.f32.xlu0 %v946_v61  ;;  %v5883_v60 = vld [vmem:[%s7477_s7] sm:$0xff]  }
 0x5b8   :  { %v5370_v48 = vpop.f32.mrb[23].mxu0  ;;  %v949_v2 = vsel %vm276_vm2, %v939_v58, -inf }
 0x5b9   :  { %950 = vmax.xlane.f32.xlu1 %v949_v2  ;;  %v5884_v48 = vld [vmem:[%s7477_s7 + $0x8] sm:$0xff]  }
 0x5ca   :  { %1036 = vrot.lane.b32.xlu1 %v6618_v34, %s6279_s17 }
 0x5cd   :  { %986 = vrot.lane.b32.xlu0 %v6618_v34, %s7498_s3 }
 0x63c   :  { %v942_v56 = vpop.xlane.xlu1 %941 }
 0x63d   :  { %v952_v3 = vsub.f32 %v936_v35, %v942_v56 }
 0x63e   :  { %v945_v4 = vpop.xlane.xlu0 %944 }
 0x63f   :  { %v956_v5 = vmul.f32 1.442695, %v952_v3  ;;  %v953_v6 = vsub.f32 %v937_v40, %v945_v4 }
 0x641   :  { %5933 = vpow2.f32 %v956_v5  ;;  %v958_v8 = vmul.f32 1.442695, %v953_v6 }
 0x643   :  { %5935 = vpow2.f32 %v958_v8 }
 0x644   :  { %v948_v9 = vpop.xlane.xlu0 %947 }
 0x645   :  { %v954_v10 = vsub.f32 %v938_v52, %v948_v9 }
 0x646   :  { %v951_v11 = vpop.xlane.xlu1 %950 }
 0x647   :  { %v960_v12 = vmul.f32 1.442695, %v954_v10  ;;  %v955_v13 = vsub.f32 %v939_v58, %v951_v11 }
 0x648   :  { %v987_v15 = vpop.permute.xlu0 %986 }
 0x649   :  { %5937 = vpow2.f32 %v960_v12  ;;  %v962_v16 = vmul.f32 1.442695, %v955_v13  ;;  %v992_v18 = vsel %vm528_vm3, %v987_v15, 0 }
 0x64a   :  { %v1037_v19 = vpop.permute.xlu1 %1036  ;;  %5372 = vmatpush3.bf16.msra.mxu1 %v992_v18 }
 0x64b   :  { %v5934_v20 = vpop.eup %5933  ;;  %5939 = vpow2.f32 %v962_v16  ;;  %v1042_v21 = vsel %vm528_vm3, %v1037_v19, 0  ;;  %5383 = vmatprep.subr.bf16.mxu1 %v6268_v7 }
 0x64c   :  { %5378 = vmatpush3.bf16.msra.mxu0 %v1042_v21  ;;  %v964_v23 = vsel %vm276_vm2, %v5934_v20, 0.0 }
 0x64d   :  { %v5936_v24 = vpop.eup %5935  ;;  %965 = vadd.xlane.f32.xlu0 %v964_v23  ;;  %5389 = vmatprep.subr.bf16.mxu0 %v6268_v7 }
 0x64e   :  { %v967_v27 = vsel %vm276_vm2, %v5936_v24, 0.0 }
 0x64f   :  { %968 = vadd.xlane.f32.xlu1 %v967_v27 }
 0x653   :  { %v5938_v28 = vpop.eup %5937 }
 0x654   :  { %v970_v29 = vsel %vm276_vm2, %v5938_v28, 0.0 }
 0x655   :  { %v5940_v30 = vpop.eup %5939  ;;  %971 = vadd.xlane.f32.xlu0 %v970_v29 }
 0x656   :  { %v973_v31 = vsel %vm276_vm2, %v5940_v30, 0.0 }
 0x657   :  { %974 = vadd.xlane.f32.xlu1 %v973_v31 }
 0x668   :  { %1084 = vrot.lane.b32.xlu1 %v6618_v34, %s6277_s2 }
 0x66b   :  { %1134 = vrot.lane.b32.xlu0 %v6618_v34, %s6278_s28 }
 0x6da   :  { %v966_v26 = vpop.xlane.xlu0 %965 }
 0x6db   :  { %5941 = vrcp.f32 %v966_v26 }
 0x6dc   :  { %v969_v35 = vpop.xlane.xlu1 %968 }
 0x6dd   :  { %5943 = vrcp.f32 %v969_v35 }
 0x6e2   :  { %v972_v36 = vpop.xlane.xlu0 %971 }
 0x6e3   :  { %5945 = vrcp.f32 %v972_v36 }
 0x6e4   :  { %v975_v37 = vpop.xlane.xlu1 %974 }
 0x6e5   :  { %v5942_v38 = vpop.eup %5941  ;;  %5947 = vrcp.f32 %v975_v37 }
 0x6e6   :  { %v980_v43 = vmul.f32 %v5942_v38, %v5934_v20  ;;  %v1135_v49 = vpop.permute.xlu0 %1134 }
 0x6e7   :  { %v5944_v40 = vpop.eup %5943  ;;  %v1140_v52 = vsel %vm528_vm3, %v1135_v49, 0 }
 0x6e8   :  { %v981_v44 = vmul.f32 %v5944_v40, %v5936_v24  ;;  %v1085_v45 = vpop.permute.xlu1 %1084 }
 0x6e9   :  { %v1090_v39 = vsel %vm528_vm3, %v1085_v45, 0 }
 0x6ea   :  { %v984_v47 = vpack.c.bf16 %v981_v44, %v980_v43 }
 0x6ec   :  { %5374 = vmatmul.mubr.msk.bf16.vlgmr.msra.gmra.mrb[28].mxu1 %vm276_vm2, %v984_v47  ;;  %v1035_v34 = vrot.slane %v984_v47, 4 }
 0x6ed   :  { %v5946_v51 = vpop.eup %5945  ;;  %5384 = vmatpush3.bf16.msra.mxu1 %v1090_v39  ;;  %5385 = vmatprep.mubr.msk.bf16.mxu1 %vm6269_vm1, %v6268_v7 }
 0x6ee   :  { %5380 = vmatmul.mubr.msk.bf16.vlgmr.msra.gmra.mrb[24].mxu0 %vm276_vm2, %v1035_v34  ;;  %5395 = vmatprep.subr.bf16.mxu1 %v6268_v7  ;;  %v982_v55 = vmul.f32 %v5946_v51, %v5938_v28 }
 0x6ef   :  { %v5948_v53 = vpop.eup %5947  ;;  %5390 = vmatpush3.bf16.msra.mxu0 %v1140_v52  ;;  %5391 = vmatprep.mubr.msk.bf16.mxu0 %vm6269_vm1, %v6268_v7  ;;  %v5886_v52 = vld [vmem:[#allocation10 + $0x8] sm:$0xff]  }
 0x6f0   :  { %v983_v57 = vmul.f32 %v5948_v53, %v5940_v30  ;;  %5403 = vmatprep.subr.bf16.mxu0 %v6268_v7  ;;  %v153_v53 = vld [vmem:[#allocation5 + $0x8] sm:$0xff] }
 0x6f2   :  { %v985_v58 = vpack.c.bf16 %v983_v57, %v982_v55  ;;  %v5887_v57 = vld [vmem:[#allocation8] sm:$0xff]  }
 0x6f4   :  { %5386 = vmatmul.mubr.msk.bf16.vlgmr.msra.gmra.mrb[32].mxu1 %vm276_vm2, %v985_v58  ;;  %v1133_v59 = vrot.slane %v985_v58, 4  ;;  %v5888_v58 = vld [vmem:[#allocation8 + $0x8] sm:$0xff]  }
 0x6f5   :  { %5399 = vmatprep.mubr.msk.bf16.mxu1 %vm6269_vm1, %v6268_v7  ;;  %5396 = vmatpush3.bf16.msra.mxu1 %v5883_v60 }
 0x6f6   :  { %5392 = vmatmul.mubr.msk.bf16.vlgmr.msra.gmra.mrb[28].mxu0 %vm276_vm2, %v1133_v59  ;;  %5397 = vmatprep.subr.bf16.mxu1 %v6268_v7 }
 0x6f7   :  { %5407 = vmatprep.mubr.msk.bf16.mxu0 %vm6269_vm1, %v6268_v7  ;;  %5404 = vmatpush3.bf16.msra.mxu0 %v5887_v57 }
 0x6f8   :  { %5405 = vmatprep.subr.bf16.mxu0 %v6268_v7 }
 0x6f9   :  { %5398 = vmatpush3.bf16.msra.mxu1 %v5884_v48 }
 0x6fa   :  { %5411 = vmatprep.subr.bf16.mxu1 %v6268_v7 }
 0x6fb   :  { %5406 = vmatpush3.bf16.msra.mxu0 %v5888_v58 }
 0x6fc   :  { %5419 = vmatprep.subr.bf16.mxu0 %v6268_v7 }
 0x7bf   :  { %v1028_v61 = vpop.f32.mrb[28].mxu1 }
 0x7c0   :  { %v5375_v63 = vpop.f32.mrb[29].mxu1 }
 0x7c1   :  { %v1031_v2 = vpop.f32.mrb[30].mxu1  ;;  %v1078_v56 = vpop.f32.mrb[24].mxu0 }
 0x7c2   :  { %v5821_v3 = vpack.i.bf16 %v1078_v56, %v6675_v17  ;;  %v5376_v4 = vpop.f32.mrb[31].mxu1  ;;  %v5381_v5 = vpop.f32.mrb[25].mxu0 }
 0x7c3   :  { %v1081_v6 = vpop.f32.mrb[26].mxu0  ;;  %v5004_v5 = vld [vmem:[%s7478_s8] ss:$0 sm:$0xff] }
 0x7c4   :  { %5822 = vrot.lane.b32.xlu1 %v5821_v3, %s7496_s11  ;;  %v5382_v8 = vpop.f32.mrb[27].mxu0 }
 0x7c7   :  { %v1126_v9 = vpop.f32.mrb[32].mxu1 }
 0x7c8   :  { %v5826_v10 = vpack.i.bf16 %v1126_v9, %v6677_v22  ;;  %v5387_v11 = vpop.f32.mrb[33].mxu1 }
 0x7c9   :  { %v1129_v12 = vpop.f32.mrb[34].mxu1  ;;  %v1176_v13 = vpop.f32.mrb[28].mxu0 }
 0x7ca   :  { %v5831_v15 = vpack.i.bf16 %v1176_v13, %v6679_v25  ;;  %v5393_v16 = vpop.f32.mrb[29].mxu0  ;;  %5827 = vrot.lane.b32.xlu0 %v5826_v10, %s6280_s10  ;;  %v5388_v17 = vpop.f32.mrb[35].mxu1 }
 0x7cb   :  { %v1179_v18 = vpop.f32.mrb[30].mxu0 }
 0x7cc   :  { %5832 = vrot.lane.b32.xlu1 %v5831_v15, %s6281_s21  ;;  %v5394_v19 = vpop.f32.mrb[31].mxu0 }
 0x836   :  { %v5823_v20 = vpop.permute.xlu1 %5822 }
 0x837   :  { %v5825_v21 = vunpack.i.h.bf16 %v5823_v20  ;;  %v5824_v23 = vunpack.i.l.bf16 %v5823_v20 }
 0x839   :  { %v732_v25 = vsel %vm276_vm2, %v6673_v14, %v5824_v23  ;;  %v1194_v28 = vsel %vm276_vm2, %v1028_v61, %v5825_v21 }
 0x83c   :  { %v5828_v22 = vpop.permute.xlu0 %5827 }
 0x83d   :  { %v5830_v24 = vunpack.i.h.bf16 %v5828_v22  ;;  %v5829_v27 = vunpack.i.l.bf16 %v5828_v22 }
 0x83e   :  { %v5833_v29 = vpop.permute.xlu1 %5832 }
 0x83f   :  { %v1195_v30 = vsel %vm733_vm4, %v1194_v28, %v5830_v24  ;;  %v734_v31 = vsel %vm733_vm4, %v732_v25, %v5829_v27  ;;  %v5835_v26 = vunpack.i.h.bf16 %v5833_v29  ;;  %v5834_v35 = vunpack.i.l.bf16 %v5833_v29 }
 0x841   :  { %v736_v36 = vsel %vm735_vm5, %v734_v31, %v5834_v35  ;;  %v1196_v37 = vsel %vm735_vm5, %v1195_v30, %v5835_v26  ;;  %v4978_v35 = vld [vmem:[%s7474_s4] ss:$0 sm:$0xff] }
 0x842   :  { %v1201_v38 = vpack.c.bf16 %v1196_v37, %v736_v36 }
 0x844   :  { %5400 = vmatmul.mubr.msk.bf16.vlgmr.msra.gmra.mrb[36].mxu1 %vm187_vm0, %v1201_v38 }
 0x845   :  { %5415 = vmatprep.mubr.msk.bf16.mxu1 %vm6269_vm1, %v6268_v7 }
 0x917   :  { %v1251_v14 = vpop.f32.mrb[36].mxu1 }
 0x918   :  { %v6758_v40 = vadd.f32 %v1251_v14, %v6494_v0  ;;  %v5401_v43 = vpop.f32.mrb[37].mxu1  ;;  %v5885_v0 = vld [vmem:[#allocation10] sm:$0xff]  }
 0x919   :  { %v1254_v44 = vpop.f32.mrb[38].mxu1  ;;  %5412 = vmatpush3.bf16.msra.mxu1 %v5885_v0 }
 0x91a   :  { %v6761_v45 = vadd.f32 %v1254_v44, %v6496_v1  ;;  %v5402_v47 = vpop.f32.mrb[39].mxu1  ;;  %v1261_v49 = vmul.f32 %v6758_v40, %v6758_v40  ;;  %5413 = vmatprep.subr.bf16.mxu1 %v6268_v7  ;;  %v152_v1 = vld [vmem:[#allocation5] sm:$0xff] }
 0x91b   :  { %v6770_v55 = vpack.c.bf16 %v153_v53, %v152_v1 }
 0x91c   :  { %v1263_v39 = vsel %vm187_vm0, %v1261_v49, 0.0  ;;  %v1262_v34 = vmul.f32 %v6761_v45, %v6761_v45 }
 0x91d   :  { %1264 = vadd.xlane.f32.xlu0 %v1263_v39  ;;  %5414 = vmatpush3.bf16.msra.mxu1 %v5886_v52 }
 0x91e   :  { %v1266_v51 = vsel %vm187_vm0, %v1262_v34, 0.0  ;;  %5425 = vmatprep.subr.bf16.mxu1 %v6268_v7 }
 0x91f   :  { %1267 = vadd.xlane.f32.xlu1 %v1266_v51 }
 0x920   :  { %5416 = vmatmul.mubr.msk.bf16.vlgmr.msra.gmra.mrb[40].mxu1 %vm187_vm0, %v6770_v55 }
 0x921   :  { %5427 = vmatprep.mubr.msk.bf16.mxu1 %vm6269_vm1, %v6268_v7 }
 0x9aa   :  { %v1265_v59 = vpop.xlane.xlu0 %1264 }
 0x9ab   :  { %v1269_v60 = vmul.f32 0.03125, %v1265_v59 }
 0x9ac   :  { %v1268_v61 = vpop.xlane.xlu1 %1267 }
 0x9ad   :  { %v1271_v63 = vadd.f32 1e-06, %v1269_v60  ;;  %v1270_v48 = vmul.f32 0.03125, %v1268_v61 }
 0x9af   :  { %5949 = vrsqrt.f32 %v1271_v63  ;;  %v1272_v2 = vadd.f32 1e-06, %v1270_v48 }
 0x9b1   :  { %5951 = vrsqrt.f32 %v1272_v2 }
 0x9b9   :  { %v5950_v56 = vpop.eup %5949 }
 0x9ba   :  { %v1275_v3 = vmul.f32 %v5950_v56, %v6758_v40 }
 0x9bb   :  { %v5952_v4 = vpop.eup %5951 }
 0x9bc   :  { %v1276_v6 = vmul.f32 %v5952_v4, %v6761_v45  ;;  %v1283_v8 = vmul.f32 %v5004_v5, %v1275_v3 }
 0x9be   :  { %v1284_v9 = vmul.f32 %v5004_v5, %v1276_v6 }
 0x9c0   :  { %v1289_v10 = vpack.c.bf16 %v1284_v9, %v1283_v8 }
 0x9c2   :  { %5408 = vmatmul.mubr.msk.bf16.vlgmr.msra.gmra.mrb[32].mxu0 %vm187_vm0, %v1289_v10 }
 0x9c3   :  { %5421 = vmatprep.mubr.msk.bf16.mxu0 %vm6269_vm1, %v6268_v7 }
 0x9f3   :  { %v1401_v11 = vpop.f32.mrb[40].mxu1 }
 0x9f4   :  { %v5417_v12 = vpop.f32.mrb[41].mxu1 }
 0x9f5   :  { %v1404_v13 = vpop.f32.mrb[42].mxu1 }
 0x9f6   :  { %v6787_v15 = vpack.c.bf16 %v1404_v13, %v1401_v11  ;;  %v5418_v16 = vpop.f32.mrb[43].mxu1 }
 0x9f8   :  { %1459 = vrot.lane.b32.xlu0 %v6787_v15, %s6270_s30  ;;  %v1413_v17 = vsel %vm276_vm2, %v6787_v15, 0 }
 0x9f9   :  { %5420 = vmatpush3.bf16.xpose.msra.mxu0 %v1413_v17 }
 0x9fa   :  { %5431 = vmatprep.subr.bf16.mxu0 %v6268_v7 }
 0x9fc   :  { %1509 = vrot.lane.b32.xlu0 %v6787_v15, %s6275_s24 }
 0xa6a   :  { %v1460_v18 = vpop.permute.xlu0 %1459 }
 0xa6b   :  { %v1465_v19 = vsel %vm276_vm2, %v1460_v18, 0 }
 0xa6c   :  { %5426 = vmatpush3.bf16.xpose.msra.mxu1 %v1465_v19 }
 0xa6d   :  { %5437 = vmatprep.subr.bf16.mxu1 %v6268_v7 }
 0xa6e   :  { %v1510_v23 = vpop.permute.xlu0 %1509 }
 0xa6f   :  { %v1515_v25 = vsel %vm276_vm2, %v1510_v23, 0 }
 0xa95   :  { %v1339_v20 = vpop.f32.mrb[32].mxu0 }
 0xa96   :  { %v5409_v21 = vpop.f32.mrb[33].mxu0 }
 0xa97   :  { %v1342_v22 = vpop.f32.mrb[34].mxu0 }
 0xa98   :  { %v6798_v24 = vpack.c.bf16 %v1342_v22, %v1339_v20  ;;  %v5410_v27 = vpop.f32.mrb[35].mxu0 }
 0xa99   :  { %v6849_v27 = vrot.slane %v6787_v15, 4 }
 0xa9a   :  { %1456 = vrot.lane.b32.xlu1 %v6798_v24, %s6270_s30  ;;  %1507 = vrot.lane.b32.xlu0 %v6798_v24, %s6275_s24  ;;  %v6844_v22 = vrot.slane %v6798_v24, 4 }
 0xa9b   :  { %5422 = vmatmul.mubr.msk.bf16.vlgmr.msra.gmra.mrb[36].mxu0 %vm276_vm2, %v6798_v24 }
 0xa9c   :  { %5432 = vmatpush3.bf16.xpose.msra.mxu0 %v1515_v25  ;;  %5433 = vmatprep.mubr.msk.bf16.mxu0 %vm6269_vm1, %v6268_v7 }
 0xa9d   :  { %5443 = vmatprep.subr.bf16.mxu0 %v6268_v7 }
 0xa9e   :  { %1559 = vrot.lane.b32.xlu1 %v6787_v15, %s6276_s1 }
 0xaa2   :  { %1557 = vrot.lane.b32.xlu1 %v6798_v24, %s6276_s1 }
 0xb0c   :  { %v1457_v28 = vpop.permute.xlu1 %1456  ;;  %v1508_v29 = vpop.permute.xlu0 %1507 }
 0xb0d   :  { %5428 = vmatmul.mubr.msk.bf16.vlgmr.msra.gmra.mrb[44].mxu1 %vm276_vm2, %v1457_v28  ;;  %5434 = vmatmul.mubr.msk.bf16.vlgmr.msra.gmra.mrb[40].mxu0 %vm276_vm2, %v1508_v29 }
 0xb0e   :  { %5439 = vmatprep.mubr.msk.bf16.mxu1 %vm6269_vm1, %v6268_v7  ;;  %5445 = vmatprep.mubr.msk.bf16.mxu0 %vm6269_vm1, %v6268_v7 }
 0xb10   :  { %v1560_v30 = vpop.permute.xlu1 %1559 }
 0xb11   :  { %v1565_v31 = vsel %vm276_vm2, %v1560_v30, 0 }
 0xb12   :  { %5438 = vmatpush3.bf16.xpose.msra.mxu1 %v1565_v31 }
 0xb13   :  { %5449 = vmatprep.subr.bf16.mxu1 %v6268_v7 }
 0xb14   :  { %v1558_v26 = vpop.permute.xlu1 %1557 }
 0xb19   :  { %5440 = vmatmul.mubr.msk.bf16.vlgmr.msra.gmra.mrb[48].mxu1 %vm276_vm2, %v1558_v26 }
 0xb1a   :  { %5451 = vmatprep.mubr.msk.bf16.mxu1 %vm6269_vm1, %v6268_v7 }
 0xb6e   :  { %v1449_v36 = vpop.f32.mrb[36].mxu0 }
 0xb6f   :  { %v1607_v37 = vadd.f32 %v4978_v35, %v1449_v36  ;;  %v5423_v38 = vpop.f32.mrb[37].mxu0 }
 0xb70   :  { %v1452_v14 = vpop.f32.mrb[38].mxu0 }
 0xb71   :  { %v5424_v43 = vpop.f32.mrb[39].mxu0  ;;  %v1611_v44 = vsel %vm276_vm2, %v1607_v37, -inf }
 0xb72   :  { %1612 = vmax.xlane.f32.xlu0 %v1611_v44 }
 0xbe0   :  { %v1501_v47 = vpop.f32.mrb[44].mxu1  ;;  %v1551_v49 = vpop.f32.mrb[40].mxu0 }
 0xbe1   :  { %v1608_v39 = vadd.f32 %v4978_v35, %v1501_v47  ;;  %v1609_v34 = vadd.f32 %v4978_v35, %v1551_v49  ;;  %v5429_v51 = vpop.f32.mrb[45].mxu1  ;;  %v5435_v0 = vpop.f32.mrb[41].mxu0 }
 0xbe2   :  { %v1504_v52 = vpop.f32.mrb[46].mxu1  ;;  %v1554_v1 = vpop.f32.mrb[42].mxu0 }
 0xbe3   :  { %v5430_v53 = vpop.f32.mrb[47].mxu1  ;;  %v5436_v57 = vpop.f32.mrb[43].mxu0  ;;  %v1617_v58 = vsel %vm276_vm2, %v1609_v34, -inf  ;;  %v1614_v59 = vsel %vm276_vm2, %v1608_v39, -inf }
 0xbe4   :  { %1618 = vmax.xlane.f32.xlu0 %v1617_v58  ;;  %1615 = vmax.xlane.f32.xlu1 %v1614_v59 }
 0xbec   :  { %v1601_v60 = vpop.f32.mrb[48].mxu1 }
 0xbed   :  { %v1610_v61 = vadd.f32 %v4978_v35, %v1601_v60  ;;  %v5441_v63 = vpop.f32.mrb[49].mxu1  ;;  %v1874_v60 = vsel %vm276_vm2, %v6849_v27, 0 }
 0xbee   :  { %v1604_v48 = vpop.f32.mrb[50].mxu1 }
 0xbef   :  { %v5442_v2 = vpop.f32.mrb[51].mxu1  ;;  %v1620_v56 = vsel %vm276_vm2, %v1610_v61, -inf }
 0xbf0   :  { %1621 = vmax.xlane.f32.xlu0 %v1620_v56 }
 0xbf5   :  { %1657 = vrot.lane.b32.xlu1 %v6787_v15, %s6271_s26 }
 0xbff   :  { %v1613_v3 = vpop.xlane.xlu0 %1612 }
 0xc00   :  { %v1623_v4 = vsub.f32 %v1607_v37, %v1613_v3 }
 0xc02   :  { %v1627_v5 = vmul.f32 1.442695, %v1623_v4 }
 0xc04   :  { %5953 = vpow2.f32 %v1627_v5 }
 0xc0e   :  { %v5954_v6 = vpop.eup %5953 }
 0xc0f   :  { %v1635_v8 = vsel %vm276_vm2, %v5954_v6, 0.0 }
 0xc19   :  { %1636 = vadd.xlane.f32.xlu1 %v1635_v8 }
 0xc2a   :  { %1755 = vrot.lane.b32.xlu1 %v6787_v15, %s6273_s0 }
 0xc2e   :  { %1805 = vrot.lane.b32.xlu1 %v6787_v15, %s6274_s9 }
 0xc71   :  { %v1619_v9 = vpop.xlane.xlu0 %1618  ;;  %v1616_v10 = vpop.xlane.xlu1 %1615 }
 0xc72   :  { %v1625_v11 = vsub.f32 %v1609_v34, %v1619_v9  ;;  %v1624_v12 = vsub.f32 %v1608_v39, %v1616_v10 }
 0xc74   :  { %v1631_v13 = vmul.f32 1.442695, %v1625_v11  ;;  %v1629_v16 = vmul.f32 1.442695, %v1624_v12 }
 0xc75   :  { %v1658_v17 = vpop.permute.xlu1 %1657 }
 0xc76   :  { %5955 = vpow2.f32 %v1631_v13  ;;  %v1663_v18 = vsel %vm528_vm3, %v1658_v17, 0 }
 0xc77   :  { %5957 = vpow2.f32 %v1629_v16  ;;  %5444 = vmatpush3.bf16.msra.mxu0 %v1663_v18 }
 0xc78   :  { %5455 = vmatprep.subr.bf16.mxu0 %v6268_v7 }
 0xc7d   :  { %v1622_v25 = vpop.xlane.xlu0 %1621 }
 0xc7e   :  { %v1626_v28 = vsub.f32 %v1610_v61, %v1622_v25 }
 0xc80   :  { %v5956_v19 = vpop.eup %5955  ;;  %v1633_v29 = vmul.f32 1.442695, %v1626_v28 }
 0xc81   :  { %v5958_v20 = vpop.eup %5957  ;;  %v1641_v21 = vsel %vm276_vm2, %v5956_v19, 0.0 }
 0xc82   :  { %1642 = vadd.xlane.f32.xlu1 %v1641_v21  ;;  %v1638_v23 = vsel %vm276_vm2, %v5958_v20, 0.0  ;;  %5959 = vpow2.f32 %v1633_v29  ;;  %v4980_v29 = vld [vmem:[%s7474_s4 + $0x1] ss:$0 sm:$0xff] }
 0xc83   :  { %1639 = vadd.xlane.f32.xlu0 %v1638_v23 }
 0xc8c   :  { %v5960_v24 = vpop.eup %5959 }
 0xc8d   :  { %v1644_v30 = vsel %vm276_vm2, %v5960_v24, 0.0 }
 0xc93   :  { %1916 = vrot.lane.b32.xlu1 %v6844_v22, %s6270_s30 }
 0xc97   :  { %2018 = vrot.lane.b32.xlu1 %v6849_v27, %s6276_s1 }
 0xc99   :  { %1707 = vrot.lane.b32.xlu0 %v6787_v15, %s6272_s18 }
 0xc9b   :  { %2016 = vrot.lane.b32.xlu1 %v6844_v22, %s6276_s1 }
 0xca6   :  { %v1637_v15 = vpop.xlane.xlu1 %1636 }
 0xca7   :  { %5961 = vrcp.f32 %v1637_v15 }
 0xcaa   :  { %v1756_v37 = vpop.permute.xlu1 %1755 }
 0xcab   :  { %v1761_v49 = vsel %vm528_vm3, %v1756_v37, 0 }
 0xcae   :  { %v1806_v47 = vpop.permute.xlu1 %1805 }
 0xcaf   :  { %v1811_v34 = vsel %vm528_vm3, %v1806_v47, 0 }
 0xcb1   :  { %v5962_v36 = vpop.eup %5961 }
 0xcb2   :  { %v1651_v14 = vmul.f32 %v5962_v36, %v5954_v6 }
 0xcb8   :  { %1645 = vadd.xlane.f32.xlu0 %v1644_v30 }
 0xcce   :  { %1918 = vrot.lane.b32.xlu0 %v6849_v27, %s6270_s30 }
 0xcd2   :  { %1968 = vrot.lane.b32.xlu0 %v6849_v27, %s6275_s24 }
 0xcd6   :  { %1966 = vrot.lane.b32.xlu0 %v6844_v22, %s6275_s24 }
 0xd0f   :  { %v1643_v51 = vpop.xlane.xlu1 %1642 }
 0xd10   :  { %v1640_v31 = vpop.xlane.xlu0 %1639 }
 0xd11   :  { %5963 = vrcp.f32 %v1640_v31 }
 0xd12   :  { %5965 = vrcp.f32 %v1643_v51 }
 0xd13   :  { %v1917_v63 = vpop.permute.xlu1 %1916 }
 0xd14   :  { %v1708_v26 = vpop.permute.xlu0 %1707 }
 0xd15   :  { %v1713_v35 = vsel %vm528_vm3, %v1708_v26, 0 }
 0xd16   :  { %5450 = vmatpush3.bf16.msra.mxu1 %v1713_v35 }
 0xd17   :  { %5461 = vmatprep.subr.bf16.mxu1 %v6268_v7  ;;  %v2019_v56 = vpop.permute.xlu1 %2018 }
 0xd18   :  { %v2024_v4 = vsel %vm276_vm2, %v2019_v56, 0 }
 0xd1b   :  { %v5964_v38 = vpop.eup %5963  ;;  %v2017_v6 = vpop.permute.xlu1 %2016 }
 0xd1c   :  { %v1652_v43 = vmul.f32 %v5964_v38, %v5958_v20  ;;  %v5966_v52 = vpop.eup %5965 }
 0xd1d   :  { %v1653_v53 = vmul.f32 %v5966_v52, %v5956_v19 }
 0xd1e   :  { %v1655_v44 = vpack.c.bf16 %v1652_v43, %v1651_v14 }
 0xd20   :  { %5446 = vmatmul.mubr.msk.bf16.vlgmr.msra.gmra.mrb[44].mxu0 %vm276_vm2, %v1655_v44  ;;  %v1706_v39 = vrot.slane %v1655_v44, 4 }
 0xd21   :  { %5456 = vmatpush3.bf16.msra.mxu0 %v1761_v49  ;;  %5457 = vmatprep.mubr.msk.bf16.mxu0 %vm6269_vm1, %v6268_v7 }
 0xd22   :  { %5452 = vmatmul.mubr.msk.bf16.vlgmr.msra.gmra.mrb[52].mxu1 %vm276_vm2, %v1706_v39  ;;  %5467 = vmatprep.subr.bf16.mxu0 %v6268_v7 }
 0xd23   :  { %5462 = vmatpush3.bf16.msra.mxu1 %v1811_v34  ;;  %5463 = vmatprep.mubr.msk.bf16.mxu1 %vm6269_vm1, %v6268_v7 }
 0xd24   :  { %5473 = vmatprep.subr.bf16.mxu1 %v6268_v7 }
 0xd45   :  { %v1646_v0 = vpop.xlane.xlu0 %1645 }
 0xd46   :  { %5967 = vrcp.f32 %v1646_v0 }
 0xd49   :  { %v1919_v59 = vpop.permute.xlu0 %1918 }
 0xd4a   :  { %v1924_v48 = vsel %vm276_vm2, %v1919_v59, 0 }
 0xd4d   :  { %v1969_v2 = vpop.permute.xlu0 %1968 }
 0xd4e   :  { %v1974_v3 = vsel %vm276_vm2, %v1969_v2, 0 }
 0xd50   :  { %v5968_v1 = vpop.eup %5967 }
 0xd51   :  { %v1654_v57 = vmul.f32 %v5968_v1, %v5960_v24  ;;  %v1967_v5 = vpop.permute.xlu0 %1966 }
 0xd53   :  { %v1656_v58 = vpack.c.bf16 %v1654_v57, %v1653_v53 }
 0xd55   :  { %5458 = vmatmul.mubr.msk.bf16.vlgmr.msra.gmra.mrb[48].mxu0 %vm276_vm2, %v1656_v58  ;;  %v1804_v61 = vrot.slane %v1656_v58, 4 }
 0xd56   :  { %5468 = vmatpush3.bf16.xpose.msra.mxu0 %v1874_v60  ;;  %5469 = vmatprep.mubr.msk.bf16.mxu0 %vm6269_vm1, %v6268_v7 }
 0xd57   :  { %5464 = vmatmul.mubr.msk.bf16.vlgmr.msra.gmra.mrb[56].mxu1 %vm276_vm2, %v1804_v61  ;;  %5479 = vmatprep.subr.bf16.mxu0 %v6268_v7 }
 0xd58   :  { %5474 = vmatpush3.bf16.xpose.msra.mxu1 %v1924_v48  ;;  %5475 = vmatprep.mubr.msk.bf16.mxu1 %vm6269_vm1, %v6268_v7 }
 0xd59   :  { %5485 = vmatprep.subr.bf16.mxu1 %v6268_v7 }
 0xd5d   :  { %5470 = vmatmul.mubr.msk.bf16.vlgmr.msra.gmra.mrb[52].mxu0 %vm276_vm2, %v6844_v22 }
 0xd5e   :  { %5480 = vmatpush3.bf16.xpose.msra.mxu0 %v1974_v3  ;;  %5481 = vmatprep.mubr.msk.bf16.mxu0 %vm6269_vm1, %v6268_v7 }
 0xd5f   :  { %5476 = vmatmul.mubr.msk.bf16.vlgmr.msra.gmra.mrb[60].mxu1 %vm276_vm2, %v1917_v63  ;;  %5491 = vmatprep.subr.bf16.mxu0 %v6268_v7 }
 0xd60   :  { %5486 = vmatpush3.bf16.xpose.msra.mxu1 %v2024_v4  ;;  %5487 = vmatprep.mubr.msk.bf16.mxu1 %vm6269_vm1, %v6268_v7 }
 0xd61   :  { %5497 = vmatprep.subr.bf16.mxu1 %v6268_v7 }
 0xd65   :  { %5482 = vmatmul.mubr.msk.bf16.vlgmr.msra.gmra.mrb[56].mxu0 %vm276_vm2, %v1967_v5 }
 0xd66   :  { %5493 = vmatprep.mubr.msk.bf16.mxu0 %vm6269_vm1, %v6268_v7 }
 0xd67   :  { %5488 = vmatmul.mubr.msk.bf16.vlgmr.msra.gmra.mrb[64].mxu1 %vm276_vm2, %v2017_v6 }
 0xd68   :  { %5499 = vmatprep.mubr.msk.bf16.mxu1 %vm6269_vm1, %v6268_v7 }
 0xdf3   :  { %v6904_v8 = vpop.f32.mrb[44].mxu0 }
 0xdf4   :  { %v5447_v9 = vpop.f32.mrb[45].mxu0 }
 0xdf5   :  { %v1702_v10 = vpop.f32.mrb[46].mxu0  ;;  %v6906_v11 = vpop.f32.mrb[52].mxu1 }
 0xdf6   :  { %v5448_v12 = vpop.f32.mrb[47].mxu0  ;;  %v5453_v13 = vpop.f32.mrb[53].mxu1 }
 0xdf7   :  { %v1752_v16 = vpop.f32.mrb[54].mxu1 }
 0xdf8   :  { %v5454_v17 = vpop.f32.mrb[55].mxu1 }
 0xe28   :  { %v6908_v18 = vpop.f32.mrb[48].mxu0 }
 0xe29   :  { %v5459_v19 = vpop.f32.mrb[49].mxu0 }
 0xe2a   :  { %v1800_v20 = vpop.f32.mrb[50].mxu0  ;;  %v6910_v21 = vpop.f32.mrb[56].mxu1 }
 0xe2b   :  { %v5460_v23 = vpop.f32.mrb[51].mxu0  ;;  %v5465_v22 = vpop.f32.mrb[57].mxu1 }
 0xe2c   :  { %v1850_v25 = vpop.f32.mrb[58].mxu1 }
 0xe2d   :  { %v5466_v28 = vpop.f32.mrb[59].mxu1 }
 0xe30   :  { %v1910_v24 = vpop.f32.mrb[52].mxu0 }
 0xe31   :  { %v2066_v30 = vadd.f32 %v4980_v29, %v1910_v24  ;;  %v5471_v15 = vpop.f32.mrb[53].mxu0 }
 0xe32   :  { %v1913_v31 = vpop.f32.mrb[54].mxu0  ;;  %v1960_v26 = vpop.f32.mrb[60].mxu1 }
 0xe33   :  { %v2067_v35 = vadd.f32 %v4980_v29, %v1960_v26  ;;  %v5472_v36 = vpop.f32.mrb[55].mxu0  ;;  %v5477_v37 = vpop.f32.mrb[61].mxu1  ;;  %v2070_v38 = vsel %vm276_vm2, %v2066_v30, -inf }
 0xe34   :  { %2071 = vmax.xlane.f32.xlu0 %v2070_v38  ;;  %v1963_v14 = vpop.f32.mrb[62].mxu1 }
 0xe35   :  { %v5478_v43 = vpop.f32.mrb[63].mxu1  ;;  %v2073_v44 = vsel %vm276_vm2, %v2067_v35, -inf }
 0xe36   :  { %2074 = vmax.xlane.f32.xlu1 %v2073_v44 }
 0xe38   :  { %v2010_v47 = vpop.f32.mrb[56].mxu0 }
 0xe39   :  { %v2068_v49 = vadd.f32 %v4980_v29, %v2010_v47  ;;  %v5483_v39 = vpop.f32.mrb[57].mxu0 }
 0xe3a   :  { %v2013_v34 = vpop.f32.mrb[58].mxu0  ;;  %v2060_v51 = vpop.f32.mrb[64].mxu1 }
 0xe3b   :  { %v2069_v0 = vadd.f32 %v4980_v29, %v2060_v51  ;;  %v5484_v52 = vpop.f32.mrb[59].mxu0  ;;  %v5489_v1 = vpop.f32.mrb[65].mxu1  ;;  %v2076_v53 = vsel %vm276_vm2, %v2068_v49, -inf }
 0xe3c   :  { %2077 = vmax.xlane.f32.xlu0 %v2076_v53  ;;  %v2063_v57 = vpop.f32.mrb[66].mxu1  ;;  %v5889_v53 = vld [vmem:[#allocation11] sm:$0xff]  }
 0xe3d   :  { %v5490_v58 = vpop.f32.mrb[67].mxu1  ;;  %v2079_v59 = vsel %vm276_vm2, %v2069_v0, -inf }
 0xe40   :  { %2080 = vmax.xlane.f32.xlu0 %v2079_v59 }
 0xe47   :  { %2116 = vrot.lane.b32.xlu1 %v6849_v27, %s6271_s26 }
 0xec1   :  { %v2072_v60 = vpop.xlane.xlu0 %2071 }
 0xec2   :  { %v2082_v61 = vsub.f32 %v2066_v30, %v2072_v60 }
 0xec3   :  { %v2075_v63 = vpop.xlane.xlu1 %2074 }
 0xec4   :  { %v2086_v48 = vmul.f32 1.442695, %v2082_v61  ;;  %v2083_v2 = vsub.f32 %v2067_v35, %v2075_v63  ;;  %v5890_v63 = vld [vmem:[#allocation11 + $0x8] sm:$0xff]  }
 0xec6   :  { %5969 = vpow2.f32 %v2086_v48  ;;  %v2088_v56 = vmul.f32 1.442695, %v2083_v2 }
 0xec7   :  { %v2117_v3 = vpop.permute.xlu1 %2116 }
 0xec8   :  { %5971 = vpow2.f32 %v2088_v56  ;;  %v2122_v4 = vsel %vm528_vm3, %v2117_v3, 0 }
 0xec9   :  { %v2078_v5 = vpop.xlane.xlu0 %2077  ;;  %5492 = vmatpush3.bf16.msra.mxu0 %v2122_v4 }
 0xeca   :  { %v2084_v6 = vsub.f32 %v2068_v49, %v2078_v5  ;;  %5503 = vmatprep.subr.bf16.mxu0 %v6268_v7 }
 0xecc   :  { %v2090_v9 = vmul.f32 1.442695, %v2084_v6 }
 0xecd   :  { %v2081_v10 = vpop.xlane.xlu0 %2080 }
 0xece   :  { %5973 = vpow2.f32 %v2090_v9  ;;  %v2085_v12 = vsub.f32 %v2069_v0, %v2081_v10 }
 0xed0   :  { %v5970_v13 = vpop.eup %5969  ;;  %v2092_v16 = vmul.f32 1.442695, %v2085_v12 }
 0xed1   :  { %v2094_v17 = vsel %vm276_vm2, %v5970_v13, 0.0 }
 0xed2   :  { %v5972_v19 = vpop.eup %5971  ;;  %5975 = vpow2.f32 %v2092_v16  ;;  %2095 = vadd.xlane.f32.xlu1 %v2094_v17 }
 0xed3   :  { %v2097_v20 = vsel %vm276_vm2, %v5972_v19, 0.0 }
 0xed4   :  { %2098 = vadd.xlane.f32.xlu0 %v2097_v20 }
 0xed8   :  { %v5974_v23 = vpop.eup %5973 }
 0xed9   :  { %v2100_v22 = vsel %vm276_vm2, %v5974_v23, 0.0 }
 0xeda   :  { %2101 = vadd.xlane.f32.xlu1 %v2100_v22 }
 0xedc   :  { %v5976_v25 = vpop.eup %5975 }
 0xedd   :  { %v2103_v28 = vsel %vm276_vm2, %v5976_v25, 0.0 }
 0xede   :  { %2104 = vadd.xlane.f32.xlu0 %v2103_v28 }
 0xeeb   :  { %2214 = vrot.lane.b32.xlu1 %v6849_v27, %s6273_s0 }
 0xeef   :  { %2264 = vrot.lane.b32.xlu1 %v6849_v27, %s6274_s9 }
 0xef4   :  { %2166 = vrot.lane.b32.xlu0 %v6849_v27, %s6272_s18 }
 0xf5f   :  { %v2096_v29 = vpop.xlane.xlu1 %2095 }
 0xf60   :  { %5977 = vrcp.f32 %v2096_v29 }
 0xf61   :  { %v2099_v24 = vpop.xlane.xlu0 %2098 }
 0xf62   :  { %5979 = vrcp.f32 %v2099_v24 }
 0xf67   :  { %v2102_v30 = vpop.xlane.xlu1 %2101 }
 0xf68   :  { %5981 = vrcp.f32 %v2102_v30 }
 0xf6a   :  { %v5978_v15 = vpop.eup %5977 }
 0xf6b   :  { %v2215_v31 = vpop.permute.xlu1 %2214  ;;  %v2105_v26 = vpop.xlane.xlu0 %2104  ;;  %v2110_v36 = vmul.f32 %v5978_v15, %v5970_v13 }
 0xf6c   :  { %v5980_v35 = vpop.eup %5979  ;;  %5983 = vrcp.f32 %v2105_v26  ;;  %v2220_v44 = vsel %vm528_vm3, %v2215_v31, 0 }
 0xf6d   :  { %v2111_v37 = vmul.f32 %v5980_v35, %v5972_v19 }
 0xf6f   :  { %v2167_v38 = vpop.permute.xlu0 %2166  ;;  %v2114_v14 = vpack.c.bf16 %v2111_v37, %v2110_v36  ;;  %v2265_v27 = vpop.permute.xlu1 %2264 }
 0xf70   :  { %v2172_v43 = vsel %vm528_vm3, %v2167_v38, 0  ;;  %v2270_v39 = vsel %vm528_vm3, %v2265_v27, 0 }
 0xf71   :  { %5494 = vmatmul.mubr.msk.bf16.vlgmr.msra.gmra.mrb[60].mxu0 %vm276_vm2, %v2114_v14  ;;  %5498 = vmatpush3.bf16.msra.mxu1 %v2172_v43  ;;  %v2165_v47 = vrot.slane %v2114_v14, 4 }
 0xf72   :  { %5504 = vmatpush3.bf16.msra.mxu0 %v2220_v44  ;;  %5509 = vmatprep.subr.bf16.mxu1 %v6268_v7  ;;  %v5982_v49 = vpop.eup %5981 }
 0xf73   :  { %5505 = vmatprep.mubr.msk.bf16.mxu0 %vm6269_vm1, %v6268_v7  ;;  %5515 = vmatprep.subr.bf16.mxu0 %v6268_v7  ;;  %v2112_v51 = vmul.f32 %v5982_v49, %v5974_v23 }
 0xf74   :  { %5500 = vmatmul.mubr.msk.bf16.vlgmr.msra.gmra.mrb[68].mxu1 %vm276_vm2, %v2165_v47 }
 0xf75   :  { %5510 = vmatpush3.bf16.msra.mxu1 %v2270_v39  ;;  %5511 = vmatprep.mubr.msk.bf16.mxu1 %vm6269_vm1, %v6268_v7 }
 0xf76   :  { %v5984_v34 = vpop.eup %5983  ;;  %5523 = vmatprep.subr.bf16.mxu1 %v6268_v7 }
 0xf77   :  { %v2113_v0 = vmul.f32 %v5984_v34, %v5976_v25  ;;  %v5891_v34 = vld [vmem:[#allocation13] sm:$0xff]  }
 0xf79   :  { %v2115_v52 = vpack.c.bf16 %v2113_v0, %v2112_v51  ;;  %v5892_v51 = vld [vmem:[#allocation13 + $0x8] sm:$0xff]  }
 0xf7b   :  { %5506 = vmatmul.mubr.msk.bf16.vlgmr.msra.gmra.mrb[64].mxu0 %vm276_vm2, %v2115_v52  ;;  %v2263_v1 = vrot.slane %v2115_v52, 4 }
 0xf7c   :  { %5519 = vmatprep.mubr.msk.bf16.mxu0 %vm6269_vm1, %v6268_v7  ;;  %5516 = vmatpush3.bf16.msra.mxu0 %v5889_v53 }
 0xf7d   :  { %5512 = vmatmul.mubr.msk.bf16.vlgmr.msra.gmra.mrb[72].mxu1 %vm276_vm2, %v2263_v1  ;;  %5517 = vmatprep.subr.bf16.mxu0 %v6268_v7 }
 0xf7e   :  { %5527 = vmatprep.mubr.msk.bf16.mxu1 %vm6269_vm1, %v6268_v7  ;;  %5524 = vmatpush3.bf16.msra.mxu1 %v5891_v34 }
 0xf7f   :  { %5525 = vmatprep.subr.bf16.mxu1 %v6268_v7 }
 0xf80   :  { %5518 = vmatpush3.bf16.msra.mxu0 %v5890_v63  ;;  %v5030_v63 = vld [vmem:[%s7482_s12] ss:$0 sm:$0xff] }
 0xf81   :  { %5531 = vmatprep.subr.bf16.mxu0 %v6268_v7 }
 0xf82   :  { %5526 = vmatpush3.bf16.msra.mxu1 %v5892_v51 }
 0xf83   :  { %5543 = vmatprep.subr.bf16.mxu1 %v6268_v7 }
0x1044   :  { %v2158_v57 = vpop.f32.mrb[60].mxu0 }
0x1045   :  { %v5495_v58 = vpop.f32.mrb[61].mxu0 }
0x1046   :  { %v2161_v59 = vpop.f32.mrb[62].mxu0 }
0x1047   :  { %v5496_v60 = vpop.f32.mrb[63].mxu0  ;;  %v2208_v61 = vpop.f32.mrb[68].mxu1 }
0x1048   :  { %v5836_v48 = vpack.i.bf16 %v2208_v61, %v6906_v11  ;;  %v5501_v2 = vpop.f32.mrb[69].mxu1 }
0x1049   :  { %v2211_v56 = vpop.f32.mrb[70].mxu1 }
0x104a   :  { %5837 = vrot.lane.b32.xlu0 %v5836_v48, %s7496_s11  ;;  %v5502_v3 = vpop.f32.mrb[71].mxu1 }
0x104e   :  { %v2256_v4 = vpop.f32.mrb[64].mxu0 }
0x104f   :  { %v5841_v5 = vpack.i.bf16 %v2256_v4, %v6908_v18  ;;  %v5507_v6 = vpop.f32.mrb[65].mxu0  ;;  %v5895_v4 = vld [vmem:[%s7484_s14 + $0x10] sm:$0xff]  }
0x1050   :  { %v2259_v9 = vpop.f32.mrb[66].mxu0  ;;  %v2306_v10 = vpop.f32.mrb[72].mxu1 }
0x1051   :  { %v5846_v12 = vpack.i.bf16 %v2306_v10, %v6910_v21  ;;  %5842 = vrot.lane.b32.xlu1 %v5841_v5, %s6280_s10  ;;  %v5508_v13 = vpop.f32.mrb[67].mxu0  ;;  %v5513_v11 = vpop.f32.mrb[73].mxu1  ;;  %v5896_v5 = vld [vmem:[%s7484_s14 + $0x18] sm:$0xff]  }
0x1052   :  { %v2309_v16 = vpop.f32.mrb[74].mxu1 }
0x1053   :  { %5847 = vrot.lane.b32.xlu0 %v5846_v12, %s6281_s21  ;;  %v5514_v17 = vpop.f32.mrb[75].mxu1 }
0x10bc   :  { %v5838_v19 = vpop.permute.xlu0 %5837 }
0x10bd   :  { %v5840_v20 = vunpack.i.h.bf16 %v5838_v19  ;;  %v5839_v23 = vunpack.i.l.bf16 %v5838_v19 }
0x10bf   :  { %v2324_v18 = vsel %vm276_vm2, %v2158_v57, %v5840_v20  ;;  %v1865_v29 = vsel %vm276_vm2, %v6904_v8, %v5839_v23 }
0x10c3   :  { %v5843_v22 = vpop.permute.xlu1 %5842 }
0x10c4   :  { %v5845_v25 = vunpack.i.h.bf16 %v5843_v22  ;;  %v5844_v28 = vunpack.i.l.bf16 %v5843_v22 }
0x10c5   :  { %v5848_v21 = vpop.permute.xlu0 %5847 }
0x10c6   :  { %v1866_v24 = vsel %vm733_vm4, %v1865_v29, %v5844_v28  ;;  %v2325_v30 = vsel %vm733_vm4, %v2324_v18, %v5845_v25  ;;  %v5850_v15 = vunpack.i.h.bf16 %v5848_v21  ;;  %v5849_v31 = vunpack.i.l.bf16 %v5848_v21 }
0x10c8   :  { %v2326_v26 = vsel %vm735_vm5, %v2325_v30, %v5850_v15  ;;  %v1867_v35 = vsel %vm735_vm5, %v1866_v24, %v5849_v31  ;;  %v5897_v24 = vld [vmem:[%s7476_s6 + $0x10] sm:$0xff]   ;;  %v5898_v30 = vld [vmem:[%s7476_s6 + $0x18] sm:$0xff]  }
0x10c9   :  { %v2331_v36 = vpack.c.bf16 %v2326_v26, %v1867_v35 }
0x10cb   :  { %5520 = vmatmul.mubr.msk.bf16.vlgmr.msra.gmra.mrb[68].mxu0 %vm187_vm0, %v2331_v36 }
0x10cc   :  { %5539 = vmatprep.mubr.msk.bf16.mxu0 %vm6269_vm1, %v6268_v7 }
0x119e   :  { %v2381_v37 = vpop.f32.mrb[68].mxu0 }
0x119f   :  { %v2388_v8 = vadd.f32 %v2381_v37, %v6758_v40  ;;  %v5521_v38 = vpop.f32.mrb[69].mxu0  ;;  %v5893_v40 = vld [vmem:[%s7484_s14] sm:$0xff]  }
0x11a0   :  { %v2384_v14 = vpop.f32.mrb[70].mxu0  ;;  %5532 = vmatpush3.bf16.msra.mxu0 %v5893_v40 }
0x11a1   :  { %v2389_v43 = vadd.f32 %v2384_v14, %v6761_v45  ;;  %v5522_v44 = vpop.f32.mrb[71].mxu0  ;;  %v2391_v27 = vmul.f32 %v2388_v8, %v2388_v8  ;;  %v5894_v45 = vld [vmem:[%s7484_s14 + $0x8] sm:$0xff]   ;;  %5533 = vmatprep.subr.bf16.mxu0 %v6268_v7 }
0x11a3   :  { %v2393_v47 = vsel %vm187_vm0, %v2391_v27, 0.0  ;;  %v2392_v49 = vmul.f32 %v2389_v43, %v2389_v43 }
0x11a4   :  { %2394 = vadd.xlane.f32.xlu1 %v2393_v47  ;;  %5534 = vmatpush3.bf16.msra.mxu0 %v5894_v45 }
0x11a5   :  { %v2396_v39 = vsel %vm187_vm0, %v2392_v49, 0.0  ;;  %5535 = vmatprep.subr.bf16.mxu0 %v6268_v7 }
0x11a6   :  { %2397 = vadd.xlane.f32.xlu0 %v2396_v39 }
0x11a8   :  { %5536 = vmatpush3.bf16.msra.mxu0 %v5895_v4 }
0x11a9   :  { %5537 = vmatprep.subr.bf16.mxu0 %v6268_v7 }
0x11ac   :  { %5538 = vmatpush3.bf16.msra.mxu0 %v5896_v5 }
0x11ad   :  { %5557 = vmatprep.subr.bf16.mxu0 %v6268_v7 }
0x1231   :  { %v2395_v0 = vpop.xlane.xlu1 %2394 }
0x1232   :  { %v2399_v52 = vmul.f32 0.03125, %v2395_v0 }
0x1233   :  { %v2398_v1 = vpop.xlane.xlu0 %2397 }
0x1234   :  { %v2401_v53 = vadd.f32 1e-06, %v2399_v52  ;;  %v2400_v57 = vmul.f32 0.03125, %v2398_v1 }
0x1236   :  { %5985 = vrsqrt.f32 %v2401_v53  ;;  %v2402_v58 = vadd.f32 1e-06, %v2400_v57 }
0x1238   :  { %5987 = vrsqrt.f32 %v2402_v58 }
0x1240   :  { %v5986_v59 = vpop.eup %5985 }
0x1241   :  { %v2405_v60 = vmul.f32 %v5986_v59, %v2388_v8 }
0x1242   :  { %v5988_v61 = vpop.eup %5987 }
0x1243   :  { %v2406_v48 = vmul.f32 %v5988_v61, %v2389_v43  ;;  %v2413_v2 = vmul.f32 %v5030_v63, %v2405_v60 }
0x1245   :  { %v2414_v56 = vmul.f32 %v5030_v63, %v2406_v48 }
0x1247   :  { %v2419_v3 = vpack.c.bf16 %v2414_v56, %v2413_v2 }
0x1249   :  { %5528 = vmatmul.mubr.msk.bf16.vlgmr.msra.gmra.mrb[76].mxu1 %vm187_vm0, %v2419_v3 }
0x124a   :  { %5547 = vmatprep.mubr.msk.bf16.mxu1 %vm6269_vm1, %v6268_v7  ;;  %5544 = vmatpush3.bf16.msra.mxu1 %v5897_v24 }
0x124b   :  { %5545 = vmatprep.subr.bf16.mxu1 %v6268_v7 }
0x124e   :  { %5546 = vmatpush3.bf16.msra.mxu1 %v5898_v30 }
0x124f   :  { %5551 = vmatprep.subr.bf16.mxu1 %v6268_v7 }
0x131c   :  { %v2469_v6 = vpop.f32.mrb[76].mxu1 }
0x131d   :  { %v5529_v9 = vpop.f32.mrb[77].mxu1  ;;  %v2476_v12 = vmax.f32 %v2469_v6, 0.0 }
0x131e   :  { %v2472_v10 = vpop.f32.mrb[78].mxu1 }
0x131f   :  { %v2477_v13 = vmax.f32 %v2472_v10, 0.0  ;;  %v5530_v11 = vpop.f32.mrb[79].mxu1 }
0x1321   :  { %v2486_v16 = vpack.c.bf16 %v2477_v13, %v2476_v12 }
0x1323   :  { %5540 = vmatmul.mubr.msk.bf16.vlgmr.msra.gmra.mrb[72].mxu0 %vm2511_vm6, %v2486_v16 }
0x1324   :  { %5559 = vmatprep.mubr.msk.bf16.mxu0 %vm6269_vm1, %v6268_v7 }
0x13f6   :  { %v2549_v17 = vpop.f32.mrb[72].mxu0 }
0x13f7   :  { %v7000_v19 = vadd.f32 %v2549_v17, %v2388_v8  ;;  %v5541_v20 = vpop.f32.mrb[73].mxu0 }
0x13f8   :  { %v2552_v23 = vpop.f32.mrb[74].mxu0 }
0x13f9   :  { %v7002_v22 = vadd.f32 %v2552_v23, %v2389_v43  ;;  %v5542_v25 = vpop.f32.mrb[75].mxu0  ;;  %v2560_v28 = vmul.f32 %v7000_v19, %v7000_v19  ;;  %v5040_v43 = vld [vmem:[%s7475_s5 + $0x1] ss:$0 sm:$0xff] }
0x13fb   :  { %v2562_v18 = vsel %vm187_vm0, %v2560_v28, 0.0  ;;  %v2561_v29 = vmul.f32 %v7002_v22, %v7002_v22 }
0x13fc   :  { %2563 = vadd.xlane.f32.xlu0 %v2562_v18 }
0x13fd   :  { %v2565_v21 = vsel %vm187_vm0, %v2561_v29, 0.0 }
0x13fe   :  { %2566 = vadd.xlane.f32.xlu1 %v2565_v21 }
0x1489   :  { %v2564_v15 = vpop.xlane.xlu0 %2563 }
0x148a   :  { %v2568_v31 = vmul.f32 0.03125, %v2564_v15 }
0x148b   :  { %v2567_v26 = vpop.xlane.xlu1 %2566 }
0x148c   :  { %v2570_v35 = vadd.f32 1e-06, %v2568_v31  ;;  %v2569_v36 = vmul.f32 0.03125, %v2567_v26 }
0x148e   :  { %5989 = vrsqrt.f32 %v2570_v35  ;;  %v2571_v37 = vadd.f32 1e-06, %v2569_v36 }
0x1490   :  { %5991 = vrsqrt.f32 %v2571_v37 }
0x1498   :  { %v5990_v8 = vpop.eup %5989 }
0x1499   :  { %v2574_v38 = vmul.f32 %v5990_v8, %v7000_v19 }
0x149a   :  { %v5992_v14 = vpop.eup %5991 }
0x149b   :  { %v2575_v44 = vmul.f32 %v5992_v14, %v7002_v22  ;;  %v2582_v27 = vmul.f32 %v5040_v43, %v2574_v38 }
0x149d   :  { %v2583_v47 = vmul.f32 %v5040_v43, %v2575_v44 }
0x149f   :  { %v2589_v49 = vpack.c.bf16 %v2583_v47, %v2582_v27 }
0x14a1   :  { %5548 = vmatmul.mubr.msk.bf16.vlgmr.msra.gmra.mrb[80].mxu1 %vm187_vm0, %v2589_v49 }
0x14a2   :  { %5553 = vmatprep.mubr.msk.bf16.mxu1 %vm6269_vm1, %v6268_v7 }
0x1574   :  { %v2639_v39 = vpop.f32.mrb[80].mxu1 }
0x1575   :  { %v5549_v34 = vpop.f32.mrb[81].mxu1 }
0x1576   :  { %v2642_v51 = vpop.f32.mrb[82].mxu1 }
0x1577   :  { %v7026_v40 = vpack.c.bf16 %v2642_v51, %v2639_v39  ;;  %v5550_v45 = vpop.f32.mrb[83].mxu1 }
0x1579   :  { %2698 = vrot.lane.b32.xlu1 %v7026_v40, %s6272_s18  ;;  %2648 = vrot.lane.b32.xlu0 %v7026_v40, %s6271_s26 }
0x157d   :  { %2696 = vrot.lane.b32.xlu1 %v7026_v40, %s6270_s30  ;;  %2748 = vrot.lane.b32.xlu0 %v7026_v40, %s6273_s0 }
0x1581   :  { %2798 = vrot.lane.b32.xlu1 %v7026_v40, %s6274_s9  ;;  %2746 = vrot.lane.b32.xlu0 %v7026_v40, %s6275_s24 }
0x1585   :  { %2796 = vrot.lane.b32.xlu1 %v7026_v40, %s6276_s1 }
0x15eb   :  { %v2699_v0 = vpop.permute.xlu1 %2698  ;;  %v2649_v52 = vpop.permute.xlu0 %2648 }
0x15ec   :  { %v2704_v1 = vsel %vm276_vm2, %v2699_v0, 0  ;;  %v2654_v53 = vsel %vm276_vm2, %v2649_v52, 0 }
0x15ed   :  { %5552 = vmatpush3.bf16.xpose.msra.mxu1 %v2654_v53  ;;  %5558 = vmatpush3.bf16.xpose.msra.mxu0 %v2704_v1  ;;  %v7086_v1 = vrot.slane %v7026_v40, 4 }
0x15ee   :  { %5563 = vmatprep.subr.bf16.mxu1 %v6268_v7  ;;  %5569 = vmatprep.subr.bf16.mxu0 %v6268_v7 }
0x15ef   :  { %v2697_v57 = vpop.permute.xlu1 %2696  ;;  %v2749_v58 = vpop.permute.xlu0 %2748 }
0x15f0   :  { %v2754_v60 = vsel %vm276_vm2, %v2749_v58, 0 }
0x15f3   :  { %v2799_v59 = vpop.permute.xlu1 %2798  ;;  %v2747_v63 = vpop.permute.xlu0 %2746 }
0x15f4   :  { %v2804_v61 = vsel %vm276_vm2, %v2799_v59, 0  ;;  %5554 = vmatmul.mubr.msk.bf16.vlgmr.msra.gmra.mrb[84].mxu1 %vm276_vm2, %v7026_v40  ;;  %5560 = vmatmul.mubr.msk.bf16.vlgmr.msra.gmra.mrb[76].mxu0 %vm276_vm2, %v2697_v57 }
0x15f5   :  { %5564 = vmatpush3.bf16.xpose.msra.mxu1 %v2754_v60  ;;  %5570 = vmatpush3.bf16.xpose.msra.mxu0 %v2804_v61 }
0x15f6   :  { %5565 = vmatprep.mubr.msk.bf16.mxu1 %vm6269_vm1, %v6268_v7  ;;  %5571 = vmatprep.mubr.msk.bf16.mxu0 %vm6269_vm1, %v6268_v7 }
0x15f7   :  { %5575 = vmatprep.subr.bf16.mxu1 %v6268_v7  ;;  %5581 = vmatprep.subr.bf16.mxu0 %v6268_v7  ;;  %v2797_v48 = vpop.permute.xlu1 %2796 }
0x15fc   :  { %5566 = vmatmul.mubr.msk.bf16.vlgmr.msra.gmra.mrb[88].mxu1 %vm276_vm2, %v2747_v63  ;;  %5572 = vmatmul.mubr.msk.bf16.vlgmr.msra.gmra.mrb[80].mxu0 %vm276_vm2, %v2797_v48 }
0x15fd   :  { %5577 = vmatprep.mubr.msk.bf16.mxu1 %vm6269_vm1, %v6268_v7  ;;  %5583 = vmatprep.mubr.msk.bf16.mxu0 %vm6269_vm1, %v6268_v7 }
0x16c7   :  { %v2690_v2 = vpop.f32.mrb[84].mxu1  ;;  %v2740_v56 = vpop.f32.mrb[76].mxu0 }
0x16c8   :  { %v2846_v3 = vadd.f32 %v2690_v2, %v6569_v41  ;;  %v2847_v4 = vadd.f32 %v2740_v56, %v6578_v46  ;;  %v5555_v5 = vpop.f32.mrb[85].mxu1  ;;  %v5561_v6 = vpop.f32.mrb[77].mxu0 }
0x16c9   :  { %v2693_v9 = vpop.f32.mrb[86].mxu1  ;;  %v2743_v10 = vpop.f32.mrb[78].mxu0 }
0x16ca   :  { %v5556_v12 = vpop.f32.mrb[87].mxu1  ;;  %v5562_v13 = vpop.f32.mrb[79].mxu0  ;;  %v2853_v11 = vsel %vm276_vm2, %v2847_v4, -inf  ;;  %v2850_v16 = vsel %vm276_vm2, %v2846_v3, -inf }
0x16cb   :  { %2854 = vmax.xlane.f32.xlu1 %v2853_v11  ;;  %2851 = vmax.xlane.f32.xlu0 %v2850_v16 }
0x16cf   :  { %v2790_v17 = vpop.f32.mrb[88].mxu1  ;;  %v2840_v20 = vpop.f32.mrb[80].mxu0 }
0x16d0   :  { %v2848_v23 = vadd.f32 %v2790_v17, %v6588_v54  ;;  %v5567_v25 = vpop.f32.mrb[89].mxu1  ;;  %v5573_v41 = vpop.f32.mrb[81].mxu0  ;;  %v2849_v18 = vadd.f32 %v2840_v20, %v6598_v62 }
0x16d1   :  { %v2793_v28 = vpop.f32.mrb[90].mxu1  ;;  %v2843_v46 = vpop.f32.mrb[82].mxu0 }
0x16d2   :  { %v5568_v29 = vpop.f32.mrb[91].mxu1  ;;  %v5574_v21 = vpop.f32.mrb[83].mxu0  ;;  %v2856_v24 = vsel %vm276_vm2, %v2848_v23, -inf  ;;  %v2859_v30 = vsel %vm276_vm2, %v2849_v18, -inf }
0x16d3   :  { %2857 = vmax.xlane.f32.xlu0 %v2856_v24 }
0x16d7   :  { %2860 = vmax.xlane.f32.xlu0 %v2859_v30 }
0x16dc   :  { %2896 = vrot.lane.b32.xlu1 %v7026_v40, %s7498_s3 }
0x1758   :  { %v2855_v15 = vpop.xlane.xlu1 %2854  ;;  %v2852_v31 = vpop.xlane.xlu0 %2851 }
0x1759   :  { %v2863_v54 = vsub.f32 %v2847_v4, %v2855_v15  ;;  %v2862_v26 = vsub.f32 %v2846_v3, %v2852_v31 }
0x175b   :  { %v2868_v35 = vmul.f32 1.442695, %v2863_v54  ;;  %v2866_v36 = vmul.f32 1.442695, %v2862_v26 }
0x175c   :  { %v2897_v37 = vpop.permute.xlu1 %2896 }
0x175d   :  { %5993 = vpow2.f32 %v2868_v35  ;;  %v2902_v62 = vsel %vm528_vm3, %v2897_v37, 0 }
0x175e   :  { %5995 = vpow2.f32 %v2866_v36  ;;  %5576 = vmatpush3.bf16.msra.mxu1 %v2902_v62 }
0x175f   :  { %5587 = vmatprep.subr.bf16.mxu1 %v6268_v7 }
0x1760   :  { %v2858_v44 = vpop.xlane.xlu0 %2857 }
0x1761   :  { %v2864_v39 = vsub.f32 %v2848_v23, %v2858_v44 }
0x1763   :  { %v2870_v34 = vmul.f32 1.442695, %v2864_v39 }
0x1764   :  { %v2861_v27 = vpop.xlane.xlu0 %2860 }
0x1765   :  { %v2865_v47 = vsub.f32 %v2849_v18, %v2861_v27 }
0x1767   :  { %v5994_v8 = vpop.eup %5993  ;;  %v2872_v49 = vmul.f32 1.442695, %v2865_v47 }
0x1768   :  { %v5996_v38 = vpop.eup %5995  ;;  %v2877_v14 = vsel %vm276_vm2, %v5994_v8, 0.0 }
0x1769   :  { %v2874_v43 = vsel %vm276_vm2, %v5996_v38, 0.0  ;;  %2878 = vadd.xlane.f32.xlu0 %v2877_v14  ;;  %5997 = vpow2.f32 %v2872_v49 }
0x176a   :  { %2875 = vadd.xlane.f32.xlu1 %v2874_v43  ;;  %5999 = vpow2.f32 %v2870_v34 }
0x1773   :  { %v5998_v51 = vpop.eup %5997 }
0x1774   :  { %v2883_v45 = vsel %vm276_vm2, %v5998_v51, 0.0  ;;  %v6000_v0 = vpop.eup %5999 }
0x1775   :  { %v2880_v52 = vsel %vm276_vm2, %v6000_v0, 0.0 }
0x177b   :  { %2994 = vrot.lane.b32.xlu1 %v7026_v40, %s6277_s2 }
0x177f   :  { %3044 = vrot.lane.b32.xlu1 %v7026_v40, %s6278_s28  ;;  %2946 = vrot.lane.b32.xlu0 %v7026_v40, %s6279_s17 }
0x179e   :  { %2884 = vadd.xlane.f32.xlu0 %v2883_v45 }
0x17a3   :  { %2881 = vadd.xlane.f32.xlu1 %v2880_v52 }
0x17b4   :  { %3158 = vrot.lane.b32.xlu1 %v7086_v1, %s6272_s18  ;;  %3108 = vrot.lane.b32.xlu0 %v7086_v1, %s6271_s26 }
0x17b8   :  { %3208 = vrot.lane.b32.xlu1 %v7086_v1, %s6273_s0  ;;  %3156 = vrot.lane.b32.xlu0 %v7086_v1, %s6270_s30 }
0x17bc   :  { %3206 = vrot.lane.b32.xlu1 %v7086_v1, %s6275_s24  ;;  %3258 = vrot.lane.b32.xlu0 %v7086_v1, %s6274_s9 }
0x17c0   :  { %3256 = vrot.lane.b32.xlu0 %v7086_v1, %s6276_s1 }
0x17f6   :  { %v2879_v40 = vpop.xlane.xlu0 %2878 }
0x17f7   :  { %v2876_v53 = vpop.xlane.xlu1 %2875  ;;  %6001 = vrcp.f32 %v2879_v40 }
0x17f8   :  { %6003 = vrcp.f32 %v2876_v53 }
0x17fa   :  { %v2947_v57 = vpop.permute.xlu0 %2946 }
0x17fb   :  { %v2952_v58 = vsel %vm528_vm3, %v2947_v57, 0  ;;  %v2995_v59 = vpop.permute.xlu1 %2994 }
0x17fc   :  { %5582 = vmatpush3.bf16.msra.mxu0 %v2952_v58  ;;  %v3000_v3 = vsel %vm528_vm3, %v2995_v59, 0 }
0x17fd   :  { %5593 = vmatprep.subr.bf16.mxu0 %v6268_v7 }
0x17ff   :  { %v3045_v56 = vpop.permute.xlu1 %3044 }
0x1800   :  { %v3050_v5 = vsel %vm528_vm3, %v3045_v56, 0 }
0x1801   :  { %v6002_v60 = vpop.eup %6001 }
0x1802   :  { %v6004_v61 = vpop.eup %6003  ;;  %v2891_v63 = vmul.f32 %v6002_v60, %v5994_v8 }
0x1803   :  { %v2890_v48 = vmul.f32 %v6004_v61, %v5996_v38 }
0x1805   :  { %v2894_v2 = vpack.c.bf16 %v2891_v63, %v2890_v48 }
0x1807   :  { %5578 = vmatmul.mubr.msk.bf16.vlgmr.msra.gmra.mrb[92].mxu1 %vm276_vm2, %v2894_v2  ;;  %v2945_v4 = vrot.slane %v2894_v2, 4 }
0x1808   :  { %5588 = vmatpush3.bf16.msra.mxu1 %v3000_v3  ;;  %5589 = vmatprep.mubr.msk.bf16.mxu1 %vm6269_vm1, %v6268_v7 }
0x1809   :  { %5584 = vmatmul.mubr.msk.bf16.vlgmr.msra.gmra.mrb[84].mxu0 %vm276_vm2, %v2945_v4  ;;  %5599 = vmatprep.subr.bf16.mxu1 %v6268_v7 }
0x180a   :  { %5594 = vmatpush3.bf16.msra.mxu0 %v3050_v5  ;;  %5595 = vmatprep.mubr.msk.bf16.mxu0 %vm6269_vm1, %v6268_v7 }
0x180b   :  { %5605 = vmatprep.subr.bf16.mxu0 %v6268_v7 }
0x182b   :  { %v2885_v6 = vpop.xlane.xlu0 %2884 }
0x182c   :  { %6005 = vrcp.f32 %v2885_v6 }
0x182f   :  { %v3109_v13 = vpop.permute.xlu0 %3108 }
0x1830   :  { %v2882_v9 = vpop.xlane.xlu1 %2881  ;;  %v3114_v23 = vsel %vm276_vm2, %v3109_v13, 0 }
0x1831   :  { %6007 = vrcp.f32 %v2882_v9 }
0x1833   :  { %v3157_v41 = vpop.permute.xlu0 %3156 }
0x1834   :  { %v3159_v20 = vpop.permute.xlu1 %3158 }
0x1835   :  { %v3164_v28 = vsel %vm276_vm2, %v3159_v20, 0 }
0x1836   :  { %v6006_v10 = vpop.eup %6005 }
0x1837   :  { %v2893_v11 = vmul.f32 %v6006_v10, %v5998_v51  ;;  %v3259_v18 = vpop.permute.xlu0 %3258 }
0x1838   :  { %v3209_v46 = vpop.permute.xlu1 %3208  ;;  %v3264_v21 = vsel %vm276_vm2, %v3259_v18, 0 }
0x1839   :  { %v3214_v29 = vsel %vm276_vm2, %v3209_v46, 0 }
0x183b   :  { %v6008_v12 = vpop.eup %6007  ;;  %v3257_v30 = vpop.permute.xlu0 %3256 }
0x183c   :  { %v2892_v16 = vmul.f32 %v6008_v12, %v6000_v0  ;;  %v3207_v24 = vpop.permute.xlu1 %3206 }
0x183e   :  { %v2895_v17 = vpack.c.bf16 %v2893_v11, %v2892_v16 }
0x1840   :  { %5590 = vmatmul.mubr.msk.bf16.vlgmr.msra.gmra.mrb[96].mxu1 %vm276_vm2, %v2895_v17  ;;  %v3043_v25 = vrot.slane %v2895_v17, 4 }
0x1841   :  { %5600 = vmatpush3.bf16.xpose.msra.mxu1 %v3114_v23  ;;  %5601 = vmatprep.mubr.msk.bf16.mxu1 %vm6269_vm1, %v6268_v7 }
0x1842   :  { %5596 = vmatmul.mubr.msk.bf16.vlgmr.msra.gmra.mrb[88].mxu0 %vm276_vm2, %v3043_v25  ;;  %5611 = vmatprep.subr.bf16.mxu1 %v6268_v7 }
0x1843   :  { %5606 = vmatpush3.bf16.xpose.msra.mxu0 %v3164_v28  ;;  %5607 = vmatprep.mubr.msk.bf16.mxu0 %vm6269_vm1, %v6268_v7 }
0x1844   :  { %5617 = vmatprep.subr.bf16.mxu0 %v6268_v7 }
0x1848   :  { %5602 = vmatmul.mubr.msk.bf16.vlgmr.msra.gmra.mrb[100].mxu1 %vm276_vm2, %v7086_v1 }
0x1849   :  { %5612 = vmatpush3.bf16.xpose.msra.mxu1 %v3214_v29  ;;  %5613 = vmatprep.mubr.msk.bf16.mxu1 %vm6269_vm1, %v6268_v7 }
0x184a   :  { %5608 = vmatmul.mubr.msk.bf16.vlgmr.msra.gmra.mrb[92].mxu0 %vm276_vm2, %v3157_v41  ;;  %5623 = vmatprep.subr.bf16.mxu1 %v6268_v7 }
0x184b   :  { %5618 = vmatpush3.bf16.xpose.msra.mxu0 %v3264_v21  ;;  %5619 = vmatprep.mubr.msk.bf16.mxu0 %vm6269_vm1, %v6268_v7 }
0x184c   :  { %5629 = vmatprep.subr.bf16.mxu0 %v6268_v7 }
0x1850   :  { %5614 = vmatmul.mubr.msk.bf16.vlgmr.msra.gmra.mrb[104].mxu1 %vm276_vm2, %v3207_v24 }
0x1851   :  { %5625 = vmatprep.mubr.msk.bf16.mxu1 %vm6269_vm1, %v6268_v7 }
0x1852   :  { %5620 = vmatmul.mubr.msk.bf16.vlgmr.msra.gmra.mrb[96].mxu0 %vm276_vm2, %v3257_v30 }
0x1853   :  { %5631 = vmatprep.mubr.msk.bf16.mxu0 %vm6269_vm1, %v6268_v7 }
0x18da   :  { %v7141_v15 = vpop.f32.mrb[92].mxu1 }
0x18db   :  { %v5579_v31 = vpop.f32.mrb[93].mxu1 }
0x18dc   :  { %v2941_v54 = vpop.f32.mrb[94].mxu1  ;;  %v7143_v26 = vpop.f32.mrb[84].mxu0 }
0x18dd   :  { %v5580_v35 = vpop.f32.mrb[95].mxu1  ;;  %v5585_v36 = vpop.f32.mrb[85].mxu0 }
0x18de   :  { %v2991_v37 = vpop.f32.mrb[86].mxu0 }
0x18df   :  { %v5586_v62 = vpop.f32.mrb[87].mxu0 }
0x1913   :  { %v7145_v8 = vpop.f32.mrb[96].mxu1 }
0x1914   :  { %v5591_v38 = vpop.f32.mrb[97].mxu1 }
0x1915   :  { %v3039_v14 = vpop.f32.mrb[98].mxu1  ;;  %v7147_v43 = vpop.f32.mrb[88].mxu0 }
0x1916   :  { %v5592_v44 = vpop.f32.mrb[99].mxu1  ;;  %v5597_v27 = vpop.f32.mrb[89].mxu0 }
0x1917   :  { %v3089_v47 = vpop.f32.mrb[90].mxu0 }
0x1918   :  { %v5598_v49 = vpop.f32.mrb[91].mxu0 }
0x191b   :  { %v3150_v39 = vpop.f32.mrb[100].mxu1 }
0x191c   :  { %v3306_v34 = vadd.f32 %v3150_v39, %v6682_v32  ;;  %v5603_v51 = vpop.f32.mrb[101].mxu1 }
0x191d   :  { %v3153_v45 = vpop.f32.mrb[102].mxu1  ;;  %v3200_v0 = vpop.f32.mrb[92].mxu0 }
0x191e   :  { %v3307_v52 = vadd.f32 %v3200_v0, %v6685_v33  ;;  %v5604_v40 = vpop.f32.mrb[103].mxu1  ;;  %v5609_v53 = vpop.f32.mrb[93].mxu0  ;;  %v3310_v57 = vsel %vm276_vm2, %v3306_v34, -inf }
0x191f   :  { %v3203_v58 = vpop.f32.mrb[94].mxu0  ;;  %3311 = vmax.xlane.f32.xlu1 %v3310_v57 }
0x1920   :  { %v5610_v59 = vpop.f32.mrb[95].mxu0  ;;  %v3313_v60 = vsel %vm276_vm2, %v3307_v52, -inf }
0x1921   :  { %3314 = vmax.xlane.f32.xlu0 %v3313_v60 }
0x1923   :  { %v3250_v61 = vpop.f32.mrb[104].mxu1 }
0x1924   :  { %v3308_v63 = vadd.f32 %v3250_v61, %v6692_v42  ;;  %v5615_v48 = vpop.f32.mrb[105].mxu1  ;;  %v5899_v61 = vld [vmem:[%s7477_s7 + $0x10] sm:$0xff]  }
0x1925   :  { %v3253_v32 = vpop.f32.mrb[106].mxu1  ;;  %v3300_v2 = vpop.f32.mrb[96].mxu0 }
0x1926   :  { %v3309_v56 = vadd.f32 %v3300_v2, %v6695_v50  ;;  %v5616_v3 = vpop.f32.mrb[107].mxu1  ;;  %v5621_v33 = vpop.f32.mrb[97].mxu0  ;;  %v3316_v4 = vsel %vm276_vm2, %v3308_v63, -inf  ;;  %v5900_v32 = vld [vmem:[%s7477_s7 + $0x18] sm:$0xff]  }
0x1927   :  { %v3303_v5 = vpop.f32.mrb[98].mxu0  ;;  %3317 = vmax.xlane.f32.xlu0 %v3316_v4 }
0x1928   :  { %v5622_v6 = vpop.f32.mrb[99].mxu0  ;;  %v3319_v9 = vsel %vm276_vm2, %v3309_v56, -inf }
0x1929   :  { %3320 = vmax.xlane.f32.xlu1 %v3319_v9 }
0x193a   :  { %3406 = vrot.lane.b32.xlu1 %v7086_v1, %s6279_s17 }
0x193d   :  { %3356 = vrot.lane.b32.xlu0 %v7086_v1, %s7498_s3 }
0x19ac   :  { %v3312_v42 = vpop.xlane.xlu1 %3311 }
0x19ad   :  { %v3322_v10 = vsub.f32 %v3306_v34, %v3312_v42 }
0x19ae   :  { %v3315_v12 = vpop.xlane.xlu0 %3314 }
0x19af   :  { %v3326_v50 = vmul.f32 1.442695, %v3322_v10  ;;  %v3323_v13 = vsub.f32 %v3307_v52, %v3315_v12 }
0x19b1   :  { %6009 = vpow2.f32 %v3326_v50  ;;  %v3328_v11 = vmul.f32 1.442695, %v3323_v13 }
0x19b3   :  { %6011 = vpow2.f32 %v3328_v11 }
0x19b4   :  { %v3318_v16 = vpop.xlane.xlu0 %3317 }
0x19b5   :  { %v3324_v17 = vsub.f32 %v3308_v63, %v3318_v16 }
0x19b6   :  { %v3321_v20 = vpop.xlane.xlu1 %3320 }
0x19b7   :  { %v3330_v23 = vmul.f32 1.442695, %v3324_v17  ;;  %v3325_v25 = vsub.f32 %v3309_v56, %v3321_v20 }
0x19b8   :  { %v3357_v41 = vpop.permute.xlu0 %3356 }
0x19b9   :  { %6013 = vpow2.f32 %v3330_v23  ;;  %v3332_v28 = vmul.f32 1.442695, %v3325_v25  ;;  %v3362_v46 = vsel %vm528_vm3, %v3357_v41, 0 }
0x19ba   :  { %v3407_v18 = vpop.permute.xlu1 %3406  ;;  %5624 = vmatpush3.bf16.msra.mxu1 %v3362_v46 }
0x19bb   :  { %v6010_v29 = vpop.eup %6009  ;;  %6015 = vpow2.f32 %v3332_v28  ;;  %v3412_v21 = vsel %vm528_vm3, %v3407_v18, 0  ;;  %5635 = vmatprep.subr.bf16.mxu1 %v6268_v7 }
0x19bc   :  { %5630 = vmatpush3.bf16.msra.mxu0 %v3412_v21  ;;  %v3334_v24 = vsel %vm276_vm2, %v6010_v29, 0.0 }
0x19bd   :  { %v6012_v30 = vpop.eup %6011  ;;  %3335 = vadd.xlane.f32.xlu0 %v3334_v24  ;;  %5641 = vmatprep.subr.bf16.mxu0 %v6268_v7 }
0x19be   :  { %v3337_v31 = vsel %vm276_vm2, %v6012_v30, 0.0 }
0x19bf   :  { %3338 = vadd.xlane.f32.xlu1 %v3337_v31 }
0x19c3   :  { %v6014_v54 = vpop.eup %6013 }
0x19c4   :  { %v3340_v35 = vsel %vm276_vm2, %v6014_v54, 0.0 }
0x19c5   :  { %v6016_v36 = vpop.eup %6015  ;;  %3341 = vadd.xlane.f32.xlu0 %v3340_v35 }
0x19c6   :  { %v3343_v37 = vsel %vm276_vm2, %v6016_v36, 0.0 }
0x19c7   :  { %3344 = vadd.xlane.f32.xlu1 %v3343_v37 }
0x19d8   :  { %3454 = vrot.lane.b32.xlu1 %v7086_v1, %s6277_s2 }
0x19db   :  { %3504 = vrot.lane.b32.xlu0 %v7086_v1, %s6278_s28 }
0x1a4a   :  { %v3336_v62 = vpop.xlane.xlu0 %3335 }
0x1a4b   :  { %6017 = vrcp.f32 %v3336_v62 }
0x1a4c   :  { %v3339_v38 = vpop.xlane.xlu1 %3338 }
0x1a4d   :  { %6019 = vrcp.f32 %v3339_v38 }
0x1a52   :  { %v3342_v14 = vpop.xlane.xlu0 %3341 }
0x1a53   :  { %6021 = vrcp.f32 %v3342_v14 }
0x1a54   :  { %v3345_v44 = vpop.xlane.xlu1 %3344 }
0x1a55   :  { %v6018_v27 = vpop.eup %6017  ;;  %6023 = vrcp.f32 %v3345_v44 }
0x1a56   :  { %v3350_v49 = vmul.f32 %v6018_v27, %v6010_v29  ;;  %v3505_v45 = vpop.permute.xlu0 %3504 }
0x1a57   :  { %v6020_v47 = vpop.eup %6019  ;;  %v3510_v40 = vsel %vm528_vm3, %v3505_v45, 0 }
0x1a58   :  { %v3351_v39 = vmul.f32 %v6020_v47, %v6012_v30  ;;  %v3455_v34 = vpop.permute.xlu1 %3454 }
0x1a59   :  { %v3460_v0 = vsel %vm528_vm3, %v3455_v34, 0  ;;  %v5904_v34 = vld [vmem:[#allocation8 + $0x18] sm:$0xff]  }
0x1a5a   :  { %v3354_v51 = vpack.c.bf16 %v3351_v39, %v3350_v49  ;;  %v5902_v39 = vld [vmem:[#allocation10 + $0x18] sm:$0xff]  }
0x1a5c   :  { %5626 = vmatmul.mubr.msk.bf16.vlgmr.msra.gmra.mrb[108].mxu1 %vm276_vm2, %v3354_v51  ;;  %v3405_v1 = vrot.slane %v3354_v51, 4 }
0x1a5d   :  { %v6022_v52 = vpop.eup %6021  ;;  %5636 = vmatpush3.bf16.msra.mxu1 %v3460_v0  ;;  %5637 = vmatprep.mubr.msk.bf16.mxu1 %vm6269_vm1, %v6268_v7 }
0x1a5e   :  { %5632 = vmatmul.mubr.msk.bf16.vlgmr.msra.gmra.mrb[100].mxu0 %vm276_vm2, %v3405_v1  ;;  %5647 = vmatprep.subr.bf16.mxu1 %v6268_v7  ;;  %v3352_v57 = vmul.f32 %v6022_v52, %v6014_v54 }
0x1a5f   :  { %v6024_v53 = vpop.eup %6023  ;;  %5642 = vmatpush3.bf16.msra.mxu0 %v3510_v40  ;;  %5643 = vmatprep.mubr.msk.bf16.mxu0 %vm6269_vm1, %v6268_v7 }
0x1a60   :  { %v3353_v58 = vmul.f32 %v6024_v53, %v6016_v36  ;;  %5655 = vmatprep.subr.bf16.mxu0 %v6268_v7 }
0x1a62   :  { %v3355_v59 = vpack.c.bf16 %v3353_v58, %v3352_v57  ;;  %v5072_v58 = vld [vmem:[%s7478_s8 + $0x1] ss:$0 sm:$0xff] }
0x1a64   :  { %5638 = vmatmul.mubr.msk.bf16.vlgmr.msra.gmra.mrb[112].mxu1 %vm276_vm2, %v3355_v59  ;;  %v3503_v60 = vrot.slane %v3355_v59, 4 }
0x1a65   :  { %5651 = vmatprep.mubr.msk.bf16.mxu1 %vm6269_vm1, %v6268_v7  ;;  %5648 = vmatpush3.bf16.msra.mxu1 %v5899_v61 }
0x1a66   :  { %5644 = vmatmul.mubr.msk.bf16.vlgmr.msra.gmra.mrb[104].mxu0 %vm276_vm2, %v3503_v60  ;;  %5649 = vmatprep.subr.bf16.mxu1 %v6268_v7 }
0x1a67   :  { %5659 = vmatprep.mubr.msk.bf16.mxu0 %vm6269_vm1, %v6268_v7 }
0x1a69   :  { %5650 = vmatpush3.bf16.msra.mxu1 %v5900_v32 }
0x1a6a   :  { %5663 = vmatprep.subr.bf16.mxu1 %v6268_v7 }
0x1b2f   :  { %v3398_v63 = vpop.f32.mrb[108].mxu1 }
0x1b30   :  { %v5627_v48 = vpop.f32.mrb[109].mxu1 }
0x1b31   :  { %v3401_v2 = vpop.f32.mrb[110].mxu1  ;;  %v3448_v56 = vpop.f32.mrb[100].mxu0 }
0x1b32   :  { %v5851_v3 = vpack.i.bf16 %v3448_v56, %v7143_v26  ;;  %v5628_v33 = vpop.f32.mrb[111].mxu1  ;;  %v5633_v4 = vpop.f32.mrb[101].mxu0 }
0x1b33   :  { %v3451_v5 = vpop.f32.mrb[102].mxu0 }
0x1b34   :  { %5852 = vrot.lane.b32.xlu1 %v5851_v3, %s7496_s11  ;;  %v5634_v6 = vpop.f32.mrb[103].mxu0 }
0x1b37   :  { %v3496_v9 = vpop.f32.mrb[112].mxu1 }
0x1b38   :  { %v5856_v42 = vpack.i.bf16 %v3496_v9, %v7145_v8  ;;  %v5639_v10 = vpop.f32.mrb[113].mxu1 }
0x1b39   :  { %v3499_v12 = vpop.f32.mrb[114].mxu1  ;;  %v3546_v50 = vpop.f32.mrb[104].mxu0 }
0x1b3a   :  { %v5861_v13 = vpack.i.bf16 %v3546_v50, %v7147_v43  ;;  %v5645_v11 = vpop.f32.mrb[105].mxu0  ;;  %5857 = vrot.lane.b32.xlu0 %v5856_v42, %s6280_s10  ;;  %v5640_v26 = vpop.f32.mrb[115].mxu1 }
0x1b3b   :  { %v3549_v16 = vpop.f32.mrb[106].mxu0 }
0x1b3c   :  { %5862 = vrot.lane.b32.xlu1 %v5861_v13, %s6281_s21  ;;  %v5646_v17 = vpop.f32.mrb[107].mxu0 }
0x1ba6   :  { %v5853_v20 = vpop.permute.xlu1 %5852 }
0x1ba7   :  { %v5855_v23 = vunpack.i.h.bf16 %v5853_v20  ;;  %v5854_v25 = vunpack.i.l.bf16 %v5853_v20 }
0x1ba9   :  { %v3104_v8 = vsel %vm276_vm2, %v7141_v15, %v5854_v25  ;;  %v3564_v18 = vsel %vm276_vm2, %v3398_v63, %v5855_v23  ;;  %v6069_v25 = vld [vmem:[%s7474_s4] ss:$0 sm:$0xff] }
0x1bac   :  { %v5858_v41 = vpop.permute.xlu0 %5857 }
0x1bad   :  { %v5860_v28 = vunpack.i.h.bf16 %v5858_v41  ;;  %v5859_v46 = vunpack.i.l.bf16 %v5858_v41 }
0x1bae   :  { %v5863_v43 = vpop.permute.xlu1 %5862 }
0x1baf   :  { %v3565_v29 = vsel %vm733_vm4, %v3564_v18, %v5860_v28  ;;  %v3105_v21 = vsel %vm733_vm4, %v3104_v8, %v5859_v46  ;;  %v5865_v24 = vunpack.i.h.bf16 %v5863_v43  ;;  %v5864_v30 = vunpack.i.l.bf16 %v5863_v43 }
0x1bb1   :  { %v3106_v31 = vsel %vm735_vm5, %v3105_v21, %v5864_v30  ;;  %v3566_v54 = vsel %vm735_vm5, %v3565_v29, %v5865_v24 }
0x1bb2   :  { %v3572_v35 = vpack.c.bf16 %v3566_v54, %v3106_v31 }
0x1bb4   :  { %5652 = vmatmul.mubr.msk.bf16.vlgmr.msra.gmra.mrb[116].mxu1 %vm187_vm0, %v3572_v35 }
0x1bb5   :  { %5667 = vmatprep.mubr.msk.bf16.mxu1 %vm6269_vm1, %v6268_v7 }
0x1c87   :  { %v3622_v15 = vpop.f32.mrb[116].mxu1 }
0x1c88   :  { %v7214_v36 = vadd.f32 %v3622_v15, %v7000_v19  ;;  %v5653_v37 = vpop.f32.mrb[117].mxu1  ;;  %v5901_v19 = vld [vmem:[#allocation10 + $0x10] sm:$0xff]  }
0x1c89   :  { %v3625_v62 = vpop.f32.mrb[118].mxu1  ;;  %5664 = vmatpush3.bf16.msra.mxu1 %v5901_v19 }
0x1c8a   :  { %v7217_v38 = vadd.f32 %v3625_v62, %v7002_v22  ;;  %v5654_v14 = vpop.f32.mrb[119].mxu1  ;;  %v3633_v44 = vmul.f32 %v7214_v36, %v7214_v36  ;;  %5665 = vmatprep.subr.bf16.mxu1 %v6268_v7  ;;  %v5903_v22 = vld [vmem:[#allocation8 + $0x10] sm:$0xff]  }
0x1c8b   :  { %5656 = vmatpush3.bf16.msra.mxu0 %v5903_v22 }
0x1c8c   :  { %v3635_v27 = vsel %vm187_vm0, %v3633_v44, 0.0  ;;  %v3634_v47 = vmul.f32 %v7217_v38, %v7217_v38  ;;  %5657 = vmatprep.subr.bf16.mxu0 %v6268_v7 }
0x1c8d   :  { %3636 = vadd.xlane.f32.xlu0 %v3635_v27  ;;  %5666 = vmatpush3.bf16.msra.mxu1 %v5902_v39 }
0x1c8e   :  { %v3638_v49 = vsel %vm187_vm0, %v3634_v47, 0.0  ;;  %5677 = vmatprep.subr.bf16.mxu1 %v6268_v7 }
0x1c8f   :  { %3639 = vadd.xlane.f32.xlu1 %v3638_v49  ;;  %5658 = vmatpush3.bf16.msra.mxu0 %v5904_v34 }
0x1c90   :  { %5668 = vmatmul.mubr.msk.bf16.vlgmr.msra.gmra.mrb[120].mxu1 %vm187_vm0, %v6770_v55  ;;  %5671 = vmatprep.subr.bf16.mxu0 %v6268_v7 }
0x1c91   :  { %5679 = vmatprep.mubr.msk.bf16.mxu1 %vm6269_vm1, %v6268_v7 }
0x1d1a   :  { %v3637_v51 = vpop.xlane.xlu0 %3636 }
0x1d1b   :  { %v3641_v45 = vmul.f32 0.03125, %v3637_v51 }
0x1d1c   :  { %v3640_v0 = vpop.xlane.xlu1 %3639 }
0x1d1d   :  { %v3643_v1 = vadd.f32 1e-06, %v3641_v45  ;;  %v3642_v52 = vmul.f32 0.03125, %v3640_v0 }
0x1d1f   :  { %6025 = vrsqrt.f32 %v3643_v1  ;;  %v3644_v40 = vadd.f32 1e-06, %v3642_v52 }
0x1d21   :  { %6027 = vrsqrt.f32 %v3644_v40 }
0x1d29   :  { %v6026_v55 = vpop.eup %6025 }
0x1d2a   :  { %v3647_v53 = vmul.f32 %v6026_v55, %v7214_v36 }
0x1d2b   :  { %v6028_v57 = vpop.eup %6027 }
0x1d2c   :  { %v3648_v59 = vmul.f32 %v6028_v57, %v7217_v38  ;;  %v3655_v60 = vmul.f32 %v5072_v58, %v3647_v53 }
0x1d2e   :  { %v3656_v61 = vmul.f32 %v5072_v58, %v3648_v59 }
0x1d30   :  { %v3662_v63 = vpack.c.bf16 %v3656_v61, %v3655_v60 }
0x1d32   :  { %5660 = vmatmul.mubr.msk.bf16.vlgmr.msra.gmra.mrb[108].mxu0 %vm187_vm0, %v3662_v63 }
0x1d33   :  { %5673 = vmatprep.mubr.msk.bf16.mxu0 %vm6269_vm1, %v6268_v7 }
0x1d63   :  { %v3771_v48 = vpop.f32.mrb[120].mxu1 }
0x1d64   :  { %v5669_v32 = vpop.f32.mrb[121].mxu1 }
0x1d65   :  { %v3774_v2 = vpop.f32.mrb[122].mxu1 }
0x1d66   :  { %v7241_v56 = vpack.c.bf16 %v3774_v2, %v3771_v48  ;;  %v5670_v3 = vpop.f32.mrb[123].mxu1 }
0x1d68   :  { %3829 = vrot.lane.b32.xlu0 %v7241_v56, %s6270_s30  ;;  %v3783_v33 = vsel %vm276_vm2, %v7241_v56, 0  ;;  %v7303_v2 = vrot.slane %v7241_v56, 4 }
0x1d69   :  { %5672 = vmatpush3.bf16.xpose.msra.mxu0 %v3783_v33 }
0x1d6a   :  { %5683 = vmatprep.subr.bf16.mxu0 %v6268_v7 }
0x1d6c   :  { %3879 = vrot.lane.b32.xlu0 %v7241_v56, %s6275_s24 }
0x1dda   :  { %v3830_v4 = vpop.permute.xlu0 %3829 }
0x1ddb   :  { %v3835_v5 = vsel %vm276_vm2, %v3830_v4, 0 }
0x1ddc   :  { %5678 = vmatpush3.bf16.xpose.msra.mxu1 %v3835_v5 }
0x1ddd   :  { %5689 = vmatprep.subr.bf16.mxu1 %v6268_v7 }
0x1dde   :  { %v3880_v42 = vpop.permute.xlu0 %3879 }
0x1ddf   :  { %v3885_v13 = vsel %vm276_vm2, %v3880_v42, 0 }
0x1e05   :  { %v3712_v6 = vpop.f32.mrb[108].mxu0 }
0x1e06   :  { %v5661_v9 = vpop.f32.mrb[109].mxu0 }
0x1e07   :  { %v3715_v10 = vpop.f32.mrb[110].mxu0 }
0x1e08   :  { %v7252_v12 = vpack.c.bf16 %v3715_v10, %v3712_v6  ;;  %v5662_v50 = vpop.f32.mrb[111].mxu0 }
0x1e0a   :  { %3826 = vrot.lane.b32.xlu1 %v7252_v12, %s6270_s30  ;;  %3877 = vrot.lane.b32.xlu0 %v7252_v12, %s6275_s24  ;;  %v7298_v32 = vrot.slane %v7252_v12, 4 }
0x1e0b   :  { %5674 = vmatmul.mubr.msk.bf16.vlgmr.msra.gmra.mrb[112].mxu0 %vm276_vm2, %v7252_v12 }
0x1e0c   :  { %5684 = vmatpush3.bf16.xpose.msra.mxu0 %v3885_v13  ;;  %5685 = vmatprep.mubr.msk.bf16.mxu0 %vm6269_vm1, %v6268_v7 }
0x1e0d   :  { %5695 = vmatprep.subr.bf16.mxu0 %v6268_v7 }
0x1e0e   :  { %3929 = vrot.lane.b32.xlu1 %v7241_v56, %s6276_s1 }
0x1e12   :  { %3927 = vrot.lane.b32.xlu1 %v7252_v12, %s6276_s1 }
0x1e7c   :  { %v3827_v11 = vpop.permute.xlu1 %3826  ;;  %v3878_v26 = vpop.permute.xlu0 %3877 }
0x1e7d   :  { %5680 = vmatmul.mubr.msk.bf16.vlgmr.msra.gmra.mrb[124].mxu1 %vm276_vm2, %v3827_v11  ;;  %5686 = vmatmul.mubr.msk.bf16.vlgmr.msra.gmra.mrb[116].mxu0 %vm276_vm2, %v3878_v26 }
0x1e7e   :  { %5691 = vmatprep.mubr.msk.bf16.mxu1 %vm6269_vm1, %v6268_v7  ;;  %5697 = vmatprep.mubr.msk.bf16.mxu0 %vm6269_vm1, %v6268_v7 }
0x1e80   :  { %v3930_v16 = vpop.permute.xlu1 %3929 }
0x1e81   :  { %v3935_v17 = vsel %vm276_vm2, %v3930_v16, 0 }
0x1e82   :  { %5690 = vmatpush3.bf16.xpose.msra.mxu1 %v3935_v17 }
0x1e83   :  { %5701 = vmatprep.subr.bf16.mxu1 %v6268_v7 }
0x1e84   :  { %v3928_v20 = vpop.permute.xlu1 %3927 }
0x1e89   :  { %5692 = vmatmul.mubr.msk.bf16.vlgmr.msra.gmra.mrb[128].mxu1 %vm276_vm2, %v3928_v20 }
0x1e8a   :  { %5703 = vmatprep.mubr.msk.bf16.mxu1 %vm6269_vm1, %v6268_v7 }
0x1ede   :  { %v3819_v23 = vpop.f32.mrb[112].mxu0 }
0x1edf   :  { %v3977_v41 = vadd.f32 %v6069_v25, %v3819_v23  ;;  %v5675_v28 = vpop.f32.mrb[113].mxu0 }
0x1ee0   :  { %v3822_v46 = vpop.f32.mrb[114].mxu0 }
0x1ee1   :  { %v5676_v8 = vpop.f32.mrb[115].mxu0  ;;  %v3981_v18 = vsel %vm276_vm2, %v3977_v41, -inf }
0x1ee2   :  { %3982 = vmax.xlane.f32.xlu0 %v3981_v18 }
0x1f50   :  { %v3871_v43 = vpop.f32.mrb[124].mxu1  ;;  %v3921_v29 = vpop.f32.mrb[116].mxu0 }
0x1f51   :  { %v3978_v21 = vadd.f32 %v6069_v25, %v3871_v43  ;;  %v3979_v24 = vadd.f32 %v6069_v25, %v3921_v29  ;;  %v5681_v30 = vpop.f32.mrb[125].mxu1  ;;  %v5687_v31 = vpop.f32.mrb[117].mxu0 }
0x1f52   :  { %v3874_v54 = vpop.f32.mrb[126].mxu1  ;;  %v3924_v35 = vpop.f32.mrb[118].mxu0 }
0x1f53   :  { %v5682_v15 = vpop.f32.mrb[127].mxu1  ;;  %v5688_v37 = vpop.f32.mrb[119].mxu0  ;;  %v3987_v62 = vsel %vm276_vm2, %v3979_v24, -inf  ;;  %v3984_v14 = vsel %vm276_vm2, %v3978_v21, -inf }
0x1f54   :  { %3988 = vmax.xlane.f32.xlu0 %v3987_v62  ;;  %3985 = vmax.xlane.f32.xlu1 %v3984_v14 }
0x1f5c   :  { %v3971_v44 = vpop.f32.mrb[128].mxu1 }
0x1f5d   :  { %v3980_v27 = vadd.f32 %v6069_v25, %v3971_v44  ;;  %v5693_v47 = vpop.f32.mrb[129].mxu1 }
0x1f5e   :  { %v3974_v49 = vpop.f32.mrb[130].mxu1 }
0x1f5f   :  { %v5694_v19 = vpop.f32.mrb[131].mxu1  ;;  %v3990_v39 = vsel %vm276_vm2, %v3980_v27, -inf }
0x1f60   :  { %3991 = vmax.xlane.f32.xlu0 %v3990_v39 }
0x1f65   :  { %4027 = vrot.lane.b32.xlu1 %v7241_v56, %s6271_s26 }
0x1f6f   :  { %v3983_v22 = vpop.xlane.xlu0 %3982 }
0x1f70   :  { %v3993_v34 = vsub.f32 %v3977_v41, %v3983_v22 }
0x1f72   :  { %v3997_v51 = vmul.f32 1.442695, %v3993_v34 }
0x1f74   :  { %6029 = vpow2.f32 %v3997_v51 }
0x1f7e   :  { %v6030_v45 = vpop.eup %6029 }
0x1f7f   :  { %v4005_v0 = vsel %vm276_vm2, %v6030_v45, 0.0 }
0x1f89   :  { %4006 = vadd.xlane.f32.xlu1 %v4005_v0 }
0x1f9a   :  { %4125 = vrot.lane.b32.xlu1 %v7241_v56, %s6273_s0 }
0x1f9e   :  { %4175 = vrot.lane.b32.xlu1 %v7241_v56, %s6274_s9 }
0x1fe1   :  { %v3989_v1 = vpop.xlane.xlu0 %3988  ;;  %v3986_v52 = vpop.xlane.xlu1 %3985 }
0x1fe2   :  { %v3995_v40 = vsub.f32 %v3979_v24, %v3989_v1  ;;  %v3994_v55 = vsub.f32 %v3978_v21, %v3986_v52  ;;  %v4244_v24 = vsel %vm276_vm2, %v7303_v2, 0 }
0x1fe4   :  { %v4001_v53 = vmul.f32 1.442695, %v3995_v40  ;;  %v3999_v57 = vmul.f32 1.442695, %v3994_v55 }
0x1fe5   :  { %v4028_v58 = vpop.permute.xlu1 %4027 }
0x1fe6   :  { %6031 = vpow2.f32 %v4001_v53  ;;  %v4033_v59 = vsel %vm528_vm3, %v4028_v58, 0 }
0x1fe7   :  { %6033 = vpow2.f32 %v3999_v57  ;;  %5696 = vmatpush3.bf16.msra.mxu0 %v4033_v59  ;;  %v6070_v59 = vld [vmem:[%s7474_s4 + $0x1] ss:$0 sm:$0xff] }
0x1fe8   :  { %5707 = vmatprep.subr.bf16.mxu0 %v6268_v7 }
0x1fed   :  { %v3992_v3 = vpop.xlane.xlu0 %3991 }
0x1fee   :  { %v3996_v33 = vsub.f32 %v3980_v27, %v3992_v3 }
0x1ff0   :  { %v6032_v60 = vpop.eup %6031  ;;  %v4003_v4 = vmul.f32 1.442695, %v3996_v33 }
0x1ff1   :  { %v6034_v61 = vpop.eup %6033  ;;  %v4011_v63 = vsel %vm276_vm2, %v6032_v60, 0.0 }
0x1ff2   :  { %4012 = vadd.xlane.f32.xlu1 %v4011_v63  ;;  %v4008_v48 = vsel %vm276_vm2, %v6034_v61, 0.0  ;;  %6035 = vpow2.f32 %v4003_v4 }
0x1ff3   :  { %4009 = vadd.xlane.f32.xlu0 %v4008_v48 }
0x1ffc   :  { %v6036_v5 = vpop.eup %6035 }
0x1ffd   :  { %v4014_v6 = vsel %vm276_vm2, %v6036_v5, 0.0 }
0x2003   :  { %4286 = vrot.lane.b32.xlu1 %v7298_v32, %s6270_s30 }
0x2007   :  { %4388 = vrot.lane.b32.xlu1 %v7303_v2, %s6276_s1 }
0x2009   :  { %4077 = vrot.lane.b32.xlu0 %v7241_v56, %s6272_s18 }
0x200b   :  { %4386 = vrot.lane.b32.xlu1 %v7298_v32, %s6276_s1 }
0x2016   :  { %v4007_v56 = vpop.xlane.xlu1 %4006 }
0x2017   :  { %6037 = vrcp.f32 %v4007_v56 }
0x201a   :  { %v4126_v50 = vpop.permute.xlu1 %4125 }
0x201b   :  { %v4131_v20 = vsel %vm528_vm3, %v4126_v50, 0 }
0x201e   :  { %v4176_v17 = vpop.permute.xlu1 %4175 }
0x201f   :  { %v4181_v25 = vsel %vm528_vm3, %v4176_v17, 0 }
0x2021   :  { %v6038_v12 = vpop.eup %6037 }
0x2022   :  { %v4021_v11 = vmul.f32 %v6038_v12, %v6030_v45 }
0x2028   :  { %4015 = vadd.xlane.f32.xlu0 %v4014_v6 }
0x203e   :  { %4288 = vrot.lane.b32.xlu0 %v7303_v2, %s6270_s30 }
0x2042   :  { %4338 = vrot.lane.b32.xlu0 %v7303_v2, %s6275_s24 }
0x2046   :  { %4336 = vrot.lane.b32.xlu0 %v7298_v32, %s6275_s24 }
0x207f   :  { %v4013_v41 = vpop.xlane.xlu1 %4012 }
0x2080   :  { %v4010_v9 = vpop.xlane.xlu0 %4009 }
0x2081   :  { %6039 = vrcp.f32 %v4010_v9 }
0x2082   :  { %6041 = vrcp.f32 %v4013_v41 }
0x2083   :  { %v4287_v31 = vpop.permute.xlu1 %4286 }
0x2084   :  { %v4078_v42 = vpop.permute.xlu0 %4077 }
0x2085   :  { %v4083_v10 = vsel %vm528_vm3, %v4078_v42, 0 }
0x2086   :  { %5702 = vmatpush3.bf16.msra.mxu1 %v4083_v10 }
0x2087   :  { %5713 = vmatprep.subr.bf16.mxu1 %v6268_v7  ;;  %v4389_v15 = vpop.permute.xlu1 %4388 }
0x2088   :  { %v4394_v62 = vsel %vm276_vm2, %v4389_v15, 0 }
0x208b   :  { %v6040_v13 = vpop.eup %6039  ;;  %v4387_v44 = vpop.permute.xlu1 %4386 }
0x208c   :  { %v4022_v26 = vmul.f32 %v6040_v13, %v6034_v61  ;;  %v6042_v46 = vpop.eup %6041 }
0x208d   :  { %v4023_v18 = vmul.f32 %v6042_v46, %v6032_v60 }
0x208e   :  { %v4025_v16 = vpack.c.bf16 %v4022_v26, %v4021_v11 }
0x2090   :  { %5698 = vmatmul.mubr.msk.bf16.vlgmr.msra.gmra.mrb[120].mxu0 %vm276_vm2, %v4025_v16  ;;  %v4076_v23 = vrot.slane %v4025_v16, 4 }
0x2091   :  { %5708 = vmatpush3.bf16.msra.mxu0 %v4131_v20  ;;  %5709 = vmatprep.mubr.msk.bf16.mxu0 %vm6269_vm1, %v6268_v7 }
0x2092   :  { %5704 = vmatmul.mubr.msk.bf16.vlgmr.msra.gmra.mrb[132].mxu1 %vm276_vm2, %v4076_v23  ;;  %5719 = vmatprep.subr.bf16.mxu0 %v6268_v7 }
0x2093   :  { %5714 = vmatpush3.bf16.msra.mxu1 %v4181_v25  ;;  %5715 = vmatprep.mubr.msk.bf16.mxu1 %vm6269_vm1, %v6268_v7 }
0x2094   :  { %5725 = vmatprep.subr.bf16.mxu1 %v6268_v7 }
0x20b5   :  { %v4016_v28 = vpop.xlane.xlu0 %4015 }
0x20b6   :  { %6043 = vrcp.f32 %v4016_v28 }
0x20b9   :  { %v4289_v21 = vpop.permute.xlu0 %4288 }
0x20ba   :  { %v4294_v54 = vsel %vm276_vm2, %v4289_v21, 0 }
0x20bd   :  { %v4339_v35 = vpop.permute.xlu0 %4338 }
0x20be   :  { %v4344_v37 = vsel %vm276_vm2, %v4339_v35, 0 }
0x20c0   :  { %v6044_v8 = vpop.eup %6043 }
0x20c1   :  { %v4024_v43 = vmul.f32 %v6044_v8, %v6036_v5  ;;  %v4337_v14 = vpop.permute.xlu0 %4336 }
0x20c3   :  { %v4026_v29 = vpack.c.bf16 %v4024_v43, %v4023_v18 }
0x20c5   :  { %5710 = vmatmul.mubr.msk.bf16.vlgmr.msra.gmra.mrb[124].mxu0 %vm276_vm2, %v4026_v29  ;;  %v4174_v30 = vrot.slane %v4026_v29, 4 }
0x20c6   :  { %5720 = vmatpush3.bf16.xpose.msra.mxu0 %v4244_v24  ;;  %5721 = vmatprep.mubr.msk.bf16.mxu0 %vm6269_vm1, %v6268_v7 }
0x20c7   :  { %5716 = vmatmul.mubr.msk.bf16.vlgmr.msra.gmra.mrb[136].mxu1 %vm276_vm2, %v4174_v30  ;;  %5731 = vmatprep.subr.bf16.mxu0 %v6268_v7 }
0x20c8   :  { %5726 = vmatpush3.bf16.xpose.msra.mxu1 %v4294_v54  ;;  %5727 = vmatprep.mubr.msk.bf16.mxu1 %vm6269_vm1, %v6268_v7 }
0x20c9   :  { %5737 = vmatprep.subr.bf16.mxu1 %v6268_v7 }
0x20cd   :  { %5722 = vmatmul.mubr.msk.bf16.vlgmr.msra.gmra.mrb[128].mxu0 %vm276_vm2, %v7298_v32 }
0x20ce   :  { %5732 = vmatpush3.bf16.xpose.msra.mxu0 %v4344_v37  ;;  %5733 = vmatprep.mubr.msk.bf16.mxu0 %vm6269_vm1, %v6268_v7 }
0x20cf   :  { %5728 = vmatmul.mubr.msk.bf16.vlgmr.msra.gmra.mrb[140].mxu1 %vm276_vm2, %v4287_v31  ;;  %5743 = vmatprep.subr.bf16.mxu0 %v6268_v7 }
0x20d0   :  { %5738 = vmatpush3.bf16.xpose.msra.mxu1 %v4394_v62  ;;  %5739 = vmatprep.mubr.msk.bf16.mxu1 %vm6269_vm1, %v6268_v7 }
0x20d1   :  { %5749 = vmatprep.subr.bf16.mxu1 %v6268_v7 }
0x20d5   :  { %5734 = vmatmul.mubr.msk.bf16.vlgmr.msra.gmra.mrb[132].mxu0 %vm276_vm2, %v4337_v14 }
0x20d6   :  { %5745 = vmatprep.mubr.msk.bf16.mxu0 %vm6269_vm1, %v6268_v7 }
0x20d7   :  { %5740 = vmatmul.mubr.msk.bf16.vlgmr.msra.gmra.mrb[144].mxu1 %vm276_vm2, %v4387_v44 }
0x20d8   :  { %5751 = vmatprep.mubr.msk.bf16.mxu1 %vm6269_vm1, %v6268_v7 }
0x2163   :  { %v7358_v27 = vpop.f32.mrb[120].mxu0 }
0x2164   :  { %v5699_v47 = vpop.f32.mrb[121].mxu0 }
0x2165   :  { %v4072_v49 = vpop.f32.mrb[122].mxu0  ;;  %v7360_v19 = vpop.f32.mrb[132].mxu1 }
0x2166   :  { %v5700_v39 = vpop.f32.mrb[123].mxu0  ;;  %v5705_v22 = vpop.f32.mrb[133].mxu1 }
0x2167   :  { %v4122_v34 = vpop.f32.mrb[134].mxu1 }
0x2168   :  { %v5706_v51 = vpop.f32.mrb[135].mxu1 }
0x2198   :  { %v7362_v45 = vpop.f32.mrb[124].mxu0 }
0x2199   :  { %v5711_v0 = vpop.f32.mrb[125].mxu0 }
0x219a   :  { %v4170_v1 = vpop.f32.mrb[126].mxu0  ;;  %v7364_v52 = vpop.f32.mrb[136].mxu1 }
0x219b   :  { %v5712_v40 = vpop.f32.mrb[127].mxu0  ;;  %v5717_v55 = vpop.f32.mrb[137].mxu1 }
0x219c   :  { %v4220_v53 = vpop.f32.mrb[138].mxu1 }
0x219d   :  { %v5718_v57 = vpop.f32.mrb[139].mxu1 }
0x21a0   :  { %v4280_v58 = vpop.f32.mrb[128].mxu0 }
0x21a1   :  { %v4436_v60 = vadd.f32 %v6070_v59, %v4280_v58  ;;  %v5723_v61 = vpop.f32.mrb[129].mxu0 }
0x21a2   :  { %v4283_v63 = vpop.f32.mrb[130].mxu0  ;;  %v4330_v48 = vpop.f32.mrb[140].mxu1 }
0x21a3   :  { %v4437_v32 = vadd.f32 %v6070_v59, %v4330_v48  ;;  %v5724_v3 = vpop.f32.mrb[131].mxu0  ;;  %v5729_v33 = vpop.f32.mrb[141].mxu1  ;;  %v4440_v4 = vsel %vm276_vm2, %v4436_v60, -inf }
0x21a4   :  { %4441 = vmax.xlane.f32.xlu0 %v4440_v4  ;;  %v4333_v5 = vpop.f32.mrb[142].mxu1 }
0x21a5   :  { %v5730_v6 = vpop.f32.mrb[143].mxu1  ;;  %v4443_v56 = vsel %vm276_vm2, %v4437_v32, -inf }
0x21a6   :  { %4444 = vmax.xlane.f32.xlu1 %v4443_v56  ;;  %v5905_v56 = vld [vmem:[#allocation11 + $0x10] sm:$0xff]  }
0x21a8   :  { %v4380_v9 = vpop.f32.mrb[132].mxu0 }
0x21a9   :  { %v4438_v42 = vadd.f32 %v6070_v59, %v4380_v9  ;;  %v5735_v10 = vpop.f32.mrb[133].mxu0 }
0x21aa   :  { %v4383_v12 = vpop.f32.mrb[134].mxu0  ;;  %v4430_v50 = vpop.f32.mrb[144].mxu1 }
0x21ab   :  { %v4439_v13 = vadd.f32 %v6070_v59, %v4430_v50  ;;  %v5736_v11 = vpop.f32.mrb[135].mxu0  ;;  %v5741_v26 = vpop.f32.mrb[145].mxu1  ;;  %v4446_v16 = vsel %vm276_vm2, %v4438_v42, -inf }
0x21ac   :  { %4447 = vmax.xlane.f32.xlu0 %v4446_v16  ;;  %v4433_v17 = vpop.f32.mrb[146].mxu1 }
0x21ad   :  { %v5742_v20 = vpop.f32.mrb[147].mxu1  ;;  %v4449_v23 = vsel %vm276_vm2, %v4439_v13, -inf }
0x21b0   :  { %4450 = vmax.xlane.f32.xlu0 %v4449_v23 }
0x21b7   :  { %4486 = vrot.lane.b32.xlu1 %v7303_v2, %s6271_s26 }
0x2231   :  { %v4442_v25 = vpop.xlane.xlu0 %4441 }
0x2232   :  { %v4452_v41 = vsub.f32 %v4436_v60, %v4442_v25 }
0x2233   :  { %v4445_v28 = vpop.xlane.xlu1 %4444 }
0x2234   :  { %v4456_v46 = vmul.f32 1.442695, %v4452_v41  ;;  %v4453_v8 = vsub.f32 %v4437_v32, %v4445_v28 }
0x2236   :  { %6045 = vpow2.f32 %v4456_v46  ;;  %v4458_v18 = vmul.f32 1.442695, %v4453_v8 }
0x2237   :  { %v4487_v43 = vpop.permute.xlu1 %4486 }
0x2238   :  { %6047 = vpow2.f32 %v4458_v18  ;;  %v4492_v29 = vsel %vm528_vm3, %v4487_v43, 0 }
0x2239   :  { %v4448_v21 = vpop.xlane.xlu0 %4447  ;;  %5744 = vmatpush3.bf16.msra.mxu0 %v4492_v29 }
0x223a   :  { %v4454_v24 = vsub.f32 %v4438_v42, %v4448_v21  ;;  %5755 = vmatprep.subr.bf16.mxu0 %v6268_v7 }
0x223c   :  { %v4460_v30 = vmul.f32 1.442695, %v4454_v24 }
0x223d   :  { %v4451_v31 = vpop.xlane.xlu0 %4450 }
0x223e   :  { %6049 = vpow2.f32 %v4460_v30  ;;  %v4455_v54 = vsub.f32 %v4439_v13, %v4451_v31  ;;  %v5906_v13 = vld [vmem:[#allocation11 + $0x18] sm:$0xff]  }
0x2240   :  { %v6046_v35 = vpop.eup %6045  ;;  %v4462_v15 = vmul.f32 1.442695, %v4455_v54 }
0x2241   :  { %v4464_v37 = vsel %vm276_vm2, %v6046_v35, 0.0 }
0x2242   :  { %v6048_v62 = vpop.eup %6047  ;;  %6051 = vpow2.f32 %v4462_v15  ;;  %4465 = vadd.xlane.f32.xlu1 %v4464_v37 }
0x2243   :  { %v4467_v14 = vsel %vm276_vm2, %v6048_v62, 0.0 }
0x2244   :  { %4468 = vadd.xlane.f32.xlu0 %v4467_v14 }
0x2248   :  { %v6050_v44 = vpop.eup %6049 }
0x2249   :  { %v4470_v47 = vsel %vm276_vm2, %v6050_v44, 0.0 }
0x224a   :  { %4471 = vadd.xlane.f32.xlu1 %v4470_v47 }
0x224c   :  { %v6052_v49 = vpop.eup %6051 }
0x224d   :  { %v4473_v39 = vsel %vm276_vm2, %v6052_v49, 0.0 }
0x224e   :  { %4474 = vadd.xlane.f32.xlu0 %v4473_v39 }
0x225b   :  { %4584 = vrot.lane.b32.xlu1 %v7303_v2, %s6273_s0 }
0x225f   :  { %4634 = vrot.lane.b32.xlu1 %v7303_v2, %s6274_s9 }
0x2264   :  { %4536 = vrot.lane.b32.xlu0 %v7303_v2, %s6272_s18 }
0x22cf   :  { %v4466_v22 = vpop.xlane.xlu1 %4465 }
0x22d0   :  { %6053 = vrcp.f32 %v4466_v22 }
0x22d1   :  { %v4469_v34 = vpop.xlane.xlu0 %4468 }
0x22d2   :  { %6055 = vrcp.f32 %v4469_v34 }
0x22d7   :  { %v4472_v51 = vpop.xlane.xlu1 %4471 }
0x22d8   :  { %6057 = vrcp.f32 %v4472_v51 }
0x22da   :  { %v6054_v0 = vpop.eup %6053 }
0x22db   :  { %v4585_v1 = vpop.permute.xlu1 %4584  ;;  %v4475_v40 = vpop.xlane.xlu0 %4474  ;;  %v4480_v53 = vmul.f32 %v6054_v0, %v6046_v35 }
0x22dc   :  { %v6056_v55 = vpop.eup %6055  ;;  %6059 = vrcp.f32 %v4475_v40  ;;  %v4590_v61 = vsel %vm528_vm3, %v4585_v1, 0 }
0x22dd   :  { %v4481_v57 = vmul.f32 %v6056_v55, %v6048_v62 }
0x22df   :  { %v4537_v58 = vpop.permute.xlu0 %4536  ;;  %v4484_v59 = vpack.c.bf16 %v4481_v57, %v4480_v53  ;;  %v4635_v2 = vpop.permute.xlu1 %4634  ;;  %v5907_v57 = vld [vmem:[#allocation13 + $0x10] sm:$0xff]  }
0x22e0   :  { %v4542_v60 = vsel %vm528_vm3, %v4537_v58, 0  ;;  %v4640_v32 = vsel %vm528_vm3, %v4635_v2, 0  ;;  %v5908_v58 = vld [vmem:[#allocation13 + $0x18] sm:$0xff]  }
0x22e1   :  { %5746 = vmatmul.mubr.msk.bf16.vlgmr.msra.gmra.mrb[136].mxu0 %vm276_vm2, %v4484_v59  ;;  %5750 = vmatpush3.bf16.msra.mxu1 %v4542_v60  ;;  %v4535_v63 = vrot.slane %v4484_v59, 4 }
0x22e2   :  { %5756 = vmatpush3.bf16.msra.mxu0 %v4590_v61  ;;  %5761 = vmatprep.subr.bf16.mxu1 %v6268_v7  ;;  %v6058_v48 = vpop.eup %6057 }
0x22e3   :  { %5757 = vmatprep.mubr.msk.bf16.mxu0 %vm6269_vm1, %v6268_v7  ;;  %5767 = vmatprep.subr.bf16.mxu0 %v6268_v7  ;;  %v4482_v33 = vmul.f32 %v6058_v48, %v6050_v44 }
0x22e4   :  { %5752 = vmatmul.mubr.msk.bf16.vlgmr.msra.gmra.mrb[148].mxu1 %vm276_vm2, %v4535_v63 }
0x22e5   :  { %5762 = vmatpush3.bf16.msra.mxu1 %v4640_v32  ;;  %5763 = vmatprep.mubr.msk.bf16.mxu1 %vm6269_vm1, %v6268_v7 }
0x22e6   :  { %v6060_v3 = vpop.eup %6059  ;;  %5775 = vmatprep.subr.bf16.mxu1 %v6268_v7 }
0x22e7   :  { %v4483_v4 = vmul.f32 %v6060_v3, %v6052_v49 }
0x22e9   :  { %v4485_v5 = vpack.c.bf16 %v4483_v4, %v4482_v33  ;;  %v5099_v4 = vld [vmem:[%s7482_s12 + $0x1] ss:$0 sm:$0xff] }
0x22eb   :  { %5758 = vmatmul.mubr.msk.bf16.vlgmr.msra.gmra.mrb[140].mxu0 %vm276_vm2, %v4485_v5  ;;  %v4633_v6 = vrot.slane %v4485_v5, 4 }
0x22ec   :  { %5771 = vmatprep.mubr.msk.bf16.mxu0 %vm6269_vm1, %v6268_v7  ;;  %5768 = vmatpush3.bf16.msra.mxu0 %v5905_v56 }
0x22ed   :  { %5764 = vmatmul.mubr.msk.bf16.vlgmr.msra.gmra.mrb[152].mxu1 %vm276_vm2, %v4633_v6  ;;  %5769 = vmatprep.subr.bf16.mxu0 %v6268_v7 }
0x22ee   :  { %5779 = vmatprep.mubr.msk.bf16.mxu1 %vm6269_vm1, %v6268_v7  ;;  %5776 = vmatpush3.bf16.msra.mxu1 %v5907_v57 }
0x22ef   :  { %5777 = vmatprep.subr.bf16.mxu1 %v6268_v7 }
0x22f0   :  { %5770 = vmatpush3.bf16.msra.mxu0 %v5906_v13 }
0x22f1   :  { %5783 = vmatprep.subr.bf16.mxu0 %v6268_v7 }
0x22f2   :  { %5778 = vmatpush3.bf16.msra.mxu1 %v5908_v58 }
0x23b4   :  { %v4528_v9 = vpop.f32.mrb[136].mxu0 }
0x23b5   :  { %v5747_v42 = vpop.f32.mrb[137].mxu0 }
0x23b6   :  { %v4531_v10 = vpop.f32.mrb[138].mxu0  ;;  %v5911_v42 = vld [vmem:[%s7484_s14 + $0x30] sm:$0xff]  }
0x23b7   :  { %v5748_v12 = vpop.f32.mrb[139].mxu0  ;;  %v4578_v50 = vpop.f32.mrb[148].mxu1  ;;  %v5912_v10 = vld [vmem:[%s7484_s14 + $0x38] sm:$0xff]  }
0x23b8   :  { %v5866_v11 = vpack.i.bf16 %v4578_v50, %v7360_v19  ;;  %v5753_v26 = vpop.f32.mrb[149].mxu1 }
0x23b9   :  { %v4581_v16 = vpop.f32.mrb[150].mxu1 }
0x23ba   :  { %5867 = vrot.lane.b32.xlu0 %v5866_v11, %s7496_s11  ;;  %v5754_v17 = vpop.f32.mrb[151].mxu1 }
0x23be   :  { %v4626_v20 = vpop.f32.mrb[140].mxu0 }
0x23bf   :  { %v5871_v23 = vpack.i.bf16 %v4626_v20, %v7362_v45  ;;  %v5759_v25 = vpop.f32.mrb[141].mxu0 }
0x23c0   :  { %v4629_v41 = vpop.f32.mrb[142].mxu0  ;;  %v4676_v28 = vpop.f32.mrb[152].mxu1 }
0x23c1   :  { %v5876_v46 = vpack.i.bf16 %v4676_v28, %v7364_v52  ;;  %5872 = vrot.lane.b32.xlu1 %v5871_v23, %s6280_s10  ;;  %v5760_v8 = vpop.f32.mrb[143].mxu0  ;;  %v5765_v19 = vpop.f32.mrb[153].mxu1 }
0x23c2   :  { %v4679_v18 = vpop.f32.mrb[154].mxu1 }
0x23c3   :  { %5877 = vrot.lane.b32.xlu0 %v5876_v46, %s6281_s21  ;;  %v5766_v43 = vpop.f32.mrb[155].mxu1 }
0x242c   :  { %v5868_v29 = vpop.permute.xlu0 %5867 }
0x242d   :  { %v5870_v21 = vunpack.i.h.bf16 %v5868_v29  ;;  %v5869_v24 = vunpack.i.l.bf16 %v5868_v29 }
0x242f   :  { %v4694_v45 = vsel %vm276_vm2, %v4528_v9, %v5870_v21  ;;  %v4235_v35 = vsel %vm276_vm2, %v7358_v27, %v5869_v24 }
0x2433   :  { %v5873_v30 = vpop.permute.xlu1 %5872 }
0x2434   :  { %v5875_v31 = vunpack.i.h.bf16 %v5873_v30  ;;  %v5874_v54 = vunpack.i.l.bf16 %v5873_v30 }
0x2435   :  { %v5878_v52 = vpop.permute.xlu0 %5877 }
0x2436   :  { %v4236_v15 = vsel %vm733_vm4, %v4235_v35, %v5874_v54  ;;  %v4695_v37 = vsel %vm733_vm4, %v4694_v45, %v5875_v31  ;;  %v5880_v62 = vunpack.i.h.bf16 %v5878_v52  ;;  %v5879_v14 = vunpack.i.l.bf16 %v5878_v52  ;;  %v5116_v45 = vld [vmem:[%s7485_s15] ss:$0 sm:$0xff] }
0x2438   :  { %v4696_v44 = vsel %vm735_vm5, %v4695_v37, %v5880_v62  ;;  %v4237_v47 = vsel %vm735_vm5, %v4236_v15, %v5879_v14 }
0x2439   :  { %v4702_v49 = vpack.c.bf16 %v4696_v44, %v4237_v47 }
0x243b   :  { %5772 = vmatmul.mubr.msk.bf16.vlgmr.msra.gmra.mrb[144].mxu0 %vm187_vm0, %v4702_v49 }
0x243c   :  { %5791 = vmatprep.mubr.msk.bf16.mxu0 %vm6269_vm1, %v6268_v7 }
0x250e   :  { %v4752_v39 = vpop.f32.mrb[144].mxu0 }
0x250f   :  { %v4759_v27 = vadd.f32 %v4752_v39, %v7214_v36  ;;  %v5773_v22 = vpop.f32.mrb[145].mxu0  ;;  %v5909_v36 = vld [vmem:[%s7484_s14 + $0x20] sm:$0xff]  }
0x2510   :  { %v4755_v34 = vpop.f32.mrb[146].mxu0  ;;  %5784 = vmatpush3.bf16.msra.mxu0 %v5909_v36 }
0x2511   :  { %v4760_v51 = vadd.f32 %v4755_v34, %v7217_v38  ;;  %v5774_v0 = vpop.f32.mrb[147].mxu0  ;;  %v4763_v1 = vmul.f32 %v4759_v27, %v4759_v27  ;;  %v5910_v38 = vld [vmem:[%s7484_s14 + $0x28] sm:$0xff]   ;;  %5785 = vmatprep.subr.bf16.mxu0 %v6268_v7 }
0x2513   :  { %v4765_v40 = vsel %vm187_vm0, %v4763_v1, 0.0  ;;  %v4764_v55 = vmul.f32 %v4760_v51, %v4760_v51 }
0x2514   :  { %4766 = vadd.xlane.f32.xlu1 %v4765_v40  ;;  %5786 = vmatpush3.bf16.msra.mxu0 %v5910_v38 }
0x2515   :  { %v4768_v53 = vsel %vm187_vm0, %v4764_v55, 0.0  ;;  %5787 = vmatprep.subr.bf16.mxu0 %v6268_v7 }
0x2516   :  { %4769 = vadd.xlane.f32.xlu0 %v4768_v53 }
0x2518   :  { %5788 = vmatpush3.bf16.msra.mxu0 %v5911_v42 }
0x2519   :  { %5789 = vmatprep.subr.bf16.mxu0 %v6268_v7 }
0x251c   :  { %5790 = vmatpush3.bf16.msra.mxu0 %v5912_v10 }
0x25a1   :  { %v4767_v59 = vpop.xlane.xlu1 %4766 }
0x25a2   :  { %v4771_v60 = vmul.f32 0.03125, %v4767_v59 }
0x25a3   :  { %v4770_v61 = vpop.xlane.xlu0 %4769 }
0x25a4   :  { %v4773_v2 = vadd.f32 1e-06, %v4771_v60  ;;  %v4772_v63 = vmul.f32 0.03125, %v4770_v61 }
0x25a6   :  { %6061 = vrsqrt.f32 %v4773_v2  ;;  %v4774_v48 = vadd.f32 1e-06, %v4772_v63 }
0x25a8   :  { %6063 = vrsqrt.f32 %v4774_v48 }
0x25b0   :  { %v6062_v32 = vpop.eup %6061 }
0x25b1   :  { %v4777_v3 = vmul.f32 %v6062_v32, %v4759_v27 }
0x25b2   :  { %v6064_v33 = vpop.eup %6063 }
0x25b3   :  { %v4778_v5 = vmul.f32 %v6064_v33, %v4760_v51  ;;  %v4785_v6 = vmul.f32 %v5099_v4, %v4777_v3 }
0x25b5   :  { %v4786_v56 = vmul.f32 %v5099_v4, %v4778_v5 }
0x25b7   :  { %v4792_v9 = vpack.c.bf16 %v4786_v56, %v4785_v6 }
0x25b9   :  { %5780 = vmatmul.mubr.msk.bf16.vlgmr.msra.gmra.mrb[156].mxu1 %vm187_vm0, %v4792_v9 }
0x268c   :  { %v4842_v12 = vpop.f32.mrb[156].mxu1 }
0x268d   :  { %v5781_v50 = vpop.f32.mrb[157].mxu1  ;;  %v4849_v11 = vmax.f32 %v4842_v12, 0.0 }
0x268e   :  { %v4845_v13 = vpop.f32.mrb[158].mxu1 }
0x268f   :  { %v4850_v26 = vmax.f32 %v4845_v13, 0.0  ;;  %v5782_v16 = vpop.f32.mrb[159].mxu1 }
0x2691   :  { %v4860_v17 = vpack.c.bf16 %v4850_v26, %v4849_v11 }
0x2693   :  { %5792 = vmatmul.mubr.msk.bf16.vlgmr.msra.gmra.mrb[148].mxu0 %vm2511_vm6, %v4860_v17 }
0x2766   :  { %v4922_v20 = vpop.f32.mrb[148].mxu0 }
0x2767   :  { %v4929_v23 = vadd.f32 %v4922_v20, %v4759_v27  ;;  %v5793_v25 = vpop.f32.mrb[149].mxu0 }
0x2768   :  { %v4925_v41 = vpop.f32.mrb[150].mxu0 }
0x2769   :  { %v4932_v28 = vmul.f32 %v4929_v23, %v4929_v23  ;;  %v4930_v7 = vadd.f32 %v4925_v41, %v4760_v51  ;;  %v5794_v46 = vpop.f32.mrb[151].mxu0 }
0x276b   :  { %v4933_v8 = vmul.f32 %v4930_v7, %v4930_v7  ;;  %v4934_v19 = vsel %vm187_vm0, %v4932_v28, 0.0 }
0x276c   :  { %4935 = vadd.xlane.f32.xlu0 %v4934_v19 }
0x276d   :  { %v4937_v18 = vsel %vm187_vm0, %v4933_v8, 0.0 }
0x276e   :  { %4938 = vadd.xlane.f32.xlu1 %v4937_v18 }
0x27f9   :  { %v4936_v43 = vpop.xlane.xlu0 %4935 }
0x27fa   :  { %v4940_v29 = vmul.f32 0.03125, %v4936_v43 }
0x27fb   :  { %v4939_v21 = vpop.xlane.xlu1 %4938 }
0x27fc   :  { %v4942_v24 = vadd.f32 1e-06, %v4940_v29  ;;  %v4941_v30 = vmul.f32 0.03125, %v4939_v21 }
0x27fe   :  { %6065 = vrsqrt.f32 %v4942_v24  ;;  %v4943_v31 = vadd.f32 1e-06, %v4941_v30 }
0x2800   :  { %6067 = vrsqrt.f32 %v4943_v31 }
0x2808   :  { %v6066_v54 = vpop.eup %6065 }
0x2809   :  { %v4946_v35 = vmul.f32 %v6066_v54, %v4929_v23 }
0x280a   :  { %v6068_v52 = vpop.eup %6067 }
0x280b   :  { %v4947_v15 = vmul.f32 %v6068_v52, %v4930_v7  ;;  %v4954_v37 = vmul.f32 %v5116_v45, %v4946_v35 }
0x280d   :  { %v4955_v62 = vmul.f32 %v5116_v45, %v4947_v15  ;;  %4956 = vst.msk [vmem:[#allocation14] sm:$0xff] %vm187_vm0, %v4954_v37 }
0x280f   :  { %4957 = vst.msk [vmem:[#allocation14 + $0x8] sm:$0xff] %vm187_vm0, %v4955_v62 }
0x2810   :  { %6236 = shalt.err (!%p6233_p4)
}
0x2811   :  { %s6237_s13 = scalar_lea.hbm %s7486_s16, 256 }
0x2812   :  { %p6238_p5 = scmp.ne.s32.totalorder %s7486_s16, %s6237_s13  ;;  %p6241_p6 = scmp.lt.u32.totalorder %s6237_s13, %s7486_s16 }
0x2814   :  { %p6243_p7 = pnand %p6241_p6, %p6238_p5 }
0x2816   :  { %6246 = shalt.err (!%p6243_p7)
}
0x2817   :  { %4969 = dma.vmem_to_hbm [thread:$0]  %s4964_s20, 256, %s7486_s16, [#allocation4], %s7497_s23, %s7497_s23, %s7496_s11  }
0x2818   :  { %6255 = dma.done.wait [#allocation4], 256  }
0x2819   :  { %6256 = vsyncadd [#allocation4], 4294967040 }
0x281a   :  { %4973 = vsyncpa [#allocation3], 1 }
0x281b   :  { %4974 = vsyncpa [#allocation6], 1 }
0x281c   :  { %4975 = vsyncpa [#allocation9], 1 }
0x281d   :  { %4976 = vsyncpa [#allocation12], 1 }
0x281e   :  { %4977 = vsyncpa [#allocation4], 1 }

</bundles_post_ra>
